<compile_context>
chip_gen: v6e
topology: v6e:2x2x1
jax: 0.10.0
libtpu: 0.0.40
codegen_flags: <defaults>
</compile_context>

<pallas_src>
import functools

import numpy as np
import jax
import jax.numpy as jnp
from jax import lax
from jax.experimental import pallas as pl
from jax.experimental.pallas import tpu as pltpu

K = 11            # kernel size (fixed by the module)
C_IN = 76         # in channels (fixed by the module)
C_OUT = 42        # out channels (fixed by the module)
C_IN_PAD = 128    # lane-aligned padded in-channels
C_OUT_PAD = 128   # lane-dense padded out-channels
NEG_SLOPE = -0.4


def _round_up(a, b):
    return (a + b - 1) // b * b


def _convt_leaky_kernel(x_ref, w_ref, o_ref, acc_ref, patch_ref, *,
                        toh, ow_pad, b_blk):
    """One (batch-block, output-H-tile) per grid step.

    x_ref:     (b_blk, HP, WP, 128)    zero-padded input (full H resident)
    w_ref:     (K, K*128, 128)         flipped weight, kw folded into contraction
    o_ref:     (b_blk, toh, ow_pad, 128)
    acc_ref:   (M, 128) f32 VMEM       accumulator, M = b_blk*toh*ow_pad
    patch_ref: (M, K*128) f32 VMEM     per-kh im2col LHS staging
    """
    oh0 = pl.program_id(1) * toh
    m = b_blk * toh * ow_pad

    acc_ref[...] = jnp.zeros_like(acc_ref)

    def kh_step(kh, carry):
        # Build the im2col LHS for this kh: column block kw holds the input
        # window shifted by kw along W.  Stores are 128-lane aligned.
        for kw in range(K):
            patch_ref[:, kw * C_IN_PAD:(kw + 1) * C_IN_PAD] = (
                x_ref[:, pl.ds(oh0 + kh, toh), kw:kw + ow_pad, :]
                .reshape(m, C_IN_PAD))
        # Single large MXU contraction over kw*C_IN (depth K*128 = 1408).
        acc_ref[...] += jnp.dot(patch_ref[...], w_ref[kh],
                                preferred_element_type=jnp.float32)
        return carry

    lax.fori_loop(0, K, kh_step, 0, unroll=False)

    # Fused o2/o3/o4: where(o1 > 0, o1, o1 * -0.4); lane-dense 128-wide store.
    acc = acc_ref[...]
    o_ref[...] = jnp.where(acc > 0.0, acc, acc * NEG_SLOPE).reshape(
        b_blk, toh, ow_pad, C_OUT_PAD)


@functools.partial(jax.jit, static_argnames=("b_blk", "toh"))
def model_forward(x_nchw, w_torch, *, b_blk=2, toh=8):
    """x_nchw: (N, 76, H, W) f32; w_torch: (76, 42, 11, 11) f32 (PyTorch layout).

    Returns (N, 42, H+10, W+10) f32, matching the PyTorch module.
    """
    N, cin, H, W = x_nchw.shape
    assert cin == C_IN
    OH, OW = H + K - 1, W + K - 1

    ow_pad = _round_up(OW, 8)        # sublane-aligned output width
    oh_pad = _round_up(OH, toh)      # output height rounded to the H tile
    n_pad = _round_up(N, b_blk)      # batch rounded to the batch block
    hp = oh_pad + K - 1              # padded input height
    wp = ow_pad + K - 1              # padded input width

    # NCHW -> NHWC; zero-pad batch, spatial (full correlation + tile rounding)
    # and channels 76 -> 128 (lane aligned; padded weight rows are zero).
    x = jnp.transpose(x_nchw, (0, 2, 3, 1)).astype(jnp.float32)
    x = jnp.pad(x, ((0, n_pad - N),
                    (K - 1, hp - (K - 1) - H),
                    (K - 1, wp - (K - 1) - W),
                    (0, C_IN_PAD - C_IN)))

    # ConvTranspose2d(stride=1, pad=0) == full correlation with the flipped
    # kernel.  (K, K, Cin, Cout) -> pad channels -> fold kw into contraction.
    w = jnp.transpose(jnp.flip(w_torch, axis=(2, 3)), (2, 3, 0, 1)).astype(jnp.float32)
    w = jnp.pad(w, ((0, 0), (0, 0),
                    (0, C_IN_PAD - C_IN), (0, C_OUT_PAD - C_OUT)))
    w = w.reshape(K, K * C_IN_PAD, C_OUT_PAD)   # contraction index = kw*128 + cin

    m = b_blk * toh * ow_pad
    kernel = functools.partial(_convt_leaky_kernel,
                               toh=toh, ow_pad=ow_pad, b_blk=b_blk)

    out = pl.pallas_call(
        kernel,
        out_shape=jax.ShapeDtypeStruct((n_pad, oh_pad, ow_pad, C_OUT_PAD),
                                       jnp.float32),
        grid_spec=pltpu.PrefetchScalarGridSpec(
            num_scalar_prefetch=0,
            grid=(n_pad // b_blk, oh_pad // toh),
            in_specs=[
                pl.BlockSpec((b_blk, hp, wp, C_IN_PAD),
                             lambda n, t: (n, 0, 0, 0)),
                pl.BlockSpec((K, K * C_IN_PAD, C_OUT_PAD),
                             lambda n, t: (0, 0, 0)),
            ],
            out_specs=pl.BlockSpec((b_blk, toh, ow_pad, C_OUT_PAD),
                                   lambda n, t: (n, t, 0, 0)),
            scratch_shapes=[
                pltpu.VMEM((m, C_OUT_PAD), jnp.float32),     # accumulator
                pltpu.VMEM((m, K * C_IN_PAD), jnp.float32),  # im2col staging
            ],
        ),
        compiler_params=pltpu.CompilerParams(
            dimension_semantics=("parallel", "arbitrary"),
            vmem_limit_bytes=48 * 1024 * 1024,
        ),
    )(x, w)

    # Drop the padding and return NCHW like the PyTorch module.
    out = out[:N, :OH, :OW, :C_OUT]
    return jnp.transpose(out, (0, 3, 1, 2))


def reference_forward(x_nchw, w_torch):
    """Pure-XLA reference: transposed conv as padded correlation w/ flipped kernel."""
    w_oihw = jnp.transpose(jnp.flip(w_torch, axis=(2, 3)), (1, 0, 2, 3))
    o1 = lax.conv_general_dilated(
        x_nchw, w_oihw, window_strides=(1, 1),
        padding=[(K - 1, K - 1), (K - 1, K - 1)],
        dimension_numbers=('NCHW', 'OIHW', 'NCHW'))
    return jnp.where(o1 > 0.0, o1, o1 * NEG_SLOPE)


if __name__ == "__main__":
    # Small shapes consistent with the module (channels / kernel fixed by
    # __init__; batch + spatial scaled down from (655, 76, 13, 40)).  Chosen so
    # the batch / OH / OW padding paths are all exercised.
    N, H, W = 3, 5, 9
    key = jax.random.PRNGKey(0)
    kx, kw_ = jax.random.split(key)
    x7 = jax.random.normal(kx, (N, C_IN, H, W), dtype=jnp.float32)
    # Deterministic ConvTranspose2d weight, PyTorch shape (in, out, kH, kW).
    weight = jax.random.normal(kw_, (C_IN, C_OUT, K, K), dtype=jnp.float32) * 0.02

    out = jax.block_until_ready(model_forward(x7, weight))
    ref = jax.block_until_ready(reference_forward(x7, weight))

    assert out.shape == (N, C_OUT, H + K - 1, W + K - 1), out.shape
    assert out.dtype == jnp.float32
    np.testing.assert_allclose(np.asarray(out), np.asarray(ref),
                               rtol=1e-4, atol=1e-4)

    print("KERNEL_OK")
</pallas_src>

<mosaic_0001>
module attributes {stable_mosaic.version = 11 : i64} {
  func.func @_convt_leaky_kernel(%arg0: i32, %arg1: i32, %arg2: memref<2x26x34x128xf32, #tpu.memory_space<vmem>>, %arg3: memref<11x1408x128xf32, #tpu.memory_space<vmem>>, %arg4: memref<2x8x24x128xf32, #tpu.memory_space<vmem>>, %arg5: memref<384x128xf32, #tpu.memory_space<vmem>>, %arg6: memref<384x1408xf32, #tpu.memory_space<vmem>>) attributes {dimension_semantics = [#tpu.dimension_semantics<parallel>, #tpu.dimension_semantics<arbitrary>], iteration_bounds = array<i64: 2, 2>, scalar_prefetch = 0 : i64, scratch_operands = 2 : i64, tpu.core_type = #tpu.core_type<tc>, window_params = [{transform_indices = @transform_0, window_bounds = array<i64: 2, 26, 34, 128>}, {pipeline_mode = #tpu.pipeline_mode<synchronous>, transform_indices = @transform_1, window_bounds = array<i64: 11, 1408, 128>}, {transform_indices = @transform_2, window_bounds = array<i64: 2, 8, 24, 128>}]} {
    %c8_i32 = arith.constant 8 : i32
    %0 = arith.muli %arg1, %c8_i32 : i32
    %cst = arith.constant 0.000000e+00 : f32
    %1 = vector.broadcast %cst : f32 to vector<384x128xf32>
    %c0 = arith.constant 0 : index
    %c0_0 = arith.constant 0 : index
    %2 = vector.load %arg5[%c0, %c0_0] : memref<384x128xf32, #tpu.memory_space<vmem>>, vector<384x128xf32>
    tpu.vector_store %arg5[%c0, %c0_0], %1 {strides = array<i32>} : memref<384x128xf32, #tpu.memory_space<vmem>>, vector<384x128xf32>,
    %c0_i32 = arith.constant 0 : i32
    %c11_i32 = arith.constant 11 : i32
    %3 = arith.addi %c0_i32, %c11_i32 : i32
    %c1_i32 = arith.constant 1 : i32
    scf.for %arg7 = %c0_i32 to %3 step %c1_i32  : i32 {
      %12 = arith.addi %0, %arg7 : i32
      %c0_10 = arith.constant 0 : index
      %13 = arith.index_cast %12 : i32 to index
      %c0_11 = arith.constant 0 : index
      %c0_12 = arith.constant 0 : index
      %14 = vector.load %arg2[%c0_10, %13, %c0_11, %c0_12] : memref<2x26x34x128xf32, #tpu.memory_space<vmem>>, vector<2x8x24x128xf32>
      %15 = vector.shape_cast %14 : vector<2x8x24x128xf32> to vector<384x128xf32>
      %c0_13 = arith.constant 0 : index
      %c0_14 = arith.constant 0 : index
      %16 = vector.load %arg6[%c0_13, %c0_14] : memref<384x1408xf32, #tpu.memory_space<vmem>>, vector<384x128xf32>
      tpu.vector_store %arg6[%c0_13, %c0_14], %15 {strides = array<i32>} : memref<384x1408xf32, #tpu.memory_space<vmem>>, vector<384x128xf32>,
      %17 = arith.addi %0, %arg7 : i32
      %c0_15 = arith.constant 0 : index
      %18 = arith.index_cast %17 : i32 to index
      %c1 = arith.constant 1 : index
      %c0_16 = arith.constant 0 : index
      %19 = vector.load %arg2[%c0_15, %18, %c1, %c0_16] : memref<2x26x34x128xf32, #tpu.memory_space<vmem>>, vector<2x8x24x128xf32>
      %20 = vector.shape_cast %19 : vector<2x8x24x128xf32> to vector<384x128xf32>
      %c0_17 = arith.constant 0 : index
      %c128 = arith.constant 128 : index
      %21 = vector.load %arg6[%c0_17, %c128] : memref<384x1408xf32, #tpu.memory_space<vmem>>, vector<384x128xf32>
      tpu.vector_store %arg6[%c0_17, %c128], %20 {strides = array<i32>} : memref<384x1408xf32, #tpu.memory_space<vmem>>, vector<384x128xf32>,
      %22 = arith.addi %0, %arg7 : i32
      %c0_18 = arith.constant 0 : index
      %23 = arith.index_cast %22 : i32 to index
      %c2 = arith.constant 2 : index
      %c0_19 = arith.constant 0 : index
      %24 = vector.load %arg2[%c0_18, %23, %c2, %c0_19] : memref<2x26x34x128xf32, #tpu.memory_space<vmem>>, vector<2x8x24x128xf32>
      %25 = vector.shape_cast %24 : vector<2x8x24x128xf32> to vector<384x128xf32>
      %c0_20 = arith.constant 0 : index
      %c256 = arith.constant 256 : index
      %26 = vector.load %arg6[%c0_20, %c256] : memref<384x1408xf32, #tpu.memory_space<vmem>>, vector<384x128xf32>
      tpu.vector_store %arg6[%c0_20, %c256], %25 {strides = array<i32>} : memref<384x1408xf32, #tpu.memory_space<vmem>>, vector<384x128xf32>,
      %27 = arith.addi %0, %arg7 : i32
      %c0_21 = arith.constant 0 : index
      %28 = arith.index_cast %27 : i32 to index
      %c3 = arith.constant 3 : index
      %c0_22 = arith.constant 0 : index
      %29 = vector.load %arg2[%c0_21, %28, %c3, %c0_22] : memref<2x26x34x128xf32, #tpu.memory_space<vmem>>, vector<2x8x24x128xf32>
      %30 = vector.shape_cast %29 : vector<2x8x24x128xf32> to vector<384x128xf32>
      %c0_23 = arith.constant 0 : index
      %c384 = arith.constant 384 : index
      %31 = vector.load %arg6[%c0_23, %c384] : memref<384x1408xf32, #tpu.memory_space<vmem>>, vector<384x128xf32>
      tpu.vector_store %arg6[%c0_23, %c384], %30 {strides = array<i32>} : memref<384x1408xf32, #tpu.memory_space<vmem>>, vector<384x128xf32>,
      %32 = arith.addi %0, %arg7 : i32
      %c0_24 = arith.constant 0 : index
      %33 = arith.index_cast %32 : i32 to index
      %c4 = arith.constant 4 : index
      %c0_25 = arith.constant 0 : index
      %34 = vector.load %arg2[%c0_24, %33, %c4, %c0_25] : memref<2x26x34x128xf32, #tpu.memory_space<vmem>>, vector<2x8x24x128xf32>
      %35 = vector.shape_cast %34 : vector<2x8x24x128xf32> to vector<384x128xf32>
      %c0_26 = arith.constant 0 : index
      %c512 = arith.constant 512 : index
      %36 = vector.load %arg6[%c0_26, %c512] : memref<384x1408xf32, #tpu.memory_space<vmem>>, vector<384x128xf32>
      tpu.vector_store %arg6[%c0_26, %c512], %35 {strides = array<i32>} : memref<384x1408xf32, #tpu.memory_space<vmem>>, vector<384x128xf32>,
      %37 = arith.addi %0, %arg7 : i32
      %c0_27 = arith.constant 0 : index
      %38 = arith.index_cast %37 : i32 to index
      %c5 = arith.constant 5 : index
      %c0_28 = arith.constant 0 : index
      %39 = vector.load %arg2[%c0_27, %38, %c5, %c0_28] : memref<2x26x34x128xf32, #tpu.memory_space<vmem>>, vector<2x8x24x128xf32>
      %40 = vector.shape_cast %39 : vector<2x8x24x128xf32> to vector<384x128xf32>
      %c0_29 = arith.constant 0 : index
      %c640 = arith.constant 640 : index
      %41 = vector.load %arg6[%c0_29, %c640] : memref<384x1408xf32, #tpu.memory_space<vmem>>, vector<384x128xf32>
      tpu.vector_store %arg6[%c0_29, %c640], %40 {strides = array<i32>} : memref<384x1408xf32, #tpu.memory_space<vmem>>, vector<384x128xf32>,
      %42 = arith.addi %0, %arg7 : i32
      %c0_30 = arith.constant 0 : index
      %43 = arith.index_cast %42 : i32 to index
      %c6 = arith.constant 6 : index
      %c0_31 = arith.constant 0 : index
      %44 = vector.load %arg2[%c0_30, %43, %c6, %c0_31] : memref<2x26x34x128xf32, #tpu.memory_space<vmem>>, vector<2x8x24x128xf32>
      %45 = vector.shape_cast %44 : vector<2x8x24x128xf32> to vector<384x128xf32>
      %c0_32 = arith.constant 0 : index
      %c768 = arith.constant 768 : index
      %46 = vector.load %arg6[%c0_32, %c768] : memref<384x1408xf32, #tpu.memory_space<vmem>>, vector<384x128xf32>
      tpu.vector_store %arg6[%c0_32, %c768], %45 {strides = array<i32>} : memref<384x1408xf32, #tpu.memory_space<vmem>>, vector<384x128xf32>,
      %47 = arith.addi %0, %arg7 : i32
      %c0_33 = arith.constant 0 : index
      %48 = arith.index_cast %47 : i32 to index
      %c7 = arith.constant 7 : index
      %c0_34 = arith.constant 0 : index
      %49 = vector.load %arg2[%c0_33, %48, %c7, %c0_34] : memref<2x26x34x128xf32, #tpu.memory_space<vmem>>, vector<2x8x24x128xf32>
      %50 = vector.shape_cast %49 : vector<2x8x24x128xf32> to vector<384x128xf32>
      %c0_35 = arith.constant 0 : index
      %c896 = arith.constant 896 : index
      %51 = vector.load %arg6[%c0_35, %c896] : memref<384x1408xf32, #tpu.memory_space<vmem>>, vector<384x128xf32>
      tpu.vector_store %arg6[%c0_35, %c896], %50 {strides = array<i32>} : memref<384x1408xf32, #tpu.memory_space<vmem>>, vector<384x128xf32>,
      %52 = arith.addi %0, %arg7 : i32
      %c0_36 = arith.constant 0 : index
      %53 = arith.index_cast %52 : i32 to index
      %c8 = arith.constant 8 : index
      %c0_37 = arith.constant 0 : index
      %54 = vector.load %arg2[%c0_36, %53, %c8, %c0_37] : memref<2x26x34x128xf32, #tpu.memory_space<vmem>>, vector<2x8x24x128xf32>
      %55 = vector.shape_cast %54 : vector<2x8x24x128xf32> to vector<384x128xf32>
      %c0_38 = arith.constant 0 : index
      %c1024 = arith.constant 1024 : index
      %56 = vector.load %arg6[%c0_38, %c1024] : memref<384x1408xf32, #tpu.memory_space<vmem>>, vector<384x128xf32>
      tpu.vector_store %arg6[%c0_38, %c1024], %55 {strides = array<i32>} : memref<384x1408xf32, #tpu.memory_space<vmem>>, vector<384x128xf32>,
      %57 = arith.addi %0, %arg7 : i32
      %c0_39 = arith.constant 0 : index
      %58 = arith.index_cast %57 : i32 to index
      %c9 = arith.constant 9 : index
      %c0_40 = arith.constant 0 : index
      %59 = vector.load %arg2[%c0_39, %58, %c9, %c0_40] : memref<2x26x34x128xf32, #tpu.memory_space<vmem>>, vector<2x8x24x128xf32>
      %60 = vector.shape_cast %59 : vector<2x8x24x128xf32> to vector<384x128xf32>
      %c0_41 = arith.constant 0 : index
      %c1152 = arith.constant 1152 : index
      %61 = vector.load %arg6[%c0_41, %c1152] : memref<384x1408xf32, #tpu.memory_space<vmem>>, vector<384x128xf32>
      tpu.vector_store %arg6[%c0_41, %c1152], %60 {strides = array<i32>} : memref<384x1408xf32, #tpu.memory_space<vmem>>, vector<384x128xf32>,
      %62 = arith.addi %0, %arg7 : i32
      %c0_42 = arith.constant 0 : index
      %63 = arith.index_cast %62 : i32 to index
      %c10 = arith.constant 10 : index
      %c0_43 = arith.constant 0 : index
      %64 = vector.load %arg2[%c0_42, %63, %c10, %c0_43] : memref<2x26x34x128xf32, #tpu.memory_space<vmem>>, vector<2x8x24x128xf32>
      %65 = vector.shape_cast %64 : vector<2x8x24x128xf32> to vector<384x128xf32>
      %c0_44 = arith.constant 0 : index
      %c1280 = arith.constant 1280 : index
      %66 = vector.load %arg6[%c0_44, %c1280] : memref<384x1408xf32, #tpu.memory_space<vmem>>, vector<384x128xf32>
      tpu.vector_store %arg6[%c0_44, %c1280], %65 {strides = array<i32>} : memref<384x1408xf32, #tpu.memory_space<vmem>>, vector<384x128xf32>,
      %c0_45 = arith.constant 0 : index
      %c0_46 = arith.constant 0 : index
      %67 = vector.load %arg5[%c0_45, %c0_46] : memref<384x128xf32, #tpu.memory_space<vmem>>, vector<384x128xf32>
      %c0_47 = arith.constant 0 : index
      %c0_48 = arith.constant 0 : index
      %68 = vector.load %arg6[%c0_47, %c0_48] : memref<384x1408xf32, #tpu.memory_space<vmem>>, vector<384x1408xf32>
      %69 = arith.index_cast %arg7 : i32 to index
      %c0_49 = arith.constant 0 : index
      %c0_50 = arith.constant 0 : index
      %70 = vector.load %arg3[%69, %c0_49, %c0_50] : memref<11x1408x128xf32, #tpu.memory_space<vmem>>, vector<1x1408x128xf32>
      %71 = vector.shape_cast %70 : vector<1x1408x128xf32> to vector<1408x128xf32>
      %cst_51 = arith.constant dense<0.000000e+00> : vector<384x128xf32>
      %72 = tpu.matmul %68, %71, %cst_51 {dimension_numbers = #tpu.dot_dimension_numbers<[1], [0], [0], [1], [0, 0, 1, 1], [], []>} : vector<384x1408xf32>, vector<1408x128xf32>, vector<384x128xf32> -> vector<384x128xf32>
      %73 = arith.addf %67, %72 : vector<384x128xf32>
      %c0_52 = arith.constant 0 : index
      %c0_53 = arith.constant 0 : index
      %74 = vector.load %arg5[%c0_52, %c0_53] : memref<384x128xf32, #tpu.memory_space<vmem>>, vector<384x128xf32>
      tpu.vector_store %arg5[%c0_52, %c0_53], %73 {strides = array<i32>} : memref<384x128xf32, #tpu.memory_space<vmem>>, vector<384x128xf32>,
    }
    %c11_i32_1 = arith.constant 11 : i32
    %c0_2 = arith.constant 0 : index
    %c0_3 = arith.constant 0 : index
    %4 = vector.load %arg5[%c0_2, %c0_3] : memref<384x128xf32, #tpu.memory_space<vmem>>, vector<384x128xf32>
    %cst_4 = arith.constant 0.000000e+00 : f32
    %5 = vector.broadcast %cst_4 : f32 to vector<384x128xf32>
    %6 = arith.cmpf ogt, %4, %5 : vector<384x128xf32>
    %cst_5 = arith.constant -4.000000e-01 : f32
    %7 = vector.broadcast %cst_5 : f32 to vector<384x128xf32>
    %8 = arith.mulf %4, %7 : vector<384x128xf32>
    %9 = arith.select %6, %4, %8 : vector<384x128xi1>, vector<384x128xf32>
    %10 = vector.shape_cast %9 : vector<384x128xf32> to vector<2x8x24x128xf32>
    %c0_6 = arith.constant 0 : index
    %c0_7 = arith.constant 0 : index
    %c0_8 = arith.constant 0 : index
    %c0_9 = arith.constant 0 : index
    %11 = vector.load %arg4[%c0_6, %c0_7, %c0_8, %c0_9] : memref<2x8x24x128xf32, #tpu.memory_space<vmem>>, vector<2x8x24x128xf32>
    tpu.vector_store %arg4[%c0_6, %c0_7, %c0_8, %c0_9], %10 {strides = array<i32>} : memref<2x8x24x128xf32, #tpu.memory_space<vmem>>, vector<2x8x24x128xf32>,
    return
  }
  func.func @transform_0(%arg0: i32, %arg1: i32) -> (i32, i32, i32, i32) {
    %c0_i32 = arith.constant 0 : i32
    %c0_i32_0 = arith.constant 0 : i32
    %c0_i32_1 = arith.constant 0 : i32
    %c0_i32_2 = arith.constant 0 : i32
    return %arg0, %c0_i32, %c0_i32_0, %c0_i32_1 : i32, i32, i32, i32
  }
  func.func @transform_1(%arg0: i32, %arg1: i32) -> (i32, i32, i32) {
    %c0_i32 = arith.constant 0 : i32
    %c0_i32_0 = arith.constant 0 : i32
    %c0_i32_1 = arith.constant 0 : i32
    %c0_i32_2 = arith.constant 0 : i32
    return %c0_i32, %c0_i32_0, %c0_i32_1 : i32, i32, i32
  }
  func.func @transform_2(%arg0: i32, %arg1: i32) -> (i32, i32, i32, i32) {
    %c0_i32 = arith.constant 0 : i32
    %c0_i32_0 = arith.constant 0 : i32
    %c0_i32_1 = arith.constant 0 : i32
    return %arg0, %arg1, %c0_i32, %c0_i32_0 : i32, i32, i32, i32
  }
}

</mosaic_0001>

<bundles_post_ra>
// kernel: model_forward.1
= control target key start
LH: loop header
LB: loop body
LE: loop exit
PB: predicated region body
PF: predicated region fallthrough
CT: control target
= control target key end

     0   :  { %s4902_s9 = smov 0   ;;  %s4904_s10 = smov 0   ;;  %s6448_s0 = inlined_call_operand.vmem [shape: f32[4,26,34,128], index: 0, kind: input, shape index: {}]   ;;  %s6449_s1 = inlined_call_operand.vmem [shape: f32[11,1408,128], index: 1, kind: input, shape index: {}]   ;;  %s6450_s2 = inlined_call_operand.vmem [shape: f32[4,16,24,128], index: 2, kind: output, shape index: {}]  }
   0x1   :  { %s4906_s11 = smov 0   ;;  %s4908_s12 = smov 0  }
   0x2   :  { %s4910_s13 = smov 0   ;;  %s4912_s14 = smov 0  }
   0x3   :  { %s4914_s15 = smov 0  }
   0x4 LB: > { %s21_s16 = sadd.s32 1, %s4871_s13  ;;  %s24_s17 = sadd.s32 1, %s4875_s14  ;;  %s4879_s15 = sphi %s4914_s15, %s12_s15   ;;  %s4875_s14 = sphi %s4912_s14, %s6484_s14   ;;  %s4871_s13 = sphi %s4910_s13, %s6483_s13   ;;  %s4867_s12 = sphi %s4908_s12, %s6482_s12   ;;  %s4863_s11 = sphi %s4906_s11, %s6481_s11   ;;  %s4859_s10 = sphi %s4904_s10, %s6480_s10   ;;  %s4855_s9 = sphi %s4902_s9, %s6479_s9  }
   0x5   : > { %p22_p0 = scmp.ge.s32.totalorder %s21_s16, 2  ;;  %s4504_s18 = sadd.s32 4294967295, %s4879_s15  }
   0x6   : > { %p90_p1 = scmp.ne.s32.totalorder %s4859_s10, %s4855_s9  ;;  %p91_p2 = scmp.eq.s32.totalorder %s4504_s18, 3 }
   0x7   : > { %s6486_s16 = smov (%p22_p0, %s21_s16), 0  ;;  %s6488_s17 = smov (!%p22_p0, %s24_s17), %s4875_s14 }
   0x8   : > { %s76_s19 = ssub.s32 %s4871_s13, %s6486_s16  ;;  %p26_p3 = scmp.ge.s32.totalorder %s6488_s17, 2 }
   0x9   : > { %p4508_p4 = scmp.ge.s32.totalorder %s4879_s15, 1  ;;  %p4948_p5 = por %p91_p2, %p90_p1 }
   0xa   : > { %p128_p6 = scmp.lt.s32.totalorder %s4879_s15, 5  ;;  %s6490_s17 = smov (%p26_p3, %s6488_s17), 0 }
   0xb   : > { %s75_s21 = ssub.s32 %s4875_s14, %s6490_s17  ;;  %s80_s23 = sadd.s32 1, %s4859_s10 }
   0xc   : > { %p129_p7 = pnand %p4508_p4, %p128_p6  ;;  %s77_s22 = sor.u32 %s76_s19, %s75_s21 }
   0xd   : > { %p78_p8 = scmp.eq.s32.totalorder %s77_s22, 0  ;;  %s147_s25 = sand.u32 (!%p129_p7), 1, %s4855_s9  }
   0xe   : > { %132 = sbr.rel (%p129_p7) target bundleno = 893 (0x37d), region = 28  ;;  %s4509_s26 = sshll.u32 (!%p129_p7), %s4867_s12, 1 }
   0xf   : > { %s4959_s24 = scalar_select %p78_p8, %s4859_s10, %s80_s23  }
  0x10   : > { %s4963_s27 = smul.u32 (!%p129_p7), 384, %s147_s25  ;;  %p4967_p9 = scmp.lt.s32.totalorder (!%p129_p7), %s4509_s26, 3 }
  0x11   : > { %s4511_s29 = sshll.u32 (!%p129_p7), %s4863_s11, 3  ;;  %s4984_s7 = smov (!%p129_p7), 0  }
  0x12   : > { %s4982_s6 = scalar_lea.vmem (!%p129_p7), [#allocation4], %s4963_s27 }
  0x13   : > { %v4885_v0 = vmov 0.0   ;;  %s6492_s26 = smov (!%p4967_p9, %s4509_s26), 3 }
  0x14   : > { %160 = vst [vmem:[#allocation2 + $0xb0] sm:$0xff] %v4885_v0  ;;  %161 = vst [vmem:[#allocation2 + $0xd0] sm:$0xff] %v4885_v0  ;;  %s4752_s30 = smul.u32 1040, %s6492_s26 }
  0x15   : > { %162 = vst [vmem:[#allocation2 + $0x10] sm:$0xff] %v4885_v0  ;;  %163 = vst [vmem:[#allocation2 + $0x48] sm:$0xff] %v4885_v0 }
  0x16   : > { %164 = vst [vmem:[#allocation2 + $0x160] sm:$0xff] %v4885_v0  ;;  %165 = vst [vmem:[#allocation2 + $0x128] sm:$0xff] %v4885_v0  ;;  %s4979_s5 = scalar_lea.vmem %s6448_s0, %s4752_s30 }
  0x17   : > { %166 = vst [vmem:[#allocation2 + $0x40] sm:$0xff] %v4885_v0  ;;  %167 = vst [vmem:[#allocation2 + $0x178] sm:$0xff] %v4885_v0 }
  0x18   : > { %168 = vst [vmem:[#allocation2 + $0x108] sm:$0xff] %v4885_v0  ;;  %169 = vst [vmem:[#allocation2 + $0x110] sm:$0xff] %v4885_v0 }
  0x19   : > { %170 = vst [vmem:[#allocation2 + $0x90] sm:$0xff] %v4885_v0  ;;  %171 = vst [vmem:[#allocation2 + $0x118] sm:$0xff] %v4885_v0 }
  0x1a   : > { %172 = vst [vmem:[#allocation2 + $0x148] sm:$0xff] %v4885_v0  ;;  %173 = vst [vmem:[#allocation2 + $0x100] sm:$0xff] %v4885_v0 }
  0x1b   : > { %174 = vst [vmem:[#allocation2 + $0x58] sm:$0xff] %v4885_v0  ;;  %175 = vst [vmem:[#allocation2 + $0xd8] sm:$0xff] %v4885_v0 }
  0x1c   : > { %176 = vst [vmem:[#allocation2 + $0x80] sm:$0xff] %v4885_v0  ;;  %177 = vst [vmem:[#allocation2 + $0x130] sm:$0xff] %v4885_v0 }
  0x1d   : > { %178 = vst [vmem:[#allocation2 + $0x138] sm:$0xff] %v4885_v0  ;;  %179 = vst [vmem:[#allocation2 + $0x120] sm:$0xff] %v4885_v0 }
  0x1e   : > { %180 = vst [vmem:[#allocation2 + $0xe0] sm:$0xff] %v4885_v0  ;;  %181 = vst [vmem:[#allocation2 + $0xa8] sm:$0xff] %v4885_v0 }
  0x1f   : > { %182 = vst [vmem:[#allocation2 + $0xb8] sm:$0xff] %v4885_v0  ;;  %183 = vst [vmem:[#allocation2 + $0x168] sm:$0xff] %v4885_v0 }
  0x20   : > { %184 = vst [vmem:[#allocation2 + $0xe8] sm:$0xff] %v4885_v0  ;;  %185 = vst [vmem:[#allocation2 + $0xf8] sm:$0xff] %v4885_v0 }
  0x21   : > { %186 = vst [vmem:[#allocation2 + $0x20] sm:$0xff] %v4885_v0  ;;  %187 = vst [vmem:[#allocation2 + $0x88] sm:$0xff] %v4885_v0 }
  0x22   : > { %188 = vst [vmem:[#allocation2 + $0xa0] sm:$0xff] %v4885_v0  ;;  %189 = vst [vmem:[#allocation2 + $0x170] sm:$0xff] %v4885_v0 }
  0x23   : > { %190 = vst [vmem:[#allocation2 + $0xf0] sm:$0xff] %v4885_v0  ;;  %191 = vst [vmem:[#allocation2 + $0x140] sm:$0xff] %v4885_v0 }
  0x24   : > { %192 = vst [vmem:[#allocation2 + $0x60] sm:$0xff] %v4885_v0  ;;  %193 = vst [vmem:[#allocation2 + $0xc8] sm:$0xff] %v4885_v0 }
  0x25   : > { %194 = vst [vmem:[#allocation2 + $0x28] sm:$0xff] %v4885_v0  ;;  %195 = vst [vmem:[#allocation2 + $0x38] sm:$0xff] %v4885_v0 }
  0x26   : > { %196 = vst [vmem:[#allocation2 + $0xc0] sm:$0xff] %v4885_v0  ;;  %197 = vst [vmem:[#allocation2 + $0x18] sm:$0xff] %v4885_v0 }
  0x27   : > { %198 = vst [vmem:[#allocation2 + $0x98] sm:$0xff] %v4885_v0  ;;  %199 = vst [vmem:[#allocation2 + $0x8] sm:$0xff] %v4885_v0 }
  0x28   : > { %200 = vst [vmem:[#allocation2] sm:$0xff] %v4885_v0  ;;  %201 = vst [vmem:[#allocation2 + $0x78] sm:$0xff] %v4885_v0 }
  0x29   : > { %202 = vst [vmem:[#allocation2 + $0x50] sm:$0xff] %v4885_v0  ;;  %203 = vst [vmem:[#allocation2 + $0x68] sm:$0xff] %v4885_v0 }
  0x2a   : > { %204 = vst [vmem:[#allocation2 + $0x70] sm:$0xff] %v4885_v0  ;;  %205 = vst [vmem:[#allocation2 + $0x30] sm:$0xff] %v4885_v0 }
  0x2b   : > { %206 = vst [vmem:[#allocation2 + $0x158] sm:$0xff] %v4885_v0  ;;  %207 = vst [vmem:[#allocation2 + $0x150] sm:$0xff] %v4885_v0 }
  0x2c LB: >> { %v4886_v1 = vmov 0.0   ;;  %s1849_s8 = smul.u32 1408, %s4883_s7  ;;  %s214_s21 = sadd.s32 %s4883_s7, %s4511_s29  ;;  %s4883_s7 = sphi %s4984_s7, %s213_s7  }
  0x2d   : >> { %2027 = vmatprep.subr.mxu0 %v4886_v1  ;;  %2332 = vmatprep.subr.mxu1 %v4886_v1  ;;  %s215_s22 = smul.u32 40, %s214_s21  ;;  %s213_s7 = sadd.s32 1, %s4883_s7  }
  0x2e   : >> { %s4995_s19 = scalar_lea.vmem %s6449_s1, %s1849_s8  ;;  %p210_p10 = scmp.ge.s32.totalorder %s213_s7, 11  }
  0x2f   : >> { %v1866_v2 = vld [vmem:[%s4995_s19 + $0x78] sm:$0xff]  ;;  %v1865_v4 = vld [vmem:[%s4995_s19 + $0x70] sm:$0xff]  ;;  %v1864_v6 = vld [vmem:[%s4995_s19 + $0x68] sm:$0xff]  ;;  %s5117_s23 = scalar_lea.vmem %s4979_s5, %s215_s22 }
  0x30   : >> { %v1898_v3 = vld [vmem:[%s4995_s19 + $0x178] sm:$0xff]  ;;  %2028 = vmatpush1.msra.mxu0 %v1866_v2  ;;  %v1897_v5 = vld [vmem:[%s4995_s19 + $0x170] sm:$0xff]  ;;  %v1896_v7 = vld [vmem:[%s4995_s19 + $0x168] sm:$0xff] }
  0x31   : >> { %2333 = vmatpush1.msra.mxu1 %v1898_v3  ;;  %2029 = vmatprep.subr.mxu0 %v4886_v1  ;;  %v1863_v8 = vld [vmem:[%s4995_s19 + $0x60] sm:$0xff]  ;;  %v1862_v10 = vld [vmem:[%s4995_s19 + $0x58] sm:$0xff]  ;;  %v1861_v12 = vld [vmem:[%s4995_s19 + $0x50] sm:$0xff] }
  0x32   : >> { %2334 = vmatprep.subr.mxu1 %v4886_v1  ;;  %2030 = vmatpush1.msra.mxu0 %v1865_v4  ;;  %v1895_v9 = vld [vmem:[%s4995_s19 + $0x160] sm:$0xff]  ;;  %v1894_v11 = vld [vmem:[%s4995_s19 + $0x158] sm:$0xff]  ;;  %v1893_v13 = vld [vmem:[%s4995_s19 + $0x150] sm:$0xff] }
  0x33   : >> { %2335 = vmatpush1.msra.mxu1 %v1897_v5  ;;  %2031 = vmatprep.subr.mxu0 %v4886_v1  ;;  %v1860_v14 = vld [vmem:[%s4995_s19 + $0x48] sm:$0xff]  ;;  %v1859_v16 = vld [vmem:[%s4995_s19 + $0x40] sm:$0xff]  ;;  %v1858_v18 = vld [vmem:[%s4995_s19 + $0x38] sm:$0xff] }
  0x34   : >> { %2336 = vmatprep.subr.mxu1 %v4886_v1  ;;  %2032 = vmatpush1.msra.mxu0 %v1864_v6  ;;  %v1892_v15 = vld [vmem:[%s4995_s19 + $0x148] sm:$0xff]  ;;  %v1891_v17 = vld [vmem:[%s4995_s19 + $0x140] sm:$0xff]  ;;  %v1890_v19 = vld [vmem:[%s4995_s19 + $0x138] sm:$0xff] }
  0x35   : >> { %2337 = vmatpush1.msra.mxu1 %v1896_v7  ;;  %2033 = vmatprep.subr.mxu0 %v4886_v1  ;;  %v1857_v20 = vld [vmem:[%s4995_s19 + $0x30] sm:$0xff]  ;;  %v1856_v22 = vld [vmem:[%s4995_s19 + $0x28] sm:$0xff]  ;;  %v1855_v24 = vld [vmem:[%s4995_s19 + $0x20] sm:$0xff] }
  0x36   : >> { %2338 = vmatprep.subr.mxu1 %v4886_v1  ;;  %2034 = vmatpush1.msra.mxu0 %v1863_v8  ;;  %v1889_v21 = vld [vmem:[%s4995_s19 + $0x130] sm:$0xff]  ;;  %v1888_v23 = vld [vmem:[%s4995_s19 + $0x128] sm:$0xff]  ;;  %v1887_v25 = vld [vmem:[%s4995_s19 + $0x120] sm:$0xff] }
  0x37   : >> { %2339 = vmatpush1.msra.mxu1 %v1895_v9  ;;  %2035 = vmatprep.subr.mxu0 %v4886_v1  ;;  %v1854_v26 = vld [vmem:[%s4995_s19 + $0x18] sm:$0xff]  ;;  %v1853_v28 = vld [vmem:[%s4995_s19 + $0x10] sm:$0xff]  ;;  %v1852_v30 = vld [vmem:[%s4995_s19 + $0x8] sm:$0xff] }
  0x38   : >> { %2340 = vmatprep.subr.mxu1 %v4886_v1  ;;  %2036 = vmatpush1.msra.mxu0 %v1862_v10  ;;  %v1886_v27 = vld [vmem:[%s4995_s19 + $0x118] sm:$0xff]  ;;  %v1885_v29 = vld [vmem:[%s4995_s19 + $0x110] sm:$0xff]  ;;  %v1884_v31 = vld [vmem:[%s4995_s19 + $0x108] sm:$0xff] }
  0x39   : >> { %2341 = vmatpush1.msra.mxu1 %v1894_v11  ;;  %2037 = vmatprep.subr.mxu0 %v4886_v1  ;;  %v1851_v32 = vld [vmem:[%s4995_s19] sm:$0xff]  ;;  %v1882_v34 = vld [vmem:[%s4995_s19 + $0xf8] sm:$0xff]  ;;  %v1881_v36 = vld [vmem:[%s4995_s19 + $0xf0] sm:$0xff] }
  0x3a   : >> { %2342 = vmatprep.subr.mxu1 %v4886_v1  ;;  %2038 = vmatpush1.msra.mxu0 %v1861_v12  ;;  %v1883_v33 = vld [vmem:[%s4995_s19 + $0x100] sm:$0xff]  ;;  %v1914_v35 = vld [vmem:[%s4995_s19 + $0x1f8] sm:$0xff]  ;;  %v1913_v37 = vld [vmem:[%s4995_s19 + $0x1f0] sm:$0xff] }
  0x3b   : >> { %2343 = vmatpush1.msra.mxu1 %v1893_v13  ;;  %2039 = vmatprep.subr.mxu0 %v4886_v1  ;;  %v1880_v38 = vld [vmem:[%s4995_s19 + $0xe8] sm:$0xff]  ;;  %v1879_v40 = vld [vmem:[%s4995_s19 + $0xe0] sm:$0xff]  ;;  %v1878_v42 = vld [vmem:[%s4995_s19 + $0xd8] sm:$0xff] }
  0x3c   : >> { %2344 = vmatprep.subr.mxu1 %v4886_v1  ;;  %2040 = vmatpush1.msra.mxu0 %v1860_v14  ;;  %v1912_v39 = vld [vmem:[%s4995_s19 + $0x1e8] sm:$0xff]  ;;  %v1911_v41 = vld [vmem:[%s4995_s19 + $0x1e0] sm:$0xff]  ;;  %v1910_v43 = vld [vmem:[%s4995_s19 + $0x1d8] sm:$0xff] }
  0x3d   : >> { %2345 = vmatpush1.msra.mxu1 %v1892_v15  ;;  %2041 = vmatprep.subr.mxu0 %v4886_v1  ;;  %v1877_v44 = vld [vmem:[%s4995_s19 + $0xd0] sm:$0xff]  ;;  %v1876_v46 = vld [vmem:[%s4995_s19 + $0xc8] sm:$0xff]  ;;  %v1875_v48 = vld [vmem:[%s4995_s19 + $0xc0] sm:$0xff] }
  0x3e   : >> { %2346 = vmatprep.subr.mxu1 %v4886_v1  ;;  %2042 = vmatpush1.msra.mxu0 %v1859_v16  ;;  %v1909_v45 = vld [vmem:[%s4995_s19 + $0x1d0] sm:$0xff]  ;;  %v1908_v47 = vld [vmem:[%s4995_s19 + $0x1c8] sm:$0xff]  ;;  %v1907_v49 = vld [vmem:[%s4995_s19 + $0x1c0] sm:$0xff] }
  0x3f   : >> { %2347 = vmatpush1.msra.mxu1 %v1891_v17  ;;  %2043 = vmatprep.subr.mxu0 %v4886_v1  ;;  %v1874_v50 = vld [vmem:[%s4995_s19 + $0xb8] sm:$0xff]  ;;  %v1873_v52 = vld [vmem:[%s4995_s19 + $0xb0] sm:$0xff]  ;;  %v1872_v54 = vld [vmem:[%s4995_s19 + $0xa8] sm:$0xff] }
  0x40   : >> { %2348 = vmatprep.subr.mxu1 %v4886_v1  ;;  %2044 = vmatpush1.msra.mxu0 %v1858_v18  ;;  %v1906_v51 = vld [vmem:[%s4995_s19 + $0x1b8] sm:$0xff]  ;;  %v1905_v53 = vld [vmem:[%s4995_s19 + $0x1b0] sm:$0xff]  ;;  %v1904_v55 = vld [vmem:[%s4995_s19 + $0x1a8] sm:$0xff] }
  0x41   : >> { %2349 = vmatpush1.msra.mxu1 %v1890_v19  ;;  %2045 = vmatprep.subr.mxu0 %v4886_v1  ;;  %v1871_v56 = vld [vmem:[%s4995_s19 + $0xa0] sm:$0xff]  ;;  %v1870_v58 = vld [vmem:[%s4995_s19 + $0x98] sm:$0xff]  ;;  %v1869_v60 = vld [vmem:[%s4995_s19 + $0x90] sm:$0xff] }
  0x42   : >> { %2350 = vmatprep.subr.mxu1 %v4886_v1  ;;  %2046 = vmatpush1.msra.mxu0 %v1857_v20  ;;  %v1903_v57 = vld [vmem:[%s4995_s19 + $0x1a0] sm:$0xff]  ;;  %v1902_v59 = vld [vmem:[%s4995_s19 + $0x198] sm:$0xff]  ;;  %v1901_v61 = vld [vmem:[%s4995_s19 + $0x190] sm:$0xff] }
  0x43   : >> { %2351 = vmatpush1.msra.mxu1 %v1889_v21  ;;  %2047 = vmatprep.subr.mxu0 %v4886_v1  ;;  %v1868_v62 = vld [vmem:[%s4995_s19 + $0x88] sm:$0xff]  ;;  %v1867_v0 = vld [vmem:[%s4995_s19 + $0x80] sm:$0xff]  ;;  %v1930_v7 = vld [vmem:[%s4995_s19 + $0x278] sm:$0xff] }
  0x44   : >> { %2352 = vmatprep.subr.mxu1 %v4886_v1  ;;  %2048 = vmatpush1.msra.mxu0 %v1856_v22  ;;  %v1900_v63 = vld [vmem:[%s4995_s19 + $0x188] sm:$0xff]  ;;  %v1899_v3 = vld [vmem:[%s4995_s19 + $0x180] sm:$0xff]  ;;  %v1962_v8 = vld [vmem:[%s4995_s19 + $0x378] sm:$0xff] }
  0x45   : >> { %2353 = vmatpush1.msra.mxu1 %v1888_v23  ;;  %2049 = vmatprep.subr.mxu0 %v4886_v1  ;;  %v313_v2 = vld [vmem:[%s5117_s23 + $0x1] sm:$0xff]  ;;  %v314_v9 = vld [vmem:[%s5117_s23 + $0x9] sm:$0xff]  ;;  %v315_v13 = vld [vmem:[%s5117_s23 + $0x11] sm:$0xff] }
  0x46   : >> { %2354 = vmatprep.subr.mxu1 %v4886_v1  ;;  %2050 = vmatpush1.msra.mxu0 %v1855_v24  ;;  %v505_v4 = vld [vmem:[%s5117_s23 + $0x3] sm:$0xff]  ;;  %v506_v10 = vld [vmem:[%s5117_s23 + $0xb] sm:$0xff]  ;;  %v507_v14 = vld [vmem:[%s5117_s23 + $0x13] sm:$0xff] }
  0x47   : >> { %2355 = vmatpush1.msra.mxu1 %v1887_v25  ;;  %2051 = vmatprep.subr.mxu0 %v4886_v1  ;;  %v217_v5 = vld [vmem:[%s5117_s23] sm:$0xff]  ;;  %v218_v11 = vld [vmem:[%s5117_s23 + $0x8] sm:$0xff]  ;;  %v1929_v15 = vld [vmem:[%s4995_s19 + $0x270] sm:$0xff] }
  0x48   : >> { %2356 = vmatprep.subr.mxu1 %v4886_v1  ;;  %2052 = vmatpush1.msra.mxu0 %v1854_v26  ;;  %v409_v6 = vld [vmem:[%s5117_s23 + $0x2] sm:$0xff]  ;;  %v410_v12 = vld [vmem:[%s5117_s23 + $0xa] sm:$0xff]  ;;  %v411_v18 = vld [vmem:[%s5117_s23 + $0x12] sm:$0xff] }
  0x49   : >> { %2357 = vmatpush1.msra.mxu1 %v1886_v27  ;;  %2053 = vmatprep.subr.mxu0 %v4886_v1  ;;  %v1961_v16 = vld [vmem:[%s4995_s19 + $0x370] sm:$0xff]  ;;  %v1928_v21 = vld [vmem:[%s4995_s19 + $0x268] sm:$0xff]  ;;  %v1927_v27 = vld [vmem:[%s4995_s19 + $0x260] sm:$0xff] }
  0x4a   : >> { %2358 = vmatprep.subr.mxu1 %v4886_v1  ;;  %2054 = vmatpush1.msra.mxu0 %v1853_v28  ;;  %v219_v17 = vld [vmem:[%s5117_s23 + $0x10] sm:$0xff]  ;;  %v1960_v22 = vld [vmem:[%s4995_s19 + $0x368] sm:$0xff]  ;;  %v1959_v28 = vld [vmem:[%s4995_s19 + $0x360] sm:$0xff] }
  0x4b   : >> { %2359 = vmatpush1.msra.mxu1 %v1885_v29  ;;  %2055 = vmatprep.subr.mxu0 %v4886_v1  ;;  %v316_v19 = vld [vmem:[%s5117_s23 + $0x29] sm:$0xff]  ;;  %v317_v25 = vld [vmem:[%s5117_s23 + $0x31] sm:$0xff] }
  0x4c   : >> { %2360 = vmatprep.subr.mxu1 %v4886_v1  ;;  %2056 = vmatpush1.msra.mxu0 %v1852_v30  ;;  %v508_v20 = vld [vmem:[%s5117_s23 + $0x2b] sm:$0xff]  ;;  %v509_v26 = vld [vmem:[%s5117_s23 + $0x33] sm:$0xff] }
  0x4d   : >> { %2361 = vmatpush1.msra.mxu1 %v1884_v31  ;;  %2057 = vmatprep.subr.mxu0 %v4886_v1  ;;  %v220_v23 = vld [vmem:[%s5117_s23 + $0x28] sm:$0xff]  ;;  %v221_v29 = vld [vmem:[%s5117_s23 + $0x30] sm:$0xff]  ;;  %v318_v31 = vld [vmem:[%s5117_s23 + $0x39] sm:$0xff] }
  0x4e   : >> { %2362 = vmatprep.subr.mxu1 %v4886_v1  ;;  %2058 = vmatpush1.msra.mxu0 %v1851_v32  ;;  %v412_v24 = vld [vmem:[%s5117_s23 + $0x2a] sm:$0xff]  ;;  %v413_v30 = vld [vmem:[%s5117_s23 + $0x32] sm:$0xff]  ;;  %v510_v32 = vld [vmem:[%s5117_s23 + $0x3b] sm:$0xff] }
  0x4f   : >> { %2363 = vmatpush1.msra.mxu1 %v1883_v33  ;;  %2059 = vmatprep.subr.mxu0 %v4886_v1  ;;  %v1926_v33 = vld [vmem:[%s4995_s19 + $0x258] sm:$0xff] }
  0x50   : >> { %2364 = vmatprep.subr.mxu1 %v4886_v1  ;;  %2060 = vmatpush2.msra.mxu0 %v1882_v34  ;;  %v1958_v34 = vld [vmem:[%s4995_s19 + $0x358] sm:$0xff] }
  0x51   : >> { %2365 = vmatpush2.msra.mxu1 %v1914_v35  ;;  %2061 = vmatprep.subr.mxu0 %v4886_v1  ;;  %v222_v35 = vld [vmem:[%s5117_s23 + $0x38] sm:$0xff] }
  0x52   : >> { %2366 = vmatprep.subr.mxu1 %v4886_v1  ;;  %2062 = vmatpush2.msra.mxu0 %v1881_v36  ;;  %v414_v36 = vld [vmem:[%s5117_s23 + $0x3a] sm:$0xff] }
  0x53   : >> { %2367 = vmatpush2.msra.mxu1 %v1913_v37  ;;  %2063 = vmatprep.subr.mxu0 %v4886_v1  ;;  %v319_v37 = vld [vmem:[%s5117_s23 + $0x51] sm:$0xff] }
  0x54   : >> { %2368 = vmatprep.subr.mxu1 %v4886_v1  ;;  %2064 = vmatpush2.msra.mxu0 %v1880_v38  ;;  %v511_v38 = vld [vmem:[%s5117_s23 + $0x53] sm:$0xff] }
  0x55   : >> { %2369 = vmatpush2.msra.mxu1 %v1912_v39  ;;  %2065 = vmatprep.subr.mxu0 %v4886_v1  ;;  %v1925_v39 = vld [vmem:[%s4995_s19 + $0x250] sm:$0xff] }
  0x56   : >> { %2370 = vmatprep.subr.mxu1 %v4886_v1  ;;  %2066 = vmatpush2.msra.mxu0 %v1879_v40  ;;  %v1957_v40 = vld [vmem:[%s4995_s19 + $0x350] sm:$0xff] }
  0x57   : >> { %2371 = vmatpush2.msra.mxu1 %v1911_v41  ;;  %2067 = vmatprep.subr.mxu0 %v4886_v1  ;;  %v223_v41 = vld [vmem:[%s5117_s23 + $0x50] sm:$0xff] }
  0x58   : >> { %2372 = vmatprep.subr.mxu1 %v4886_v1  ;;  %2068 = vmatpush2.msra.mxu0 %v1878_v42  ;;  %v415_v42 = vld [vmem:[%s5117_s23 + $0x52] sm:$0xff] }
  0x59   : >> { %2373 = vmatpush2.msra.mxu1 %v1910_v43  ;;  %2069 = vmatprep.subr.mxu0 %v4886_v1  ;;  %v320_v43 = vld [vmem:[%s5117_s23 + $0x59] sm:$0xff] }
  0x5a   : >> { %2374 = vmatprep.subr.mxu1 %v4886_v1  ;;  %2070 = vmatpush2.msra.mxu0 %v1877_v44  ;;  %v512_v44 = vld [vmem:[%s5117_s23 + $0x5b] sm:$0xff] }
  0x5b   : >> { %2375 = vmatpush2.msra.mxu1 %v1909_v45  ;;  %2071 = vmatprep.subr.mxu0 %v4886_v1  ;;  %v1924_v45 = vld [vmem:[%s4995_s19 + $0x248] sm:$0xff] }
  0x5c   : >> { %2376 = vmatprep.subr.mxu1 %v4886_v1  ;;  %2072 = vmatpush2.msra.mxu0 %v1876_v46  ;;  %v1956_v46 = vld [vmem:[%s4995_s19 + $0x348] sm:$0xff] }
  0x5d   : >> { %2377 = vmatpush2.msra.mxu1 %v1908_v47  ;;  %2073 = vmatprep.subr.mxu0 %v4886_v1  ;;  %v224_v47 = vld [vmem:[%s5117_s23 + $0x58] sm:$0xff] }
  0x5e   : >> { %2378 = vmatprep.subr.mxu1 %v4886_v1  ;;  %2074 = vmatpush2.msra.mxu0 %v1875_v48  ;;  %v416_v48 = vld [vmem:[%s5117_s23 + $0x5a] sm:$0xff] }
  0x5f   : >> { %2379 = vmatpush2.msra.mxu1 %v1907_v49  ;;  %2075 = vmatprep.subr.mxu0 %v4886_v1  ;;  %v321_v49 = vld [vmem:[%s5117_s23 + $0x61] sm:$0xff] }
  0x60   : >> { %2380 = vmatprep.subr.mxu1 %v4886_v1  ;;  %2076 = vmatpush2.msra.mxu0 %v1874_v50  ;;  %v513_v50 = vld [vmem:[%s5117_s23 + $0x63] sm:$0xff] }
  0x61   : >> { %2381 = vmatpush2.msra.mxu1 %v1906_v51  ;;  %2077 = vmatprep.subr.mxu0 %v4886_v1  ;;  %v1923_v51 = vld [vmem:[%s4995_s19 + $0x240] sm:$0xff] }
  0x62   : >> { %2382 = vmatprep.subr.mxu1 %v4886_v1  ;;  %2078 = vmatpush2.msra.mxu0 %v1873_v52  ;;  %v1955_v52 = vld [vmem:[%s4995_s19 + $0x340] sm:$0xff] }
  0x63   : >> { %2383 = vmatpush2.msra.mxu1 %v1905_v53  ;;  %2079 = vmatprep.subr.mxu0 %v4886_v1  ;;  %v225_v53 = vld [vmem:[%s5117_s23 + $0x60] sm:$0xff] }
  0x64   : >> { %2384 = vmatprep.subr.mxu1 %v4886_v1  ;;  %2080 = vmatpush2.msra.mxu0 %v1872_v54  ;;  %v417_v54 = vld [vmem:[%s5117_s23 + $0x62] sm:$0xff] }
  0x65   : >> { %2385 = vmatpush2.msra.mxu1 %v1904_v55  ;;  %2081 = vmatprep.subr.mxu0 %v4886_v1  ;;  %v322_v55 = vld [vmem:[%s5117_s23 + $0x79] sm:$0xff] }
  0x66   : >> { %2386 = vmatprep.subr.mxu1 %v4886_v1  ;;  %2082 = vmatpush2.msra.mxu0 %v1871_v56  ;;  %v514_v56 = vld [vmem:[%s5117_s23 + $0x7b] sm:$0xff] }
  0x67   : >> { %2387 = vmatpush2.msra.mxu1 %v1903_v57  ;;  %2083 = vmatprep.subr.mxu0 %v4886_v1  ;;  %v1922_v57 = vld [vmem:[%s4995_s19 + $0x238] sm:$0xff] }
  0x68   : >> { %2388 = vmatprep.subr.mxu1 %v4886_v1  ;;  %2084 = vmatpush2.msra.mxu0 %v1870_v58  ;;  %v1954_v58 = vld [vmem:[%s4995_s19 + $0x338] sm:$0xff] }
  0x69   : >> { %2389 = vmatpush2.msra.mxu1 %v1902_v59  ;;  %2085 = vmatprep.subr.mxu0 %v4886_v1  ;;  %v226_v59 = vld [vmem:[%s5117_s23 + $0x78] sm:$0xff] }
  0x6a   : >> { %2390 = vmatprep.subr.mxu1 %v4886_v1  ;;  %2086 = vmatpush2.msra.mxu0 %v1869_v60  ;;  %v418_v60 = vld [vmem:[%s5117_s23 + $0x7a] sm:$0xff] }
  0x6b   : >> { %2391 = vmatpush2.msra.mxu1 %v1901_v61  ;;  %2087 = vmatprep.subr.mxu0 %v4886_v1  ;;  %v323_v61 = vld [vmem:[%s5117_s23 + $0x81] sm:$0xff] }
  0x6c   : >> { %2392 = vmatprep.subr.mxu1 %v4886_v1  ;;  %2088 = vmatpush2.msra.mxu0 %v1868_v62  ;;  %v515_v62 = vld [vmem:[%s5117_s23 + $0x83] sm:$0xff] }
  0x6d   : >> { %2393 = vmatpush2.msra.mxu1 %v1900_v63  ;;  %2089 = vmatprep.subr.mxu0 %v4886_v1  ;;  %v1921_v63 = vld [vmem:[%s4995_s19 + $0x230] sm:$0xff] }
  0x6e   : >> { %2394 = vmatprep.subr.mxu1 %v4886_v1  ;;  %2090 = vmatpush2.msra.mxu0 %v1867_v0  ;;  %v1953_v0 = vld [vmem:[%s4995_s19 + $0x330] sm:$0xff] }
  0x6f   : >> { %2091 = vmatprep.mubr.f32.mxu0 %v313_v2  ;;  %2395 = vmatpush2.msra.mxu1 %v1899_v3  ;;  %v227_v2 = vld [vmem:[%s5117_s23 + $0x80] sm:$0xff] }
  0x70   : >> { %2396 = vmatprep.mubr.f32.mxu1 %v505_v4  ;;  %2092 = vmatmul.mubr.f32.vlgmr.msra.gmra.mxu0 %v217_v5  ;;  %v419_v3 = vld [vmem:[%s5117_s23 + $0x82] sm:$0xff]  ;;  %v516_v5 = vld [vmem:[%s5117_s23 + $0x8b] sm:$0xff] }
  0x71   : >> { %2397 = vmatmul.mubr.f32.vlgmr.msra.gmra.mxu1 %v409_v6  ;;  %2637 = vmatprep.subr.mxu0 %v4886_v1  ;;  %v324_v4 = vld [vmem:[%s5117_s23 + $0x89] sm:$0xff] }
  0x72   : >> { %2942 = vmatprep.subr.mxu1 %v4886_v1  ;;  %2638 = vmatpush1.msra.mxu0 %v1930_v7  ;;  %v1920_v6 = vld [vmem:[%s4995_s19 + $0x228] sm:$0xff] }
  0x73   : >> { %2943 = vmatpush1.msra.mxu1 %v1962_v8  ;;  %2096 = vmatprep.mubr.f32.mxu0 %v314_v9  ;;  %v1952_v7 = vld [vmem:[%s4995_s19 + $0x328] sm:$0xff] }
  0x74   : >> { %2401 = vmatprep.mubr.f32.mxu1 %v506_v10  ;;  %2097 = vmatmul.mubr.f32.gmra.mxu0 %v218_v11  ;;  %v228_v8 = vld [vmem:[%s5117_s23 + $0x88] sm:$0xff] }
  0x75   : >> { %2402 = vmatmul.mubr.f32.gmra.mxu1 %v410_v12  ;;  %2639 = vmatprep.subr.mxu0 %v4886_v1  ;;  %v420_v9 = vld [vmem:[%s5117_s23 + $0x8a] sm:$0xff]  ;;  %v325_v10 = vld [vmem:[%s5117_s23 + $0xa1] sm:$0xff] }
  0x76   : >> { %2944 = vmatprep.subr.mxu1 %v4886_v1  ;;  %2101 = vmatprep.mubr.f32.mxu0 %v315_v13  ;;  %v517_v11 = vld [vmem:[%s5117_s23 + $0xa3] sm:$0xff] }
  0x77   : >> { %2406 = vmatprep.mubr.f32.mxu1 %v507_v14  ;;  %2640 = vmatpush1.msra.mxu0 %v1929_v15  ;;  %v1919_v12 = vld [vmem:[%s4995_s19 + $0x220] sm:$0xff] }
  0x78   : >> { %2945 = vmatpush1.msra.mxu1 %v1961_v16  ;;  %2102 = vmatmul.mubr.f32.gmra.mxu0 %v219_v17  ;;  %v1951_v13 = vld [vmem:[%s4995_s19 + $0x320] sm:$0xff]  ;;  %v326_v16 = vld [vmem:[%s5117_s23 + $0xa9] sm:$0xff] }
  0x79   : >> { %2407 = vmatmul.mubr.f32.gmra.mxu1 %v411_v18  ;;  %2106 = vmatprep.mubr.f32.mxu0 %v316_v19  ;;  %v229_v14 = vld [vmem:[%s5117_s23 + $0xa0] sm:$0xff]  ;;  %v518_v17 = vld [vmem:[%s5117_s23 + $0xab] sm:$0xff]  ;;  %v1918_v18 = vld [vmem:[%s4995_s19 + $0x218] sm:$0xff] }
  0x7a   : >> { %2411 = vmatprep.mubr.f32.mxu1 %v508_v20  ;;  %2641 = vmatprep.subr.mxu0 %v4886_v1  ;;  %v421_v15 = vld [vmem:[%s5117_s23 + $0xa2] sm:$0xff]  ;;  %v1950_v19 = vld [vmem:[%s4995_s19 + $0x318] sm:$0xff] }
  0x7b   : >> { %2946 = vmatprep.subr.mxu1 %v4886_v1  ;;  %2642 = vmatpush1.msra.mxu0 %v1928_v21  ;;  %v230_v20 = vld [vmem:[%s5117_s23 + $0xa8] sm:$0xff] }
  0x7c   : >> { %2947 = vmatpush1.msra.mxu1 %v1960_v22  ;;  %2107 = vmatmul.mubr.f32.gmra.mxu0 %v220_v23  ;;  %v422_v21 = vld [vmem:[%s5117_s23 + $0xaa] sm:$0xff]  ;;  %v519_v23 = vld [vmem:[%s5117_s23 + $0xb3] sm:$0xff] }
  0x7d   : >> { %2412 = vmatmul.mubr.f32.gmra.mxu1 %v412_v24  ;;  %2111 = vmatprep.mubr.f32.mxu0 %v317_v25  ;;  %v327_v22 = vld [vmem:[%s5117_s23 + $0xb1] sm:$0xff] }
  0x7e   : >> { %2416 = vmatprep.mubr.f32.mxu1 %v509_v26  ;;  %2643 = vmatprep.subr.mxu0 %v4886_v1  ;;  %v1917_v24 = vld [vmem:[%s4995_s19 + $0x210] sm:$0xff] }
  0x7f   : >> { %2948 = vmatprep.subr.mxu1 %v4886_v1  ;;  %2644 = vmatpush1.msra.mxu0 %v1927_v27  ;;  %v1949_v25 = vld [vmem:[%s4995_s19 + $0x310] sm:$0xff] }
  0x80   : >> { %2949 = vmatpush1.msra.mxu1 %v1959_v28  ;;  %2112 = vmatmul.mubr.f32.gmra.mxu0 %v221_v29  ;;  %v231_v26 = vld [vmem:[%s5117_s23 + $0xb0] sm:$0xff] }
  0x81   : >> { %2417 = vmatmul.mubr.f32.gmra.mxu1 %v413_v30  ;;  %2116 = vmatprep.mubr.f32.mxu0 %v318_v31  ;;  %v423_v27 = vld [vmem:[%s5117_s23 + $0xb2] sm:$0xff]  ;;  %v328_v28 = vld [vmem:[%s5117_s23 + $0xc9] sm:$0xff] }
  0x82   : >> { %2421 = vmatprep.mubr.f32.mxu1 %v510_v32  ;;  %2645 = vmatprep.subr.mxu0 %v4886_v1  ;;  %v520_v29 = vld [vmem:[%s5117_s23 + $0xcb] sm:$0xff] }
  0x83   : >> { %2950 = vmatprep.subr.mxu1 %v4886_v1  ;;  %2646 = vmatpush1.msra.mxu0 %v1926_v33  ;;  %v1916_v30 = vld [vmem:[%s4995_s19 + $0x208] sm:$0xff] }
  0x84   : >> { %2951 = vmatpush1.msra.mxu1 %v1958_v34  ;;  %2117 = vmatmul.mubr.f32.gmra.mxu0 %v222_v35  ;;  %v1948_v31 = vld [vmem:[%s4995_s19 + $0x308] sm:$0xff]  ;;  %v329_v34 = vld [vmem:[%s5117_s23 + $0xd1] sm:$0xff] }
  0x85   : >> { %2422 = vmatmul.mubr.f32.gmra.mxu1 %v414_v36  ;;  %2121 = vmatprep.mubr.f32.mxu0 %v319_v37  ;;  %v232_v32 = vld [vmem:[%s5117_s23 + $0xc8] sm:$0xff]  ;;  %v521_v35 = vld [vmem:[%s5117_s23 + $0xd3] sm:$0xff]  ;;  %v1915_v36 = vld [vmem:[%s4995_s19 + $0x200] sm:$0xff] }
  0x86   : >> { %2426 = vmatprep.mubr.f32.mxu1 %v511_v38  ;;  %2647 = vmatprep.subr.mxu0 %v4886_v1  ;;  %v424_v33 = vld [vmem:[%s5117_s23 + $0xca] sm:$0xff]  ;;  %v1947_v37 = vld [vmem:[%s4995_s19 + $0x300] sm:$0xff] }
  0x87   : >> { %2952 = vmatprep.subr.mxu1 %v4886_v1  ;;  %2648 = vmatpush1.msra.mxu0 %v1925_v39  ;;  %v233_v38 = vld [vmem:[%s5117_s23 + $0xd0] sm:$0xff] }
  0x88   : >> { %2953 = vmatpush1.msra.mxu1 %v1957_v40  ;;  %2122 = vmatmul.mubr.f32.gmra.mxu0 %v223_v41  ;;  %v425_v39 = vld [vmem:[%s5117_s23 + $0xd2] sm:$0xff]  ;;  %v522_v41 = vld [vmem:[%s5117_s23 + $0xdb] sm:$0xff] }
  0x89   : >> { %2427 = vmatmul.mubr.f32.gmra.mxu1 %v415_v42  ;;  %2126 = vmatprep.mubr.f32.mxu0 %v320_v43  ;;  %v330_v40 = vld [vmem:[%s5117_s23 + $0xd9] sm:$0xff] }
  0x8a   : >> { %2431 = vmatprep.mubr.f32.mxu1 %v512_v44  ;;  %2649 = vmatprep.subr.mxu0 %v4886_v1  ;;  %v1946_v42 = vld [vmem:[%s4995_s19 + $0x2f8] sm:$0xff] }
  0x8b   : >> { %2954 = vmatprep.subr.mxu1 %v4886_v1  ;;  %2650 = vmatpush1.msra.mxu0 %v1924_v45  ;;  %v1978_v43 = vld [vmem:[%s4995_s19 + $0x3f8] sm:$0xff] }
  0x8c   : >> { %2955 = vmatpush1.msra.mxu1 %v1956_v46  ;;  %2127 = vmatmul.mubr.f32.gmra.mxu0 %v224_v47  ;;  %v234_v44 = vld [vmem:[%s5117_s23 + $0xd8] sm:$0xff] }
  0x8d   : >> { %2432 = vmatmul.mubr.f32.gmra.mxu1 %v416_v48  ;;  %2131 = vmatprep.mubr.f32.mxu0 %v321_v49  ;;  %v426_v45 = vld [vmem:[%s5117_s23 + $0xda] sm:$0xff]  ;;  %v331_v46 = vld [vmem:[%s5117_s23 + $0xf1] sm:$0xff] }
  0x8e   : >> { %2436 = vmatprep.mubr.f32.mxu1 %v513_v50  ;;  %2651 = vmatprep.subr.mxu0 %v4886_v1  ;;  %v523_v47 = vld [vmem:[%s5117_s23 + $0xf3] sm:$0xff] }
  0x8f   : >> { %2956 = vmatprep.subr.mxu1 %v4886_v1  ;;  %2652 = vmatpush1.msra.mxu0 %v1923_v51  ;;  %v1945_v48 = vld [vmem:[%s4995_s19 + $0x2f0] sm:$0xff] }
  0x90   : >> { %2957 = vmatpush1.msra.mxu1 %v1955_v52  ;;  %2132 = vmatmul.mubr.f32.gmra.mxu0 %v225_v53  ;;  %v1977_v49 = vld [vmem:[%s4995_s19 + $0x3f0] sm:$0xff]  ;;  %v332_v52 = vld [vmem:[%s5117_s23 + $0xf9] sm:$0xff] }
  0x91   : >> { %2437 = vmatmul.mubr.f32.gmra.mxu1 %v417_v54  ;;  %2136 = vmatprep.mubr.f32.mxu0 %v322_v55  ;;  %v235_v50 = vld [vmem:[%s5117_s23 + $0xf0] sm:$0xff]  ;;  %v524_v53 = vld [vmem:[%s5117_s23 + $0xfb] sm:$0xff]  ;;  %v1944_v54 = vld [vmem:[%s4995_s19 + $0x2e8] sm:$0xff] }
  0x92   : >> { %2441 = vmatprep.mubr.f32.mxu1 %v514_v56  ;;  %2653 = vmatprep.subr.mxu0 %v4886_v1  ;;  %v427_v51 = vld [vmem:[%s5117_s23 + $0xf2] sm:$0xff]  ;;  %v1976_v55 = vld [vmem:[%s4995_s19 + $0x3e8] sm:$0xff] }
  0x93   : >> { %2958 = vmatprep.subr.mxu1 %v4886_v1  ;;  %2654 = vmatpush1.msra.mxu0 %v1922_v57  ;;  %v236_v56 = vld [vmem:[%s5117_s23 + $0xf8] sm:$0xff] }
  0x94   : >> { %2959 = vmatpush1.msra.mxu1 %v1954_v58  ;;  %2137 = vmatmul.mubr.f32.gmra.mxu0 %v226_v59  ;;  %v428_v57 = vld [vmem:[%s5117_s23 + $0xfa] sm:$0xff]  ;;  %v525_v59 = vld [vmem:[%s5117_s23 + $0x103] sm:$0xff] }
  0x95   : >> { %2442 = vmatmul.mubr.f32.gmra.mxu1 %v418_v60  ;;  %2141 = vmatprep.mubr.f32.mxu0 %v323_v61  ;;  %v333_v58 = vld [vmem:[%s5117_s23 + $0x101] sm:$0xff] }
  0x96   : >> { %2446 = vmatprep.mubr.f32.mxu1 %v515_v62  ;;  %2655 = vmatprep.subr.mxu0 %v4886_v1  ;;  %v1943_v60 = vld [vmem:[%s4995_s19 + $0x2e0] sm:$0xff] }
  0x97   : >> { %2960 = vmatprep.subr.mxu1 %v4886_v1  ;;  %2656 = vmatpush1.msra.mxu0 %v1921_v63  ;;  %v1975_v61 = vld [vmem:[%s4995_s19 + $0x3e0] sm:$0xff] }
  0x98   : >> { %2961 = vmatpush1.msra.mxu1 %v1953_v0  ;;  %2142 = vmatmul.mubr.f32.gmra.mxu0 %v227_v2  ;;  %v237_v62 = vld [vmem:[%s5117_s23 + $0x100] sm:$0xff] }
  0x99   : >> { %2447 = vmatmul.mubr.f32.gmra.mxu1 %v419_v3  ;;  %2146 = vmatprep.mubr.f32.mxu0 %v324_v4  ;;  %v429_v63 = vld [vmem:[%s5117_s23 + $0x102] sm:$0xff]  ;;  %v334_v0 = vld [vmem:[%s5117_s23 + $0x119] sm:$0xff] }
  0x9a   : >> { %2451 = vmatprep.mubr.f32.mxu1 %v516_v5  ;;  %2657 = vmatprep.subr.mxu0 %v4886_v1  ;;  %v526_v2 = vld [vmem:[%s5117_s23 + $0x11b] sm:$0xff] }
  0x9b   : >> { %2962 = vmatprep.subr.mxu1 %v4886_v1  ;;  %2658 = vmatpush1.msra.mxu0 %v1920_v6  ;;  %v1942_v3 = vld [vmem:[%s4995_s19 + $0x2d8] sm:$0xff] }
  0x9c   : >> { %2963 = vmatpush1.msra.mxu1 %v1952_v7  ;;  %2147 = vmatmul.mubr.f32.gmra.mxu0 %v228_v8  ;;  %v1974_v4 = vld [vmem:[%s4995_s19 + $0x3d8] sm:$0xff]  ;;  %v335_v7 = vld [vmem:[%s5117_s23 + $0x121] sm:$0xff] }
  0x9d   : >> { %2452 = vmatmul.mubr.f32.gmra.mxu1 %v420_v9  ;;  %2151 = vmatprep.mubr.f32.mxu0 %v325_v10  ;;  %v238_v5 = vld [vmem:[%s5117_s23 + $0x118] sm:$0xff]  ;;  %v527_v8 = vld [vmem:[%s5117_s23 + $0x123] sm:$0xff]  ;;  %v1941_v9 = vld [vmem:[%s4995_s19 + $0x2d0] sm:$0xff] }
  0x9e   : >> { %2456 = vmatprep.mubr.f32.mxu1 %v517_v11  ;;  %2659 = vmatprep.subr.mxu0 %v4886_v1  ;;  %v430_v6 = vld [vmem:[%s5117_s23 + $0x11a] sm:$0xff]  ;;  %v1973_v10 = vld [vmem:[%s4995_s19 + $0x3d0] sm:$0xff] }
  0x9f   : >> { %2964 = vmatprep.subr.mxu1 %v4886_v1  ;;  %2660 = vmatpush1.msra.mxu0 %v1919_v12  ;;  %v239_v11 = vld [vmem:[%s5117_s23 + $0x120] sm:$0xff] }
  0xa0   : >> { %2965 = vmatpush1.msra.mxu1 %v1951_v13  ;;  %2152 = vmatmul.mubr.f32.gmra.mxu0 %v229_v14  ;;  %v431_v12 = vld [vmem:[%s5117_s23 + $0x122] sm:$0xff]  ;;  %v528_v14 = vld [vmem:[%s5117_s23 + $0x12b] sm:$0xff] }
  0xa1   : >> { %2457 = vmatmul.mubr.f32.gmra.mxu1 %v421_v15  ;;  %2156 = vmatprep.mubr.f32.mxu0 %v326_v16  ;;  %v336_v13 = vld [vmem:[%s5117_s23 + $0x129] sm:$0xff] }
  0xa2   : >> { %2461 = vmatprep.mubr.f32.mxu1 %v518_v17  ;;  %2661 = vmatprep.subr.mxu0 %v4886_v1  ;;  %v1940_v15 = vld [vmem:[%s4995_s19 + $0x2c8] sm:$0xff] }
  0xa3   : >> { %2966 = vmatprep.subr.mxu1 %v4886_v1  ;;  %2662 = vmatpush1.msra.mxu0 %v1918_v18  ;;  %v1972_v16 = vld [vmem:[%s4995_s19 + $0x3c8] sm:$0xff] }
  0xa4   : >> { %2967 = vmatpush1.msra.mxu1 %v1950_v19  ;;  %2157 = vmatmul.mubr.f32.gmra.mxu0 %v230_v20  ;;  %v240_v17 = vld [vmem:[%s5117_s23 + $0x128] sm:$0xff]  ;;  %v337_v19 = vld [vmem:[%s5117_s23 + $0x411] sm:$0xff] }
  0xa5   : >> { %2462 = vmatmul.mubr.f32.gmra.mxu1 %v422_v21  ;;  %2161 = vmatprep.mubr.f32.mxu0 %v327_v22  ;;  %v432_v18 = vld [vmem:[%s5117_s23 + $0x12a] sm:$0xff]  ;;  %v529_v20 = vld [vmem:[%s5117_s23 + $0x413] sm:$0xff]  ;;  %v1939_v21 = vld [vmem:[%s4995_s19 + $0x2c0] sm:$0xff] }
  0xa6   : >> { %2466 = vmatprep.mubr.f32.mxu1 %v519_v23  ;;  %2663 = vmatprep.subr.mxu0 %v4886_v1  ;;  %v1971_v22 = vld [vmem:[%s4995_s19 + $0x3c0] sm:$0xff]  ;;  %v241_v23 = vld [vmem:[%s5117_s23 + $0x410] sm:$0xff] }
  0xa7   : >> { %2968 = vmatprep.subr.mxu1 %v4886_v1  ;;  %2664 = vmatpush1.msra.mxu0 %v1917_v24  ;;  %v433_v24 = vld [vmem:[%s5117_s23 + $0x412] sm:$0xff] }
  0xa8   : >> { %2969 = vmatpush1.msra.mxu1 %v1949_v25  ;;  %2162 = vmatmul.mubr.f32.gmra.mxu0 %v231_v26  ;;  %v338_v25 = vld [vmem:[%s5117_s23 + $0x419] sm:$0xff] }
  0xa9   : >> { %2467 = vmatmul.mubr.f32.gmra.mxu1 %v423_v27  ;;  %2166 = vmatprep.mubr.f32.mxu0 %v328_v28  ;;  %v530_v26 = vld [vmem:[%s5117_s23 + $0x41b] sm:$0xff] }
  0xaa   : >> { %2471 = vmatprep.mubr.f32.mxu1 %v520_v29  ;;  %2665 = vmatprep.subr.mxu0 %v4886_v1  ;;  %v1938_v27 = vld [vmem:[%s4995_s19 + $0x2b8] sm:$0xff] }
  0xab   : >> { %2970 = vmatprep.subr.mxu1 %v4886_v1  ;;  %2666 = vmatpush1.msra.mxu0 %v1916_v30  ;;  %v1970_v28 = vld [vmem:[%s4995_s19 + $0x3b8] sm:$0xff] }
  0xac   : >> { %2971 = vmatpush1.msra.mxu1 %v1948_v31  ;;  %2167 = vmatmul.mubr.f32.gmra.mxu0 %v232_v32  ;;  %v242_v29 = vld [vmem:[%s5117_s23 + $0x418] sm:$0xff]  ;;  %v339_v31 = vld [vmem:[%s5117_s23 + $0x421] sm:$0xff] }
  0xad   : >> { %2472 = vmatmul.mubr.f32.gmra.mxu1 %v424_v33  ;;  %2171 = vmatprep.mubr.f32.mxu0 %v329_v34  ;;  %v434_v30 = vld [vmem:[%s5117_s23 + $0x41a] sm:$0xff]  ;;  %v531_v32 = vld [vmem:[%s5117_s23 + $0x423] sm:$0xff]  ;;  %v1937_v33 = vld [vmem:[%s4995_s19 + $0x2b0] sm:$0xff] }
  0xae   : >> { %2476 = vmatprep.mubr.f32.mxu1 %v521_v35  ;;  %2667 = vmatprep.subr.mxu0 %v4886_v1  ;;  %v1969_v34 = vld [vmem:[%s4995_s19 + $0x3b0] sm:$0xff]  ;;  %v243_v35 = vld [vmem:[%s5117_s23 + $0x420] sm:$0xff] }
  0xaf   : >> { %2972 = vmatprep.subr.mxu1 %v4886_v1  ;;  %2668 = vmatpush1.msra.mxu0 %v1915_v36  ;;  %v435_v36 = vld [vmem:[%s5117_s23 + $0x422] sm:$0xff] }
  0xb0   : >> { %2973 = vmatpush1.msra.mxu1 %v1947_v37  ;;  %2172 = vmatmul.mubr.f32.gmra.mxu0 %v233_v38  ;;  %v340_v37 = vld [vmem:[%s5117_s23 + $0x439] sm:$0xff] }
  0xb1   : >> { %2477 = vmatmul.mubr.f32.gmra.mxu1 %v425_v39  ;;  %2176 = vmatprep.mubr.f32.mxu0 %v330_v40  ;;  %v532_v38 = vld [vmem:[%s5117_s23 + $0x43b] sm:$0xff]  ;;  %v1936_v39 = vld [vmem:[%s4995_s19 + $0x2a8] sm:$0xff] }
  0xb2   : >> { %2481 = vmatprep.mubr.f32.mxu1 %v522_v41  ;;  %2669 = vmatprep.subr.mxu0 %v4886_v1  ;;  %v1968_v40 = vld [vmem:[%s4995_s19 + $0x3a8] sm:$0xff]  ;;  %v244_v41 = vld [vmem:[%s5117_s23 + $0x438] sm:$0xff] }
  0xb3   : >> { %2974 = vmatprep.subr.mxu1 %v4886_v1  ;;  %2670 = vmatpush2.msra.mxu0 %v1946_v42  ;;  %v436_v42 = vld [vmem:[%s5117_s23 + $0x43a] sm:$0xff] }
  0xb4   : >> { %2975 = vmatpush2.msra.mxu1 %v1978_v43  ;;  %2177 = vmatmul.mubr.f32.gmra.mxu0 %v234_v44  ;;  %v341_v43 = vld [vmem:[%s5117_s23 + $0x441] sm:$0xff] }
  0xb5   : >> { %2482 = vmatmul.mubr.f32.gmra.mxu1 %v426_v45  ;;  %2181 = vmatprep.mubr.f32.mxu0 %v331_v46  ;;  %v533_v44 = vld [vmem:[%s5117_s23 + $0x443] sm:$0xff] }
  0xb6   : >> { %2486 = vmatprep.mubr.f32.mxu1 %v523_v47  ;;  %2671 = vmatprep.subr.mxu0 %v4886_v1  ;;  %v1935_v45 = vld [vmem:[%s4995_s19 + $0x2a0] sm:$0xff] }
  0xb7   : >> { %2976 = vmatprep.subr.mxu1 %v4886_v1  ;;  %2672 = vmatpush2.msra.mxu0 %v1945_v48  ;;  %v1967_v46 = vld [vmem:[%s4995_s19 + $0x3a0] sm:$0xff] }
  0xb8   : >> { %2977 = vmatpush2.msra.mxu1 %v1977_v49  ;;  %2182 = vmatmul.mubr.f32.gmra.mxu0 %v235_v50  ;;  %v245_v47 = vld [vmem:[%s5117_s23 + $0x440] sm:$0xff]  ;;  %v342_v49 = vld [vmem:[%s5117_s23 + $0x449] sm:$0xff] }
  0xb9   : >> { %2487 = vmatmul.mubr.f32.gmra.mxu1 %v427_v51  ;;  %2186 = vmatprep.mubr.f32.mxu0 %v332_v52  ;;  %v437_v48 = vld [vmem:[%s5117_s23 + $0x442] sm:$0xff]  ;;  %v534_v50 = vld [vmem:[%s5117_s23 + $0x44b] sm:$0xff]  ;;  %v1934_v51 = vld [vmem:[%s4995_s19 + $0x298] sm:$0xff] }
  0xba   : >> { %2491 = vmatprep.mubr.f32.mxu1 %v524_v53  ;;  %2673 = vmatprep.subr.mxu0 %v4886_v1  ;;  %v1966_v52 = vld [vmem:[%s4995_s19 + $0x398] sm:$0xff]  ;;  %v246_v53 = vld [vmem:[%s5117_s23 + $0x448] sm:$0xff] }
  0xbb   : >> { %2978 = vmatprep.subr.mxu1 %v4886_v1  ;;  %2674 = vmatpush2.msra.mxu0 %v1944_v54  ;;  %v438_v54 = vld [vmem:[%s5117_s23 + $0x44a] sm:$0xff] }
  0xbc   : >> { %2979 = vmatpush2.msra.mxu1 %v1976_v55  ;;  %2187 = vmatmul.mubr.f32.gmra.mxu0 %v236_v56  ;;  %v343_v55 = vld [vmem:[%s5117_s23 + $0x461] sm:$0xff] }
  0xbd   : >> { %2492 = vmatmul.mubr.f32.gmra.mxu1 %v428_v57  ;;  %2191 = vmatprep.mubr.f32.mxu0 %v333_v58  ;;  %v535_v56 = vld [vmem:[%s5117_s23 + $0x463] sm:$0xff]  ;;  %v1933_v57 = vld [vmem:[%s4995_s19 + $0x290] sm:$0xff] }
  0xbe   : >> { %2496 = vmatprep.mubr.f32.mxu1 %v525_v59  ;;  %2675 = vmatprep.subr.mxu0 %v4886_v1  ;;  %v1965_v58 = vld [vmem:[%s4995_s19 + $0x390] sm:$0xff]  ;;  %v247_v59 = vld [vmem:[%s5117_s23 + $0x460] sm:$0xff] }
  0xbf   : >> { %2980 = vmatprep.subr.mxu1 %v4886_v1  ;;  %2676 = vmatpush2.msra.mxu0 %v1943_v60  ;;  %v439_v60 = vld [vmem:[%s5117_s23 + $0x462] sm:$0xff] }
  0xc0   : >> { %2981 = vmatpush2.msra.mxu1 %v1975_v61  ;;  %2192 = vmatmul.mubr.f32.gmra.mxu0 %v237_v62  ;;  %v344_v61 = vld [vmem:[%s5117_s23 + $0x469] sm:$0xff] }
  0xc1   : >> { %2497 = vmatmul.mubr.f32.gmra.mxu1 %v429_v63  ;;  %2196 = vmatprep.mubr.f32.mxu0 %v334_v0  ;;  %v536_v62 = vld [vmem:[%s5117_s23 + $0x46b] sm:$0xff] }
  0xc2   : >> { %2501 = vmatprep.mubr.f32.mxu1 %v526_v2  ;;  %2677 = vmatprep.subr.mxu0 %v4886_v1  ;;  %v1932_v63 = vld [vmem:[%s4995_s19 + $0x288] sm:$0xff] }
  0xc3   : >> { %2982 = vmatprep.subr.mxu1 %v4886_v1  ;;  %2678 = vmatpush2.msra.mxu0 %v1942_v3  ;;  %v1964_v0 = vld [vmem:[%s4995_s19 + $0x388] sm:$0xff] }
  0xc4   : >> { %2983 = vmatpush2.msra.mxu1 %v1974_v4  ;;  %2197 = vmatmul.mubr.f32.gmra.mxu0 %v238_v5  ;;  %v248_v2 = vld [vmem:[%s5117_s23 + $0x468] sm:$0xff]  ;;  %v345_v4 = vld [vmem:[%s5117_s23 + $0x471] sm:$0xff] }
  0xc5   : >> { %2502 = vmatmul.mubr.f32.gmra.mxu1 %v430_v6  ;;  %2201 = vmatprep.mubr.f32.mxu0 %v335_v7  ;;  %v440_v3 = vld [vmem:[%s5117_s23 + $0x46a] sm:$0xff]  ;;  %v537_v5 = vld [vmem:[%s5117_s23 + $0x473] sm:$0xff]  ;;  %v1931_v6 = vld [vmem:[%s4995_s19 + $0x280] sm:$0xff] }
  0xc6   : >> { %2506 = vmatprep.mubr.f32.mxu1 %v527_v8  ;;  %2679 = vmatprep.subr.mxu0 %v4886_v1  ;;  %v1963_v7 = vld [vmem:[%s4995_s19 + $0x380] sm:$0xff]  ;;  %v249_v8 = vld [vmem:[%s5117_s23 + $0x470] sm:$0xff] }
  0xc7   : >> { %2984 = vmatprep.subr.mxu1 %v4886_v1  ;;  %2680 = vmatpush2.msra.mxu0 %v1941_v9  ;;  %v441_v9 = vld [vmem:[%s5117_s23 + $0x472] sm:$0xff] }
  0xc8   : >> { %2985 = vmatpush2.msra.mxu1 %v1973_v10  ;;  %2202 = vmatmul.mubr.f32.gmra.mxu0 %v239_v11  ;;  %v346_v10 = vld [vmem:[%s5117_s23 + $0x489] sm:$0xff] }
  0xc9   : >> { %2507 = vmatmul.mubr.f32.gmra.mxu1 %v431_v12  ;;  %2206 = vmatprep.mubr.f32.mxu0 %v336_v13  ;;  %v538_v11 = vld [vmem:[%s5117_s23 + $0x48b] sm:$0xff] }
  0xca   : >> { %2511 = vmatprep.mubr.f32.mxu1 %v528_v14  ;;  %2681 = vmatprep.subr.mxu0 %v4886_v1  ;;  %v250_v12 = vld [vmem:[%s5117_s23 + $0x488] sm:$0xff]  ;;  %v347_v14 = vld [vmem:[%s5117_s23 + $0x491] sm:$0xff] }
  0xcb   : >> { %2986 = vmatprep.subr.mxu1 %v4886_v1  ;;  %2682 = vmatpush2.msra.mxu0 %v1940_v15  ;;  %v442_v13 = vld [vmem:[%s5117_s23 + $0x48a] sm:$0xff]  ;;  %v539_v15 = vld [vmem:[%s5117_s23 + $0x493] sm:$0xff] }
  0xcc   : >> { %2987 = vmatpush2.msra.mxu1 %v1972_v16  ;;  %2207 = vmatmul.mubr.f32.gmra.mxu0 %v240_v17  ;;  %v251_v16 = vld [vmem:[%s5117_s23 + $0x490] sm:$0xff] }
  0xcd   : >> { %2512 = vmatmul.mubr.f32.gmra.mxu1 %v432_v18  ;;  %2211 = vmatprep.mubr.f32.mxu0 %v337_v19  ;;  %v443_v17 = vld [vmem:[%s5117_s23 + $0x492] sm:$0xff]  ;;  %v540_v19 = vld [vmem:[%s5117_s23 + $0x49b] sm:$0xff] }
  0xce   : >> { %2516 = vmatprep.mubr.f32.mxu1 %v529_v20  ;;  %2683 = vmatprep.subr.mxu0 %v4886_v1  ;;  %v348_v18 = vld [vmem:[%s5117_s23 + $0x499] sm:$0xff] }
  0xcf   : >> { %2988 = vmatprep.subr.mxu1 %v4886_v1  ;;  %2684 = vmatpush2.msra.mxu0 %v1939_v21  ;;  %v252_v20 = vld [vmem:[%s5117_s23 + $0x498] sm:$0xff] }
  0xd0   : >> { %2989 = vmatpush2.msra.mxu1 %v1971_v22  ;;  %2212 = vmatmul.mubr.f32.gmra.mxu0 %v241_v23  ;;  %v444_v21 = vld [vmem:[%s5117_s23 + $0x49a] sm:$0xff]  ;;  %v349_v22 = vld [vmem:[%s5117_s23 + $0x4b1] sm:$0xff] }
  0xd1   : >> { %2517 = vmatmul.mubr.f32.gmra.mxu1 %v433_v24  ;;  %2216 = vmatprep.mubr.f32.mxu0 %v338_v25  ;;  %v541_v23 = vld [vmem:[%s5117_s23 + $0x4b3] sm:$0xff] }
  0xd2   : >> { %2521 = vmatprep.mubr.f32.mxu1 %v530_v26  ;;  %2685 = vmatprep.subr.mxu0 %v4886_v1  ;;  %v253_v24 = vld [vmem:[%s5117_s23 + $0x4b0] sm:$0xff]  ;;  %v350_v26 = vld [vmem:[%s5117_s23 + $0x4b9] sm:$0xff] }
  0xd3   : >> { %2990 = vmatprep.subr.mxu1 %v4886_v1  ;;  %2686 = vmatpush2.msra.mxu0 %v1938_v27  ;;  %v445_v25 = vld [vmem:[%s5117_s23 + $0x4b2] sm:$0xff]  ;;  %v542_v27 = vld [vmem:[%s5117_s23 + $0x4bb] sm:$0xff] }
  0xd4   : >> { %2991 = vmatpush2.msra.mxu1 %v1970_v28  ;;  %2217 = vmatmul.mubr.f32.gmra.mxu0 %v242_v29  ;;  %v254_v28 = vld [vmem:[%s5117_s23 + $0x4b8] sm:$0xff] }
  0xd5   : >> { %2522 = vmatmul.mubr.f32.gmra.mxu1 %v434_v30  ;;  %2221 = vmatprep.mubr.f32.mxu0 %v339_v31  ;;  %v446_v29 = vld [vmem:[%s5117_s23 + $0x4ba] sm:$0xff]  ;;  %v543_v31 = vld [vmem:[%s5117_s23 + $0x4c3] sm:$0xff] }
  0xd6   : >> { %2526 = vmatprep.mubr.f32.mxu1 %v531_v32  ;;  %2687 = vmatprep.subr.mxu0 %v4886_v1  ;;  %v351_v30 = vld [vmem:[%s5117_s23 + $0x4c1] sm:$0xff] }
  0xd7   : >> { %2992 = vmatprep.subr.mxu1 %v4886_v1  ;;  %2688 = vmatpush2.msra.mxu0 %v1937_v33  ;;  %v255_v32 = vld [vmem:[%s5117_s23 + $0x4c0] sm:$0xff] }
  0xd8   : >> { %2993 = vmatpush2.msra.mxu1 %v1969_v34  ;;  %2222 = vmatmul.mubr.f32.gmra.mxu0 %v243_v35  ;;  %v447_v33 = vld [vmem:[%s5117_s23 + $0x4c2] sm:$0xff]  ;;  %v352_v34 = vld [vmem:[%s5117_s23 + $0x4d9] sm:$0xff] }
  0xd9   : >> { %2527 = vmatmul.mubr.f32.gmra.mxu1 %v435_v36  ;;  %2226 = vmatprep.mubr.f32.mxu0 %v340_v37  ;;  %v544_v35 = vld [vmem:[%s5117_s23 + $0x4db] sm:$0xff] }
  0xda   : >> { %2531 = vmatprep.mubr.f32.mxu1 %v532_v38  ;;  %2689 = vmatprep.subr.mxu0 %v4886_v1  ;;  %v256_v36 = vld [vmem:[%s5117_s23 + $0x4d8] sm:$0xff]  ;;  %v353_v38 = vld [vmem:[%s5117_s23 + $0x4e1] sm:$0xff] }
  0xdb   : >> { %2994 = vmatprep.subr.mxu1 %v4886_v1  ;;  %2690 = vmatpush2.msra.mxu0 %v1936_v39  ;;  %v448_v37 = vld [vmem:[%s5117_s23 + $0x4da] sm:$0xff]  ;;  %v545_v39 = vld [vmem:[%s5117_s23 + $0x4e3] sm:$0xff] }
  0xdc   : >> { %2995 = vmatpush2.msra.mxu1 %v1968_v40  ;;  %2227 = vmatmul.mubr.f32.gmra.mxu0 %v244_v41  ;;  %v257_v40 = vld [vmem:[%s5117_s23 + $0x4e0] sm:$0xff] }
  0xdd   : >> { %2532 = vmatmul.mubr.f32.gmra.mxu1 %v436_v42  ;;  %2231 = vmatprep.mubr.f32.mxu0 %v341_v43  ;;  %v449_v41 = vld [vmem:[%s5117_s23 + $0x4e2] sm:$0xff]  ;;  %v546_v43 = vld [vmem:[%s5117_s23 + $0x4eb] sm:$0xff] }
  0xde   : >> { %2536 = vmatprep.mubr.f32.mxu1 %v533_v44  ;;  %2691 = vmatprep.subr.mxu0 %v4886_v1  ;;  %v354_v42 = vld [vmem:[%s5117_s23 + $0x4e9] sm:$0xff] }
  0xdf   : >> { %2996 = vmatprep.subr.mxu1 %v4886_v1  ;;  %2692 = vmatpush2.msra.mxu0 %v1935_v45  ;;  %v258_v44 = vld [vmem:[%s5117_s23 + $0x4e8] sm:$0xff] }
  0xe0   : >> { %2997 = vmatpush2.msra.mxu1 %v1967_v46  ;;  %2232 = vmatmul.mubr.f32.gmra.mxu0 %v245_v47  ;;  %v450_v45 = vld [vmem:[%s5117_s23 + $0x4ea] sm:$0xff]  ;;  %v355_v46 = vld [vmem:[%s5117_s23 + $0x501] sm:$0xff] }
  0xe1   : >> { %2537 = vmatmul.mubr.f32.gmra.mxu1 %v437_v48  ;;  %2236 = vmatprep.mubr.f32.mxu0 %v342_v49  ;;  %v547_v47 = vld [vmem:[%s5117_s23 + $0x503] sm:$0xff] }
  0xe2   : >> { %2541 = vmatprep.mubr.f32.mxu1 %v534_v50  ;;  %2693 = vmatprep.subr.mxu0 %v4886_v1  ;;  %v259_v48 = vld [vmem:[%s5117_s23 + $0x500] sm:$0xff]  ;;  %v356_v50 = vld [vmem:[%s5117_s23 + $0x509] sm:$0xff] }
  0xe3   : >> { %2998 = vmatprep.subr.mxu1 %v4886_v1  ;;  %2694 = vmatpush2.msra.mxu0 %v1934_v51  ;;  %v451_v49 = vld [vmem:[%s5117_s23 + $0x502] sm:$0xff]  ;;  %v548_v51 = vld [vmem:[%s5117_s23 + $0x50b] sm:$0xff] }
  0xe4   : >> { %2999 = vmatpush2.msra.mxu1 %v1966_v52  ;;  %2237 = vmatmul.mubr.f32.gmra.mxu0 %v246_v53  ;;  %v260_v52 = vld [vmem:[%s5117_s23 + $0x508] sm:$0xff] }
  0xe5   : >> { %2542 = vmatmul.mubr.f32.gmra.mxu1 %v438_v54  ;;  %2241 = vmatprep.mubr.f32.mxu0 %v343_v55  ;;  %v452_v53 = vld [vmem:[%s5117_s23 + $0x50a] sm:$0xff]  ;;  %v549_v55 = vld [vmem:[%s5117_s23 + $0x513] sm:$0xff] }
  0xe6   : >> { %2546 = vmatprep.mubr.f32.mxu1 %v535_v56  ;;  %2695 = vmatprep.subr.mxu0 %v4886_v1  ;;  %v357_v54 = vld [vmem:[%s5117_s23 + $0x511] sm:$0xff] }
  0xe7   : >> { %3000 = vmatprep.subr.mxu1 %v4886_v1  ;;  %2696 = vmatpush2.msra.mxu0 %v1933_v57  ;;  %v261_v56 = vld [vmem:[%s5117_s23 + $0x510] sm:$0xff] }
  0xe8   : >> { %3001 = vmatpush2.msra.mxu1 %v1965_v58  ;;  %2242 = vmatmul.mubr.f32.gmra.mxu0 %v247_v59  ;;  %v453_v57 = vld [vmem:[%s5117_s23 + $0x512] sm:$0xff]  ;;  %v358_v58 = vld [vmem:[%s5117_s23 + $0x529] sm:$0xff] }
  0xe9   : >> { %2547 = vmatmul.mubr.f32.gmra.mxu1 %v439_v60  ;;  %2246 = vmatprep.mubr.f32.mxu0 %v344_v61  ;;  %v550_v59 = vld [vmem:[%s5117_s23 + $0x52b] sm:$0xff] }
  0xea   : >> { %2551 = vmatprep.mubr.f32.mxu1 %v536_v62  ;;  %2697 = vmatprep.subr.mxu0 %v4886_v1  ;;  %v262_v60 = vld [vmem:[%s5117_s23 + $0x528] sm:$0xff]  ;;  %v359_v62 = vld [vmem:[%s5117_s23 + $0x531] sm:$0xff] }
  0xeb   : >> { %3002 = vmatprep.subr.mxu1 %v4886_v1  ;;  %2698 = vmatpush2.msra.mxu0 %v1932_v63  ;;  %v454_v61 = vld [vmem:[%s5117_s23 + $0x52a] sm:$0xff]  ;;  %v551_v63 = vld [vmem:[%s5117_s23 + $0x533] sm:$0xff] }
  0xec   : >> { %3003 = vmatpush2.msra.mxu1 %v1964_v0  ;;  %2247 = vmatmul.mubr.f32.gmra.mxu0 %v248_v2  ;;  %v263_v0 = vld [vmem:[%s5117_s23 + $0x530] sm:$0xff] }
  0xed   : >> { %2552 = vmatmul.mubr.f32.gmra.mxu1 %v440_v3  ;;  %2251 = vmatprep.mubr.f32.mxu0 %v345_v4  ;;  %v455_v2 = vld [vmem:[%s5117_s23 + $0x532] sm:$0xff]  ;;  %v552_v4 = vld [vmem:[%s5117_s23 + $0x53b] sm:$0xff] }
  0xee   : >> { %2556 = vmatprep.mubr.f32.mxu1 %v537_v5  ;;  %2699 = vmatprep.subr.mxu0 %v4886_v1  ;;  %v360_v3 = vld [vmem:[%s5117_s23 + $0x539] sm:$0xff] }
  0xef   : >> { %3004 = vmatprep.subr.mxu1 %v4886_v1  ;;  %2700 = vmatpush2.msra.mxu0 %v1931_v6  ;;  %v264_v5 = vld [vmem:[%s5117_s23 + $0x538] sm:$0xff] }
  0xf0   : >> { %3005 = vmatpush2.msra.mxu1 %v1963_v7  ;;  %2252 = vmatmul.mubr.f32.gmra.mxu0 %v249_v8  ;;  %v456_v6 = vld [vmem:[%s5117_s23 + $0x53a] sm:$0xff]  ;;  %v697_v7 = vld [vmem:[%s5117_s23 + $0x5] sm:$0xff] }
  0xf1   : >> { %2557 = vmatmul.mubr.f32.gmra.mxu1 %v441_v9  ;;  %2256 = vmatprep.mubr.f32.mxu0 %v346_v10  ;;  %v889_v8 = vld [vmem:[%s5117_s23 + $0x7] sm:$0xff] }
  0xf2   : >> { %2561 = vmatprep.mubr.f32.mxu1 %v538_v11  ;;  %3247 = vmatprep.subr.mxu0 %v4886_v1  ;;  %v601_v9 = vld [vmem:[%s5117_s23 + $0x4] sm:$0xff]  ;;  %v1994_v11 = vld [vmem:[%s4995_s19 + $0x478] sm:$0xff] }
  0xf3   : >> { %4687 = vmatprep.subr.mxu1 %v4886_v1  ;;  %v793_v10 = vld [vmem:[%s5117_s23 + $0x6] sm:$0xff] }
  0xf4   : >> { %2257 = vmatmul.mubr.f32.gmra.mxu0 %v250_v12  ;;  %v698_v12 = vld [vmem:[%s5117_s23 + $0xd] sm:$0xff] }
  0xf5   : >> { %2562 = vmatmul.mubr.f32.gmra.mxu1 %v442_v13  ;;  %2261 = vmatprep.mubr.f32.mxu0 %v347_v14  ;;  %v890_v13 = vld [vmem:[%s5117_s23 + $0xf] sm:$0xff] }
  0xf6   : >> { %2566 = vmatprep.mubr.f32.mxu1 %v539_v15 }
  0xf8   : >> { %2262 = vmatmul.mubr.f32.gmra.mxu0 %v251_v16 }
  0xf9   : >> { %2567 = vmatmul.mubr.f32.gmra.mxu1 %v443_v17  ;;  %2266 = vmatprep.mubr.f32.mxu0 %v348_v18  ;;  %v602_v17 = vld [vmem:[%s5117_s23 + $0xc] sm:$0xff] }
  0xfa   : >> { %2571 = vmatprep.mubr.f32.mxu1 %v540_v19  ;;  %v794_v18 = vld [vmem:[%s5117_s23 + $0xe] sm:$0xff] }
  0xfc   : >> { %2267 = vmatmul.mubr.f32.gmra.mxu0 %v252_v20 }
  0xfd   : >> { %2572 = vmatmul.mubr.f32.gmra.mxu1 %v444_v21  ;;  %2271 = vmatprep.mubr.f32.mxu0 %v349_v22  ;;  %v699_v21 = vld [vmem:[%s5117_s23 + $0x15] sm:$0xff] }
  0xfe   : >> { %2576 = vmatprep.mubr.f32.mxu1 %v541_v23  ;;  %v891_v22 = vld [vmem:[%s5117_s23 + $0x17] sm:$0xff] }
  0xff   : >> { %v1993_v23 = vld [vmem:[%s4995_s19 + $0x470] sm:$0xff] }
 0x100   : >> { %2272 = vmatmul.mubr.f32.gmra.mxu0 %v253_v24 }
 0x101   : >> { %2577 = vmatmul.mubr.f32.gmra.mxu1 %v445_v25  ;;  %2276 = vmatprep.mubr.f32.mxu0 %v350_v26 }
 0x102   : >> { %2581 = vmatprep.mubr.f32.mxu1 %v542_v27  ;;  %v603_v27 = vld [vmem:[%s5117_s23 + $0x14] sm:$0xff] }
 0x104   : >> { %2277 = vmatmul.mubr.f32.gmra.mxu0 %v254_v28  ;;  %v795_v28 = vld [vmem:[%s5117_s23 + $0x16] sm:$0xff] }
 0x105   : >> { %2582 = vmatmul.mubr.f32.gmra.mxu1 %v446_v29  ;;  %2281 = vmatprep.mubr.f32.mxu0 %v351_v30 }
 0x106   : >> { %2586 = vmatprep.mubr.f32.mxu1 %v543_v31  ;;  %v700_v31 = vld [vmem:[%s5117_s23 + $0x2d] sm:$0xff] }
 0x108   : >> { %2282 = vmatmul.mubr.f32.gmra.mxu0 %v255_v32  ;;  %v892_v32 = vld [vmem:[%s5117_s23 + $0x2f] sm:$0xff] }
 0x109   : >> { %2587 = vmatmul.mubr.f32.gmra.mxu1 %v447_v33  ;;  %2286 = vmatprep.mubr.f32.mxu0 %v352_v34  ;;  %v1992_v33 = vld [vmem:[%s4995_s19 + $0x468] sm:$0xff] }
 0x10a   : >> { %2591 = vmatprep.mubr.f32.mxu1 %v544_v35 }
 0x10c   : >> { %2287 = vmatmul.mubr.f32.gmra.mxu0 %v256_v36 }
 0x10d   : >> { %2592 = vmatmul.mubr.f32.gmra.mxu1 %v448_v37  ;;  %2291 = vmatprep.mubr.f32.mxu0 %v353_v38  ;;  %v604_v37 = vld [vmem:[%s5117_s23 + $0x2c] sm:$0xff] }
 0x10e   : >> { %2596 = vmatprep.mubr.f32.mxu1 %v545_v39  ;;  %v796_v38 = vld [vmem:[%s5117_s23 + $0x2e] sm:$0xff] }
 0x110   : >> { %2292 = vmatmul.mubr.f32.gmra.mxu0 %v257_v40 }
 0x111   : >> { %2597 = vmatmul.mubr.f32.gmra.mxu1 %v449_v41  ;;  %2296 = vmatprep.mubr.f32.mxu0 %v354_v42  ;;  %v701_v41 = vld [vmem:[%s5117_s23 + $0x35] sm:$0xff] }
 0x112   : >> { %2601 = vmatprep.mubr.f32.mxu1 %v546_v43  ;;  %v893_v42 = vld [vmem:[%s5117_s23 + $0x37] sm:$0xff]  ;;  %v1991_v43 = vld [vmem:[%s4995_s19 + $0x460] sm:$0xff] }
 0x114   : >> { %2297 = vmatmul.mubr.f32.gmra.mxu0 %v258_v44 }
 0x115   : >> { %2602 = vmatmul.mubr.f32.gmra.mxu1 %v450_v45  ;;  %2301 = vmatprep.mubr.f32.mxu0 %v355_v46 }
 0x116   : >> { %2606 = vmatprep.mubr.f32.mxu1 %v547_v47  ;;  %v605_v47 = vld [vmem:[%s5117_s23 + $0x34] sm:$0xff] }
 0x118   : >> { %2302 = vmatmul.mubr.f32.gmra.mxu0 %v259_v48  ;;  %v797_v48 = vld [vmem:[%s5117_s23 + $0x36] sm:$0xff] }
 0x119   : >> { %2607 = vmatmul.mubr.f32.gmra.mxu1 %v451_v49  ;;  %2306 = vmatprep.mubr.f32.mxu0 %v356_v50 }
 0x11a   : >> { %2611 = vmatprep.mubr.f32.mxu1 %v548_v51  ;;  %v702_v51 = vld [vmem:[%s5117_s23 + $0x3d] sm:$0xff] }
 0x11c   : >> { %2307 = vmatmul.mubr.f32.gmra.mxu0 %v260_v52  ;;  %v894_v52 = vld [vmem:[%s5117_s23 + $0x3f] sm:$0xff] }
 0x11d   : >> { %2612 = vmatmul.mubr.f32.gmra.mxu1 %v452_v53  ;;  %2311 = vmatprep.mubr.f32.mxu0 %v357_v54  ;;  %v1990_v53 = vld [vmem:[%s4995_s19 + $0x458] sm:$0xff] }
 0x11e   : >> { %2616 = vmatprep.mubr.f32.mxu1 %v549_v55 }
 0x120   : >> { %2312 = vmatmul.mubr.f32.gmra.mxu0 %v261_v56 }
 0x121   : >> { %2617 = vmatmul.mubr.f32.gmra.mxu1 %v453_v57  ;;  %2316 = vmatprep.mubr.f32.mxu0 %v358_v58  ;;  %v606_v57 = vld [vmem:[%s5117_s23 + $0x3c] sm:$0xff] }
 0x122   : >> { %2621 = vmatprep.mubr.f32.mxu1 %v550_v59  ;;  %v798_v58 = vld [vmem:[%s5117_s23 + $0x3e] sm:$0xff] }
 0x124   : >> { %2317 = vmatmul.mubr.f32.gmra.mxu0 %v262_v60 }
 0x125   : >> { %2622 = vmatmul.mubr.f32.gmra.mxu1 %v454_v61  ;;  %2321 = vmatprep.mubr.f32.mxu0 %v359_v62  ;;  %v703_v61 = vld [vmem:[%s5117_s23 + $0x55] sm:$0xff] }
 0x126   : >> { %2626 = vmatprep.mubr.f32.mxu1 %v551_v63  ;;  %v895_v62 = vld [vmem:[%s5117_s23 + $0x57] sm:$0xff] }
 0x127   : >> { %v1989_v63 = vld [vmem:[%s4995_s19 + $0x450] sm:$0xff] }
 0x128   : >> { %2322 = vmatmul.mubr.f32.gmra.mxu0 %v263_v0 }
 0x129   : >> { %2627 = vmatmul.mubr.f32.gmra.mxu1 %v455_v2  ;;  %2326 = vmatprep.mubr.f32.mxu0 %v360_v3 }
 0x12a   : >> { %2631 = vmatprep.mubr.f32.mxu1 %v552_v4  ;;  %v607_v4 = vld [vmem:[%s5117_s23 + $0x54] sm:$0xff] }
 0x12c   : >> { %2327 = vmatmul.mubr.f32.gmra.mxu0 %v264_v5  ;;  %v799_v5 = vld [vmem:[%s5117_s23 + $0x56] sm:$0xff] }
 0x12d   : >> { %2632 = vmatmul.mubr.f32.gmra.mxu1 %v456_v6  ;;  %2701 = vmatprep.mubr.f32.mxu0 %v697_v7 }
 0x12e   : >> { %3006 = vmatprep.mubr.f32.mxu1 %v889_v8  ;;  %v704_v8 = vld [vmem:[%s5117_s23 + $0x5d] sm:$0xff] }
 0x130   : >> { %v2093_v14 = vpop.f32.mrf.mxu0  ;;  %2702 = vmatmul.mubr.f32.vlgmr.msra.gmra.mxu0 %v601_v9  ;;  %v896_v9 = vld [vmem:[%s5117_s23 + $0x5f] sm:$0xff] }
 0x131   : >> { %v2398_v15 = vpop.f32.mrf.mxu1  ;;  %3007 = vmatmul.mubr.f32.vlgmr.msra.gmra.mxu1 %v793_v10  ;;  %3248 = vmatpush1.msra.mxu0 %v1994_v11  ;;  %v1988_v10 = vld [vmem:[%s4995_s19 + $0x448] sm:$0xff] }
 0x132   : >> { %v5458_v16 = vadd.f32 %v2398_v15, %v2093_v14  ;;  %4719 = vmatpush1.msra.mxu1 %v1994_v11  ;;  %v2095_v19 = vpop.f32.mrf.mxu0  ;;  %2706 = vmatprep.mubr.f32.mxu0 %v698_v12  ;;  %v608_v14 = vld [vmem:[%s5117_s23 + $0x5c] sm:$0xff] }
 0x133   : >> { %v2400_v20 = vpop.f32.mrf.mxu1  ;;  %3011 = vmatprep.mubr.f32.mxu1 %v890_v13  ;;  %3249 = vmatprep.subr.mxu0 %v4886_v1  ;;  %v800_v15 = vld [vmem:[%s5117_s23 + $0x5e] sm:$0xff] }
 0x134   : >> { %4688 = vmatprep.subr.mxu1 %v4886_v1  ;;  %v2098_v24 = vpop.f32.mrf.mxu0  ;;  %2707 = vmatmul.mubr.f32.gmra.mxu0 %v602_v17  ;;  %v705_v19 = vld [vmem:[%s5117_s23 + $0x65] sm:$0xff] }
 0x135   : >> { %v2403_v25 = vpop.f32.mrf.mxu1  ;;  %3012 = vmatmul.mubr.f32.gmra.mxu1 %v794_v18  ;;  %2711 = vmatprep.mubr.f32.mxu0 %v699_v21  ;;  %v897_v20 = vld [vmem:[%s5117_s23 + $0x67] sm:$0xff] }
 0x136   : >> { %v5467_v26 = vadd.f32 %v2403_v25, %v2098_v24  ;;  %3016 = vmatprep.mubr.f32.mxu1 %v891_v22  ;;  %v2100_v29 = vpop.f32.mrf.mxu0  ;;  %3250 = vmatpush1.msra.mxu0 %v1993_v23  ;;  %v1987_v21 = vld [vmem:[%s4995_s19 + $0x440] sm:$0xff] }
 0x137   : >> { %v2405_v30 = vpop.f32.mrf.mxu1  ;;  %4720 = vmatpush1.msra.mxu1 %v1993_v23  ;;  %3251 = vmatprep.subr.mxu0 %v4886_v1  ;;  %v609_v25 = vld [vmem:[%s5117_s23 + $0x64] sm:$0xff] }
 0x138   : >> { %4689 = vmatprep.subr.mxu1 %v4886_v1  ;;  %v2103_v34 = vpop.f32.mrf.mxu0  ;;  %2712 = vmatmul.mubr.f32.gmra.mxu0 %v603_v27  ;;  %v801_v27 = vld [vmem:[%s5117_s23 + $0x66] sm:$0xff]  ;;  %v706_v30 = vld [vmem:[%s5117_s23 + $0x7d] sm:$0xff] }
 0x139   : >> { %v2408_v35 = vpop.f32.mrf.mxu1  ;;  %3017 = vmatmul.mubr.f32.gmra.mxu1 %v795_v28  ;;  %2716 = vmatprep.mubr.f32.mxu0 %v700_v31  ;;  %v898_v31 = vld [vmem:[%s5117_s23 + $0x7f] sm:$0xff] }
 0x13a   : >> { %v5476_v36 = vadd.f32 %v2408_v35, %v2103_v34  ;;  %3021 = vmatprep.mubr.f32.mxu1 %v892_v32  ;;  %v2105_v39 = vpop.f32.mrf.mxu0  ;;  %3252 = vmatpush1.msra.mxu0 %v1992_v33  ;;  %v1986_v32 = vld [vmem:[%s4995_s19 + $0x438] sm:$0xff] }
 0x13b   : >> { %v2410_v40 = vpop.f32.mrf.mxu1  ;;  %4721 = vmatpush1.msra.mxu1 %v1992_v33  ;;  %3253 = vmatprep.subr.mxu0 %v4886_v1 }
 0x13c   : >> { %4690 = vmatprep.subr.mxu1 %v4886_v1  ;;  %v2108_v44 = vpop.f32.mrf.mxu0  ;;  %2717 = vmatmul.mubr.f32.gmra.mxu0 %v604_v37  ;;  %v610_v37 = vld [vmem:[%s5117_s23 + $0x7c] sm:$0xff] }
 0x13d   : >> { %v2413_v45 = vpop.f32.mrf.mxu1  ;;  %3022 = vmatmul.mubr.f32.gmra.mxu1 %v796_v38  ;;  %2721 = vmatprep.mubr.f32.mxu0 %v701_v41  ;;  %v802_v38 = vld [vmem:[%s5117_s23 + $0x7e] sm:$0xff] }
 0x13e   : >> { %v5485_v46 = vadd.f32 %v2413_v45, %v2108_v44  ;;  %3026 = vmatprep.mubr.f32.mxu1 %v893_v42  ;;  %v2110_v49 = vpop.f32.mrf.mxu0  ;;  %3254 = vmatpush1.msra.mxu0 %v1991_v43  ;;  %v707_v41 = vld [vmem:[%s5117_s23 + $0x85] sm:$0xff] }
 0x13f   : >> { %v2415_v50 = vpop.f32.mrf.mxu1  ;;  %4722 = vmatpush1.msra.mxu1 %v1991_v43  ;;  %3255 = vmatprep.subr.mxu0 %v4886_v1  ;;  %v899_v42 = vld [vmem:[%s5117_s23 + $0x87] sm:$0xff]  ;;  %v1985_v43 = vld [vmem:[%s4995_s19 + $0x430] sm:$0xff] }
 0x140   : >> { %4691 = vmatprep.subr.mxu1 %v4886_v1  ;;  %v2113_v54 = vpop.f32.mrf.mxu0  ;;  %2722 = vmatmul.mubr.f32.gmra.mxu0 %v605_v47  ;;  %v803_v49 = vld [vmem:[%s5117_s23 + $0x86] sm:$0xff] }
 0x141   : >> { %v2418_v55 = vpop.f32.mrf.mxu1  ;;  %3027 = vmatmul.mubr.f32.gmra.mxu1 %v797_v48  ;;  %2726 = vmatprep.mubr.f32.mxu0 %v702_v51  ;;  %v611_v48 = vld [vmem:[%s5117_s23 + $0x84] sm:$0xff] }
 0x142   : >> { %v5494_v56 = vadd.f32 %v2418_v55, %v2113_v54  ;;  %3031 = vmatprep.mubr.f32.mxu1 %v894_v52  ;;  %v2115_v59 = vpop.f32.mrf.mxu0  ;;  %3256 = vmatpush1.msra.mxu0 %v1990_v53  ;;  %v708_v52 = vld [vmem:[%s5117_s23 + $0x8d] sm:$0xff] }
 0x143   : >> { %v2420_v60 = vpop.f32.mrf.mxu1  ;;  %4723 = vmatpush1.msra.mxu1 %v1990_v53  ;;  %3257 = vmatprep.subr.mxu0 %v4886_v1  ;;  %v900_v53 = vld [vmem:[%s5117_s23 + $0x8f] sm:$0xff] }
 0x144   : >> { %4692 = vmatprep.subr.mxu1 %v4886_v1  ;;  %v2118_v0 = vpop.f32.mrf.mxu0  ;;  %2727 = vmatmul.mubr.f32.gmra.mxu0 %v606_v57  ;;  %v1984_v54 = vld [vmem:[%s4995_s19 + $0x428] sm:$0xff] }
 0x145   : >> { %v2423_v2 = vpop.f32.mrf.mxu1  ;;  %3032 = vmatmul.mubr.f32.gmra.mxu1 %v798_v58  ;;  %2731 = vmatprep.mubr.f32.mxu0 %v703_v61  ;;  %v612_v59 = vld [vmem:[%s5117_s23 + $0x8c] sm:$0xff] }
 0x146   : >> { %v5503_v3 = vadd.f32 %v2423_v2, %v2118_v0  ;;  %3036 = vmatprep.mubr.f32.mxu1 %v895_v62  ;;  %v2120_v6 = vpop.f32.mrf.mxu0  ;;  %3258 = vmatpush1.msra.mxu0 %v1989_v63  ;;  %v804_v60 = vld [vmem:[%s5117_s23 + $0x8e] sm:$0xff]  ;;  %v1983_v2 = vld [vmem:[%s4995_s19 + $0x420] sm:$0xff] }
 0x147   : >> { %v2425_v7 = vpop.f32.mrf.mxu1  ;;  %4724 = vmatpush1.msra.mxu1 %v1989_v63  ;;  %3259 = vmatprep.subr.mxu0 %v4886_v1  ;;  %v709_v63 = vld [vmem:[%s5117_s23 + $0xa5] sm:$0xff] }
 0x148   : >> { %4693 = vmatprep.subr.mxu1 %v4886_v1  ;;  %v2123_v11 = vpop.f32.mrf.mxu0  ;;  %2732 = vmatmul.mubr.f32.gmra.mxu0 %v607_v4  ;;  %v901_v0 = vld [vmem:[%s5117_s23 + $0xa7] sm:$0xff] }
 0x149   : >> { %v2428_v12 = vpop.f32.mrf.mxu1  ;;  %3037 = vmatmul.mubr.f32.gmra.mxu1 %v799_v5  ;;  %2736 = vmatprep.mubr.f32.mxu0 %v704_v8  ;;  %v613_v7 = vld [vmem:[%s5117_s23 + $0xa4] sm:$0xff] }
 0x14a   : >> { %v5512_v13 = vadd.f32 %v2428_v12, %v2123_v11  ;;  %3041 = vmatprep.mubr.f32.mxu1 %v896_v9  ;;  %v2125_v17 = vpop.f32.mrf.mxu0  ;;  %3260 = vmatpush1.msra.mxu0 %v1988_v10  ;;  %v805_v8 = vld [vmem:[%s5117_s23 + $0xa6] sm:$0xff]  ;;  %v902_v12 = vld [vmem:[%s5117_s23 + $0xaf] sm:$0xff] }
 0x14b   : >> { %v2430_v18 = vpop.f32.mrf.mxu1  ;;  %4725 = vmatpush1.msra.mxu1 %v1988_v10  ;;  %3261 = vmatprep.subr.mxu0 %v4886_v1  ;;  %v710_v11 = vld [vmem:[%s5117_s23 + $0xad] sm:$0xff] }
 0x14c   : >> { %4694 = vmatprep.subr.mxu1 %v4886_v1  ;;  %v2128_v22 = vpop.f32.mrf.mxu0  ;;  %2737 = vmatmul.mubr.f32.gmra.mxu0 %v608_v14  ;;  %v1982_v14 = vld [vmem:[%s4995_s19 + $0x418] sm:$0xff] }
 0x14d   : >> { %v2433_v23 = vpop.f32.mrf.mxu1  ;;  %3042 = vmatmul.mubr.f32.gmra.mxu1 %v800_v15  ;;  %2741 = vmatprep.mubr.f32.mxu0 %v705_v19  ;;  %v614_v19 = vld [vmem:[%s5117_s23 + $0xac] sm:$0xff] }
 0x14e   : >> { %v5521_v24 = vadd.f32 %v2433_v23, %v2128_v22  ;;  %3046 = vmatprep.mubr.f32.mxu1 %v897_v20  ;;  %v2130_v28 = vpop.f32.mrf.mxu0  ;;  %3262 = vmatpush1.msra.mxu0 %v1987_v21  ;;  %v806_v20 = vld [vmem:[%s5117_s23 + $0xae] sm:$0xff] }
 0x14f   : >> { %v2435_v29 = vpop.f32.mrf.mxu1  ;;  %4726 = vmatpush1.msra.mxu1 %v1987_v21  ;;  %3263 = vmatprep.subr.mxu0 %v4886_v1  ;;  %v711_v23 = vld [vmem:[%s5117_s23 + $0xb5] sm:$0xff] }
 0x150   : >> { %4695 = vmatprep.subr.mxu1 %v4886_v1  ;;  %v2133_v33 = vpop.f32.mrf.mxu0  ;;  %2742 = vmatmul.mubr.f32.gmra.mxu0 %v609_v25  ;;  %v903_v25 = vld [vmem:[%s5117_s23 + $0xb7] sm:$0xff] }
 0x151   : >> { %v2438_v34 = vpop.f32.mrf.mxu1  ;;  %3047 = vmatmul.mubr.f32.gmra.mxu1 %v801_v27  ;;  %2746 = vmatprep.mubr.f32.mxu0 %v706_v30  ;;  %v1981_v27 = vld [vmem:[%s4995_s19 + $0x410] sm:$0xff] }
 0x152   : >> { %v5530_v35 = vadd.f32 %v2438_v34, %v2133_v33  ;;  %3051 = vmatprep.mubr.f32.mxu1 %v898_v31  ;;  %v2135_v39 = vpop.f32.mrf.mxu0  ;;  %3264 = vmatpush1.msra.mxu0 %v1986_v32  ;;  %v615_v31 = vld [vmem:[%s5117_s23 + $0xb4] sm:$0xff] }
 0x153   : >> { %v2440_v40 = vpop.f32.mrf.mxu1  ;;  %4727 = vmatpush1.msra.mxu1 %v1986_v32  ;;  %3265 = vmatprep.subr.mxu0 %v4886_v1  ;;  %v807_v32 = vld [vmem:[%s5117_s23 + $0xb6] sm:$0xff]  ;;  %v1980_v39 = vld [vmem:[%s4995_s19 + $0x408] sm:$0xff] }
 0x154   : >> { %4696 = vmatprep.subr.mxu1 %v4886_v1  ;;  %v2138_v44 = vpop.f32.mrf.mxu0  ;;  %2747 = vmatmul.mubr.f32.gmra.mxu0 %v610_v37  ;;  %v712_v37 = vld [vmem:[%s5117_s23 + $0xcd] sm:$0xff] }
 0x155   : >> { %v2443_v45 = vpop.f32.mrf.mxu1  ;;  %3052 = vmatmul.mubr.f32.gmra.mxu1 %v802_v38  ;;  %2751 = vmatprep.mubr.f32.mxu0 %v707_v41  ;;  %v904_v38 = vld [vmem:[%s5117_s23 + $0xcf] sm:$0xff] }
 0x156   : >> { %v5539_v47 = vadd.f32 %v2443_v45, %v2138_v44  ;;  %3056 = vmatprep.mubr.f32.mxu1 %v899_v42  ;;  %v2140_v50 = vpop.f32.mrf.mxu0  ;;  %3266 = vmatpush1.msra.mxu0 %v1985_v43  ;;  %v808_v44 = vld [vmem:[%s5117_s23 + $0xce] sm:$0xff] }
 0x157   : >> { %v2445_v51 = vpop.f32.mrf.mxu1  ;;  %4728 = vmatpush1.msra.mxu1 %v1985_v43  ;;  %3267 = vmatprep.subr.mxu0 %v4886_v1  ;;  %v616_v43 = vld [vmem:[%s5117_s23 + $0xcc] sm:$0xff]  ;;  %v905_v50 = vld [vmem:[%s5117_s23 + $0xd7] sm:$0xff] }
 0x158   : >> { %4697 = vmatprep.subr.mxu1 %v4886_v1  ;;  %v2143_v55 = vpop.f32.mrf.mxu0  ;;  %2752 = vmatmul.mubr.f32.gmra.mxu0 %v611_v48  ;;  %v1979_v51 = vld [vmem:[%s4995_s19 + $0x400] sm:$0xff] }
 0x159   : >> { %v2448_v57 = vpop.f32.mrf.mxu1  ;;  %3057 = vmatmul.mubr.f32.gmra.mxu1 %v803_v49  ;;  %2756 = vmatprep.mubr.f32.mxu0 %v708_v52  ;;  %v713_v49 = vld [vmem:[%s5117_s23 + $0xd5] sm:$0xff] }
 0x15a   : >> { %v5548_v58 = vadd.f32 %v2448_v57, %v2143_v55  ;;  %3061 = vmatprep.mubr.f32.mxu1 %v900_v53  ;;  %v2145_v61 = vpop.f32.mrf.mxu0  ;;  %3268 = vmatpush1.msra.mxu0 %v1984_v54  ;;  %v617_v55 = vld [vmem:[%s5117_s23 + $0xd4] sm:$0xff] }
 0x15b   : >> { %v2450_v62 = vpop.f32.mrf.mxu1  ;;  %4729 = vmatpush1.msra.mxu1 %v1984_v54  ;;  %3269 = vmatprep.subr.mxu0 %v4886_v1  ;;  %v809_v57 = vld [vmem:[%s5117_s23 + $0xd6] sm:$0xff] }
 0x15c   : >> { %4698 = vmatprep.subr.mxu1 %v4886_v1  ;;  %v2148_v4 = vpop.f32.mrf.mxu0  ;;  %2757 = vmatmul.mubr.f32.gmra.mxu0 %v612_v59  ;;  %v714_v61 = vld [vmem:[%s5117_s23 + $0xdd] sm:$0xff] }
 0x15d   : >> { %v2453_v5 = vpop.f32.mrf.mxu1  ;;  %3062 = vmatmul.mubr.f32.gmra.mxu1 %v804_v60  ;;  %2761 = vmatprep.mubr.f32.mxu0 %v709_v63  ;;  %v906_v62 = vld [vmem:[%s5117_s23 + $0xdf] sm:$0xff] }
 0x15e   : >> { %v5557_v6 = vadd.f32 %v2453_v5, %v2148_v4  ;;  %3066 = vmatprep.mubr.f32.mxu1 %v901_v0  ;;  %v2150_v9 = vpop.f32.mrf.mxu0  ;;  %3270 = vmatpush1.msra.mxu0 %v1983_v2  ;;  %v2010_v63 = vld [vmem:[%s4995_s19 + $0x4f8] sm:$0xff] }
 0x15f   : >> { %v2455_v10 = vpop.f32.mrf.mxu1  ;;  %4730 = vmatpush1.msra.mxu1 %v1983_v2  ;;  %3271 = vmatprep.subr.mxu0 %v4886_v1  ;;  %v618_v5 = vld [vmem:[%s5117_s23 + $0xdc] sm:$0xff] }
 0x160   : >> { %4699 = vmatprep.subr.mxu1 %v4886_v1  ;;  %v2153_v15 = vpop.f32.mrf.mxu0  ;;  %2762 = vmatmul.mubr.f32.gmra.mxu0 %v613_v7  ;;  %v810_v7 = vld [vmem:[%s5117_s23 + $0xde] sm:$0xff]  ;;  %v715_v10 = vld [vmem:[%s5117_s23 + $0xf5] sm:$0xff] }
 0x161   : >> { %v2458_v17 = vpop.f32.mrf.mxu1  ;;  %3067 = vmatmul.mubr.f32.gmra.mxu1 %v805_v8  ;;  %2766 = vmatprep.mubr.f32.mxu0 %v710_v11  ;;  %v907_v11 = vld [vmem:[%s5117_s23 + $0xf7] sm:$0xff] }
 0x162   : >> { %v5566_v18 = vadd.f32 %v2458_v17, %v2153_v15  ;;  %3071 = vmatprep.mubr.f32.mxu1 %v902_v12  ;;  %v2155_v21 = vpop.f32.mrf.mxu0  ;;  %3272 = vmatpush1.msra.mxu0 %v1982_v14  ;;  %v2009_v12 = vld [vmem:[%s4995_s19 + $0x4f0] sm:$0xff] }
 0x163   : >> { %v2460_v22 = vpop.f32.mrf.mxu1  ;;  %4731 = vmatpush1.msra.mxu1 %v1982_v14  ;;  %3273 = vmatprep.subr.mxu0 %v4886_v1 }
 0x164   : >> { %4700 = vmatprep.subr.mxu1 %v4886_v1  ;;  %v2158_v28 = vpop.f32.mrf.mxu0  ;;  %2767 = vmatmul.mubr.f32.gmra.mxu0 %v614_v19  ;;  %v619_v19 = vld [vmem:[%s5117_s23 + $0xf4] sm:$0xff] }
 0x165   : >> { %v2463_v29 = vpop.f32.mrf.mxu1  ;;  %3072 = vmatmul.mubr.f32.gmra.mxu1 %v806_v20  ;;  %2771 = vmatprep.mubr.f32.mxu0 %v711_v23  ;;  %v811_v20 = vld [vmem:[%s5117_s23 + $0xf6] sm:$0xff] }
 0x166   : >> { %v5575_v30 = vadd.f32 %v2463_v29, %v2158_v28  ;;  %3076 = vmatprep.mubr.f32.mxu1 %v903_v25  ;;  %v2160_v33 = vpop.f32.mrf.mxu0  ;;  %3274 = vmatpush1.msra.mxu0 %v1981_v27  ;;  %v716_v23 = vld [vmem:[%s5117_s23 + $0xfd] sm:$0xff] }
 0x167   : >> { %v2465_v34 = vpop.f32.mrf.mxu1  ;;  %4732 = vmatpush1.msra.mxu1 %v1981_v27  ;;  %3275 = vmatprep.subr.mxu0 %v4886_v1  ;;  %v908_v25 = vld [vmem:[%s5117_s23 + $0xff] sm:$0xff]  ;;  %v2008_v27 = vld [vmem:[%s4995_s19 + $0x4e8] sm:$0xff] }
 0x168   : >> { %4701 = vmatprep.subr.mxu1 %v4886_v1  ;;  %v2163_v40 = vpop.f32.mrf.mxu0  ;;  %2772 = vmatmul.mubr.f32.gmra.mxu0 %v615_v31  ;;  %v812_v33 = vld [vmem:[%s5117_s23 + $0xfe] sm:$0xff] }
 0x169   : >> { %v2468_v41 = vpop.f32.mrf.mxu1  ;;  %3077 = vmatmul.mubr.f32.gmra.mxu1 %v807_v32  ;;  %2776 = vmatprep.mubr.f32.mxu0 %v712_v37  ;;  %v620_v32 = vld [vmem:[%s5117_s23 + $0xfc] sm:$0xff] }
 0x16a   : >> { %v5584_v42 = vadd.f32 %v2468_v41, %v2163_v40  ;;  %3081 = vmatprep.mubr.f32.mxu1 %v904_v38  ;;  %v2165_v45 = vpop.f32.mrf.mxu0  ;;  %3276 = vmatpush1.msra.mxu0 %v1980_v39  ;;  %v717_v38 = vld [vmem:[%s5117_s23 + $0x105] sm:$0xff] }
 0x16b   : >> { %v2470_v48 = vpop.f32.mrf.mxu1  ;;  %4733 = vmatpush1.msra.mxu1 %v1980_v39  ;;  %3277 = vmatprep.subr.mxu0 %v4886_v1  ;;  %v909_v39 = vld [vmem:[%s5117_s23 + $0x107] sm:$0xff] }
 0x16c   : >> { %4702 = vmatprep.subr.mxu1 %v4886_v1  ;;  %v2168_v52 = vpop.f32.mrf.mxu0  ;;  %2777 = vmatmul.mubr.f32.gmra.mxu0 %v616_v43  ;;  %v2007_v40 = vld [vmem:[%s4995_s19 + $0x4e0] sm:$0xff] }
 0x16d   : >> { %v2473_v53 = vpop.f32.mrf.mxu1  ;;  %3082 = vmatmul.mubr.f32.gmra.mxu1 %v808_v44  ;;  %2781 = vmatprep.mubr.f32.mxu0 %v713_v49  ;;  %v621_v45 = vld [vmem:[%s5117_s23 + $0x104] sm:$0xff] }
 0x16e   : >> { %v5593_v54 = vadd.f32 %v2473_v53, %v2168_v52  ;;  %3086 = vmatprep.mubr.f32.mxu1 %v905_v50  ;;  %v2170_v59 = vpop.f32.mrf.mxu0  ;;  %3278 = vmatpush1.msra.mxu0 %v1979_v51  ;;  %v813_v48 = vld [vmem:[%s5117_s23 + $0x106] sm:$0xff]  ;;  %v2006_v53 = vld [vmem:[%s4995_s19 + $0x4d8] sm:$0xff] }
 0x16f   : >> { %v2475_v60 = vpop.f32.mrf.mxu1  ;;  %4734 = vmatpush1.msra.mxu1 %v1979_v51  ;;  %3279 = vmatprep.subr.mxu0 %v4886_v1  ;;  %v718_v51 = vld [vmem:[%s5117_s23 + $0x11d] sm:$0xff] }
 0x170   : >> { %4703 = vmatprep.subr.mxu1 %v4886_v1  ;;  %v2173_v0 = vpop.f32.mrf.mxu0  ;;  %2782 = vmatmul.mubr.f32.gmra.mxu0 %v617_v55  ;;  %v910_v52 = vld [vmem:[%s5117_s23 + $0x11f] sm:$0xff] }
 0x171   : >> { %v2478_v2 = vpop.f32.mrf.mxu1  ;;  %3087 = vmatmul.mubr.f32.gmra.mxu1 %v809_v57  ;;  %2786 = vmatprep.mubr.f32.mxu0 %v714_v61  ;;  %v622_v60 = vld [vmem:[%s5117_s23 + $0x11c] sm:$0xff] }
 0x172   : >> { %v5602_v4 = vadd.f32 %v2478_v2, %v2173_v0  ;;  %3091 = vmatprep.mubr.f32.mxu1 %v906_v62  ;;  %v2175_v8 = vpop.f32.mrf.mxu0  ;;  %3280 = vmatpush2.msra.mxu0 %v2010_v63  ;;  %v814_v61 = vld [vmem:[%s5117_s23 + $0x11e] sm:$0xff]  ;;  %v911_v2 = vld [vmem:[%s5117_s23 + $0x127] sm:$0xff] }
 0x173   : >> { %v2480_v9 = vpop.f32.mrf.mxu1  ;;  %4735 = vmatpush2.msra.mxu1 %v2010_v63  ;;  %3281 = vmatprep.subr.mxu0 %v4886_v1  ;;  %v719_v0 = vld [vmem:[%s5117_s23 + $0x125] sm:$0xff] }
 0x174   : >> { %4704 = vmatprep.subr.mxu1 %v4886_v1  ;;  %v2178_v14 = vpop.f32.mrf.mxu0  ;;  %2787 = vmatmul.mubr.f32.gmra.mxu0 %v618_v5  ;;  %v2005_v5 = vld [vmem:[%s4995_s19 + $0x4d0] sm:$0xff] }
 0x175   : >> { %v2483_v15 = vpop.f32.mrf.mxu1  ;;  %3092 = vmatmul.mubr.f32.gmra.mxu1 %v810_v7  ;;  %2791 = vmatprep.mubr.f32.mxu0 %v715_v10  ;;  %v623_v10 = vld [vmem:[%s5117_s23 + $0x124] sm:$0xff] }
 0x176   : >> { %v5611_v17 = vadd.f32 %v2483_v15, %v2178_v14  ;;  %3096 = vmatprep.mubr.f32.mxu1 %v907_v11  ;;  %v2180_v21 = vpop.f32.mrf.mxu0  ;;  %3282 = vmatpush2.msra.mxu0 %v2009_v12  ;;  %v815_v11 = vld [vmem:[%s5117_s23 + $0x126] sm:$0xff] }
 0x177   : >> { %v2485_v22 = vpop.f32.mrf.mxu1  ;;  %4736 = vmatpush2.msra.mxu1 %v2009_v12  ;;  %3283 = vmatprep.subr.mxu0 %v4886_v1  ;;  %v720_v15 = vld [vmem:[%s5117_s23 + $0x12d] sm:$0xff] }
 0x178   : >> { %4705 = vmatprep.subr.mxu1 %v4886_v1  ;;  %v2183_v28 = vpop.f32.mrf.mxu0  ;;  %2792 = vmatmul.mubr.f32.gmra.mxu0 %v619_v19  ;;  %v912_v19 = vld [vmem:[%s5117_s23 + $0x12f] sm:$0xff] }
 0x179   : >> { %v2488_v29 = vpop.f32.mrf.mxu1  ;;  %3097 = vmatmul.mubr.f32.gmra.mxu1 %v811_v20  ;;  %2796 = vmatprep.mubr.f32.mxu0 %v716_v23  ;;  %v2004_v20 = vld [vmem:[%s4995_s19 + $0x4c8] sm:$0xff] }
 0x17a   : >> { %v5620_v31 = vadd.f32 %v2488_v29, %v2183_v28  ;;  %3101 = vmatprep.mubr.f32.mxu1 %v908_v25  ;;  %v2185_v34 = vpop.f32.mrf.mxu0  ;;  %3284 = vmatpush2.msra.mxu0 %v2008_v27  ;;  %v624_v25 = vld [vmem:[%s5117_s23 + $0x12c] sm:$0xff] }
 0x17b   : >> { %v2490_v37 = vpop.f32.mrf.mxu1  ;;  %4737 = vmatpush2.msra.mxu1 %v2008_v27  ;;  %3285 = vmatprep.subr.mxu0 %v4886_v1  ;;  %v816_v27 = vld [vmem:[%s5117_s23 + $0x12e] sm:$0xff]  ;;  %v2003_v34 = vld [vmem:[%s4995_s19 + $0x4c0] sm:$0xff] }
 0x17c   : >> { %4706 = vmatprep.subr.mxu1 %v4886_v1  ;;  %v2188_v41 = vpop.f32.mrf.mxu0  ;;  %2797 = vmatmul.mubr.f32.gmra.mxu0 %v620_v32  ;;  %v721_v32 = vld [vmem:[%s5117_s23 + $0x415] sm:$0xff] }
 0x17d   : >> { %v2493_v43 = vpop.f32.mrf.mxu1  ;;  %3102 = vmatmul.mubr.f32.gmra.mxu1 %v812_v33  ;;  %2801 = vmatprep.mubr.f32.mxu0 %v717_v38  ;;  %v913_v33 = vld [vmem:[%s5117_s23 + $0x417] sm:$0xff] }
 0x17e   : >> { %v5629_v44 = vadd.f32 %v2493_v43, %v2188_v41  ;;  %3106 = vmatprep.mubr.f32.mxu1 %v909_v39  ;;  %v2190_v49 = vpop.f32.mrf.mxu0  ;;  %3286 = vmatpush2.msra.mxu0 %v2007_v40  ;;  %v817_v41 = vld [vmem:[%s5117_s23 + $0x416] sm:$0xff] }
 0x17f   : >> { %v2495_v50 = vpop.f32.mrf.mxu1  ;;  %4738 = vmatpush2.msra.mxu1 %v2007_v40  ;;  %3287 = vmatprep.subr.mxu0 %v4886_v1  ;;  %v625_v40 = vld [vmem:[%s5117_s23 + $0x414] sm:$0xff]  ;;  %v914_v49 = vld [vmem:[%s5117_s23 + $0x41f] sm:$0xff] }
 0x180   : >> { %4707 = vmatprep.subr.mxu1 %v4886_v1  ;;  %v2193_v55 = vpop.f32.mrf.mxu0  ;;  %2802 = vmatmul.mubr.f32.gmra.mxu0 %v621_v45  ;;  %v2002_v50 = vld [vmem:[%s4995_s19 + $0x4b8] sm:$0xff] }
 0x181   : >> { %v2498_v57 = vpop.f32.mrf.mxu1  ;;  %3107 = vmatmul.mubr.f32.gmra.mxu1 %v813_v48  ;;  %2806 = vmatprep.mubr.f32.mxu0 %v718_v51  ;;  %v722_v48 = vld [vmem:[%s5117_s23 + $0x41d] sm:$0xff] }
 0x182   : >> { %v5638_v59 = vadd.f32 %v2498_v57, %v2193_v55  ;;  %3111 = vmatprep.mubr.f32.mxu1 %v910_v52  ;;  %v2195_v62 = vpop.f32.mrf.mxu0  ;;  %3288 = vmatpush2.msra.mxu0 %v2006_v53  ;;  %v626_v55 = vld [vmem:[%s5117_s23 + $0x41c] sm:$0xff] }
 0x183   : >> { %v2500_v63 = vpop.f32.mrf.mxu1  ;;  %4739 = vmatpush2.msra.mxu1 %v2006_v53  ;;  %3289 = vmatprep.subr.mxu0 %v4886_v1  ;;  %v818_v57 = vld [vmem:[%s5117_s23 + $0x41e] sm:$0xff] }
 0x184   : >> { %4708 = vmatprep.subr.mxu1 %v4886_v1  ;;  %v2198_v7 = vpop.f32.mrf.mxu0  ;;  %2807 = vmatmul.mubr.f32.gmra.mxu0 %v622_v60  ;;  %v723_v62 = vld [vmem:[%s5117_s23 + $0x425] sm:$0xff] }
 0x185   : >> { %v2503_v8 = vpop.f32.mrf.mxu1  ;;  %3112 = vmatmul.mubr.f32.gmra.mxu1 %v814_v61  ;;  %2811 = vmatprep.mubr.f32.mxu0 %v719_v0  ;;  %v915_v63 = vld [vmem:[%s5117_s23 + $0x427] sm:$0xff]  ;;  %v2001_v0 = vld [vmem:[%s4995_s19 + $0x4b0] sm:$0xff] }
 0x186   : >> { %v5647_v9 = vadd.f32 %v2503_v8, %v2198_v7  ;;  %3116 = vmatprep.mubr.f32.mxu1 %v911_v2  ;;  %v2200_v12 = vpop.f32.mrf.mxu0  ;;  %3290 = vmatpush2.msra.mxu0 %v2005_v5  ;;  %v627_v8 = vld [vmem:[%s5117_s23 + $0x424] sm:$0xff] }
 0x187   : >> { %v2505_v14 = vpop.f32.mrf.mxu1  ;;  %4740 = vmatpush2.msra.mxu1 %v2005_v5  ;;  %3291 = vmatprep.subr.mxu0 %v4886_v1 }
 0x188   : >> { %4709 = vmatprep.subr.mxu1 %v4886_v1  ;;  %v2203_v21 = vpop.f32.mrf.mxu0  ;;  %2812 = vmatmul.mubr.f32.gmra.mxu0 %v623_v10  ;;  %v819_v10 = vld [vmem:[%s5117_s23 + $0x426] sm:$0xff]  ;;  %v724_v14 = vld [vmem:[%s5117_s23 + $0x43d] sm:$0xff] }
 0x189   : >> { %v2508_v22 = vpop.f32.mrf.mxu1  ;;  %3117 = vmatmul.mubr.f32.gmra.mxu1 %v815_v11  ;;  %2816 = vmatprep.mubr.f32.mxu0 %v720_v15  ;;  %v916_v15 = vld [vmem:[%s5117_s23 + $0x43f] sm:$0xff] }
 0x18a   : >> { %v5656_v23 = vadd.f32 %v2508_v22, %v2203_v21  ;;  %3121 = vmatprep.mubr.f32.mxu1 %v912_v19  ;;  %v2205_v28 = vpop.f32.mrf.mxu0  ;;  %3292 = vmatpush2.msra.mxu0 %v2004_v20  ;;  %v2000_v19 = vld [vmem:[%s4995_s19 + $0x4a8] sm:$0xff] }
 0x18b   : >> { %v2510_v29 = vpop.f32.mrf.mxu1  ;;  %4741 = vmatpush2.msra.mxu1 %v2004_v20  ;;  %3293 = vmatprep.subr.mxu0 %v4886_v1 }
 0x18c   : >> { %4710 = vmatprep.subr.mxu1 %v4886_v1  ;;  %v2208_v37 = vpop.f32.mrf.mxu0  ;;  %2817 = vmatmul.mubr.f32.gmra.mxu0 %v624_v25  ;;  %v628_v25 = vld [vmem:[%s5117_s23 + $0x43c] sm:$0xff] }
 0x18d   : >> { %v2513_v38 = vpop.f32.mrf.mxu1  ;;  %3122 = vmatmul.mubr.f32.gmra.mxu1 %v816_v27  ;;  %2821 = vmatprep.mubr.f32.mxu0 %v721_v32  ;;  %v820_v27 = vld [vmem:[%s5117_s23 + $0x43e] sm:$0xff] }
 0x18e   : >> { %v5665_v39 = vadd.f32 %v2513_v38, %v2208_v37  ;;  %3126 = vmatprep.mubr.f32.mxu1 %v913_v33  ;;  %v2210_v43 = vpop.f32.mrf.mxu0  ;;  %3294 = vmatpush2.msra.mxu0 %v2003_v34  ;;  %v725_v32 = vld [vmem:[%s5117_s23 + $0x445] sm:$0xff] }
 0x18f   : >> { %v2515_v45 = vpop.f32.mrf.mxu1  ;;  %4742 = vmatpush2.msra.mxu1 %v2003_v34  ;;  %3295 = vmatprep.subr.mxu0 %v4886_v1  ;;  %v917_v33 = vld [vmem:[%s5117_s23 + $0x447] sm:$0xff] }
 0x190   : >> { %4711 = vmatprep.subr.mxu1 %v4886_v1  ;;  %v2213_v51 = vpop.f32.mrf.mxu0  ;;  %2822 = vmatmul.mubr.f32.gmra.mxu0 %v625_v40  ;;  %v1999_v34 = vld [vmem:[%s4995_s19 + $0x4a0] sm:$0xff] }
 0x191   : >> { %v2518_v52 = vpop.f32.mrf.mxu1  ;;  %3127 = vmatmul.mubr.f32.gmra.mxu1 %v817_v41  ;;  %2826 = vmatprep.mubr.f32.mxu0 %v722_v48  ;;  %v629_v41 = vld [vmem:[%s5117_s23 + $0x444] sm:$0xff] }
 0x192   : >> { %v5674_v53 = vadd.f32 %v2518_v52, %v2213_v51  ;;  %3131 = vmatprep.mubr.f32.mxu1 %v914_v49  ;;  %v2215_v60 = vpop.f32.mrf.mxu0  ;;  %3296 = vmatpush2.msra.mxu0 %v2002_v50  ;;  %v821_v43 = vld [vmem:[%s5117_s23 + $0x446] sm:$0xff]  ;;  %v1998_v51 = vld [vmem:[%s4995_s19 + $0x498] sm:$0xff] }
 0x193   : >> { %v2520_v61 = vpop.f32.mrf.mxu1  ;;  %4743 = vmatpush2.msra.mxu1 %v2002_v50  ;;  %3297 = vmatprep.subr.mxu0 %v4886_v1  ;;  %v726_v49 = vld [vmem:[%s5117_s23 + $0x44d] sm:$0xff] }
 0x194   : >> { %4712 = vmatprep.subr.mxu1 %v4886_v1  ;;  %v2218_v2 = vpop.f32.mrf.mxu0  ;;  %2827 = vmatmul.mubr.f32.gmra.mxu0 %v626_v55  ;;  %v918_v50 = vld [vmem:[%s5117_s23 + $0x44f] sm:$0xff] }
 0x195   : >> { %v2523_v5 = vpop.f32.mrf.mxu1  ;;  %3132 = vmatmul.mubr.f32.gmra.mxu1 %v818_v57  ;;  %2831 = vmatprep.mubr.f32.mxu0 %v723_v62  ;;  %v630_v60 = vld [vmem:[%s5117_s23 + $0x44c] sm:$0xff] }
 0x196   : >> { %v5683_v7 = vadd.f32 %v2523_v5, %v2218_v2  ;;  %3136 = vmatprep.mubr.f32.mxu1 %v915_v63  ;;  %v2220_v11 = vpop.f32.mrf.mxu0  ;;  %3298 = vmatpush2.msra.mxu0 %v2001_v0  ;;  %v822_v61 = vld [vmem:[%s5117_s23 + $0x44e] sm:$0xff] }
 0x197   : >> { %v2525_v12 = vpop.f32.mrf.mxu1  ;;  %4744 = vmatpush2.msra.mxu1 %v2001_v0  ;;  %3299 = vmatprep.subr.mxu0 %v4886_v1  ;;  %v727_v0 = vld [vmem:[%s5117_s23 + $0x465] sm:$0xff]  ;;  %v1997_v5 = vld [vmem:[%s4995_s19 + $0x490] sm:$0xff] }
 0x198   : >> { %4713 = vmatprep.subr.mxu1 %v4886_v1  ;;  %v2223_v20 = vpop.f32.mrf.mxu0  ;;  %2832 = vmatmul.mubr.f32.gmra.mxu0 %v627_v8  ;;  %v919_v2 = vld [vmem:[%s5117_s23 + $0x467] sm:$0xff] }
 0x199   : >> { %v2528_v21 = vpop.f32.mrf.mxu1  ;;  %3137 = vmatmul.mubr.f32.gmra.mxu1 %v819_v10  ;;  %2836 = vmatprep.mubr.f32.mxu0 %v724_v14  ;;  %v631_v12 = vld [vmem:[%s5117_s23 + $0x464] sm:$0xff] }
 0x19a   : >> { %v5692_v22 = vadd.f32 %v2528_v21, %v2223_v20  ;;  %3141 = vmatprep.mubr.f32.mxu1 %v916_v15  ;;  %v2225_v28 = vpop.f32.mrf.mxu0  ;;  %3300 = vmatpush2.msra.mxu0 %v2000_v19  ;;  %v823_v14 = vld [vmem:[%s5117_s23 + $0x466] sm:$0xff]  ;;  %v920_v21 = vld [vmem:[%s5117_s23 + $0x46f] sm:$0xff] }
 0x19b   : >> { %v2530_v29 = vpop.f32.mrf.mxu1  ;;  %4745 = vmatpush2.msra.mxu1 %v2000_v19  ;;  %3301 = vmatprep.subr.mxu0 %v4886_v1  ;;  %v728_v20 = vld [vmem:[%s5117_s23 + $0x46d] sm:$0xff] }
 0x19c   : >> { %4714 = vmatprep.subr.mxu1 %v4886_v1  ;;  %v2228_v37 = vpop.f32.mrf.mxu0  ;;  %2837 = vmatmul.mubr.f32.gmra.mxu0 %v628_v25  ;;  %v1996_v25 = vld [vmem:[%s4995_s19 + $0x488] sm:$0xff] }
 0x19d   : >> { %v2533_v38 = vpop.f32.mrf.mxu1  ;;  %3142 = vmatmul.mubr.f32.gmra.mxu1 %v820_v27  ;;  %2841 = vmatprep.mubr.f32.mxu0 %v725_v32  ;;  %v632_v32 = vld [vmem:[%s5117_s23 + $0x46c] sm:$0xff] }
 0x19e   : >> { %v5701_v40 = vadd.f32 %v2533_v38, %v2228_v37  ;;  %3146 = vmatprep.mubr.f32.mxu1 %v917_v33  ;;  %v2230_v45 = vpop.f32.mrf.mxu0  ;;  %3302 = vmatpush2.msra.mxu0 %v1999_v34  ;;  %v824_v33 = vld [vmem:[%s5117_s23 + $0x46e] sm:$0xff] }
 0x19f   : >> { %v2535_v48 = vpop.f32.mrf.mxu1  ;;  %4746 = vmatpush2.msra.mxu1 %v1999_v34  ;;  %3303 = vmatprep.subr.mxu0 %v4886_v1  ;;  %v729_v38 = vld [vmem:[%s5117_s23 + $0x475] sm:$0xff] }
 0x1a0   : >> { %4715 = vmatprep.subr.mxu1 %v4886_v1  ;;  %v2233_v52 = vpop.f32.mrf.mxu0  ;;  %2842 = vmatmul.mubr.f32.gmra.mxu0 %v629_v41  ;;  %v921_v41 = vld [vmem:[%s5117_s23 + $0x477] sm:$0xff] }
 0x1a1   : >> { %v2538_v55 = vpop.f32.mrf.mxu1  ;;  %3147 = vmatmul.mubr.f32.gmra.mxu1 %v821_v43  ;;  %2846 = vmatprep.mubr.f32.mxu0 %v726_v49  ;;  %v1995_v43 = vld [vmem:[%s4995_s19 + $0x480] sm:$0xff]  ;;  %v5738_v49 = vld [vmem:[%s4995_s19 + $0x578] sm:$0xff] }
 0x1a2   : >> { %v5710_v57 = vadd.f32 %v2538_v55, %v2233_v52  ;;  %3151 = vmatprep.mubr.f32.mxu1 %v918_v50  ;;  %v2235_v62 = vpop.f32.mrf.mxu0  ;;  %3304 = vmatpush2.msra.mxu0 %v1998_v51  ;;  %v825_v52 = vld [vmem:[%s5117_s23 + $0x476] sm:$0xff] }
 0x1a3   : >> { %v2540_v63 = vpop.f32.mrf.mxu1  ;;  %4747 = vmatpush2.msra.mxu1 %v1998_v51  ;;  %3305 = vmatprep.subr.mxu0 %v4886_v1  ;;  %v633_v51 = vld [vmem:[%s5117_s23 + $0x474] sm:$0xff] }
 0x1a4   : >> { %4716 = vmatprep.subr.mxu1 %v4886_v1  ;;  %v2238_v8 = vpop.f32.mrf.mxu0  ;;  %2847 = vmatmul.mubr.f32.gmra.mxu0 %v630_v60 }
 0x1a5   : >> { %v2543_v10 = vpop.f32.mrf.mxu1  ;;  %3152 = vmatmul.mubr.f32.gmra.mxu1 %v822_v61  ;;  %2851 = vmatprep.mubr.f32.mxu0 %v727_v0  ;;  %v730_v61 = vld [vmem:[%s5117_s23 + $0x48d] sm:$0xff] }
 0x1a6   : >> { %v5719_v11 = vadd.f32 %v2543_v10, %v2238_v8  ;;  %3156 = vmatprep.mubr.f32.mxu1 %v919_v2  ;;  %v2240_v15 = vpop.f32.mrf.mxu0  ;;  %3306 = vmatpush2.msra.mxu0 %v1997_v5  ;;  %v634_v2 = vld [vmem:[%s5117_s23 + $0x48c] sm:$0xff] }
 0x1a7   : >> { %v2545_v19 = vpop.f32.mrf.mxu1  ;;  %4748 = vmatpush2.msra.mxu1 %v1997_v5  ;;  %3307 = vmatprep.subr.mxu0 %v4886_v1  ;;  %v826_v5 = vld [vmem:[%s5117_s23 + $0x48e] sm:$0xff] }
 0x1a8   : >> { %4717 = vmatprep.subr.mxu1 %v4886_v1  ;;  %v2243_v27 = vpop.f32.mrf.mxu0  ;;  %2852 = vmatmul.mubr.f32.gmra.mxu0 %v631_v12  ;;  %v731_v12 = vld [vmem:[%s5117_s23 + $0x495] sm:$0xff] }
 0x1a9   : >> { %v2548_v28 = vpop.f32.mrf.mxu1  ;;  %3157 = vmatmul.mubr.f32.gmra.mxu1 %v823_v14  ;;  %2856 = vmatprep.mubr.f32.mxu0 %v728_v20  ;;  %v923_v14 = vld [vmem:[%s5117_s23 + $0x497] sm:$0xff] }
 0x1aa   : >> { %v5728_v29 = vadd.f32 %v2548_v28, %v2243_v27  ;;  %3161 = vmatprep.mubr.f32.mxu1 %v920_v21  ;;  %v2245_v34 = vpop.f32.mrf.mxu0  ;;  %3308 = vmatpush2.msra.mxu0 %v1996_v25  ;;  %v635_v21 = vld [vmem:[%s5117_s23 + $0x494] sm:$0xff] }
 0x1ab   : >> { %v2550_v37 = vpop.f32.mrf.mxu1  ;;  %4749 = vmatpush2.msra.mxu1 %v1996_v25  ;;  %3309 = vmatprep.subr.mxu0 %v4886_v1  ;;  %v827_v25 = vld [vmem:[%s5117_s23 + $0x496] sm:$0xff] }
 0x1ac   : >> { %4718 = vmatprep.subr.mxu1 %v4886_v1  ;;  %v2248_v45 = vpop.f32.mrf.mxu0  ;;  %2857 = vmatmul.mubr.f32.gmra.mxu0 %v632_v32  ;;  %v922_v1 = vld [vmem:[%s5117_s23 + $0x48f] sm:$0xff]  ;;  %v732_v32 = vld [vmem:[%s5117_s23 + $0x49d] sm:$0xff] }
 0x1ad   : >> { %v2553_v48 = vpop.f32.mrf.mxu1  ;;  %3162 = vmatmul.mubr.f32.gmra.mxu1 %v824_v33  ;;  %2861 = vmatprep.mubr.f32.mxu0 %v729_v38  ;;  %v924_v33 = vld [vmem:[%s5117_s23 + $0x49f] sm:$0xff] }
 0x1ae   : >> { %v5740_v50 = vadd.f32 %v2553_v48, %v2248_v45  ;;  %3166 = vmatprep.mubr.f32.mxu1 %v921_v41  ;;  %v2250_v55 = vpop.f32.mrf.mxu0  ;;  %3310 = vmatpush2.msra.mxu0 %v1995_v43  ;;  %v636_v41 = vld [vmem:[%s5117_s23 + $0x49c] sm:$0xff] }
 0x1af   : >> { %v2555_v60 = vpop.f32.mrf.mxu1  ;;  %4750 = vmatpush2.msra.mxu1 %v1995_v43  ;;  %v828_v43 = vld [vmem:[%s5117_s23 + $0x49e] sm:$0xff] }
 0x1b0   : >> { %4583 = vmatprep.subr.mxu1 %v5738_v49  ;;  %v2253_v62 = vpop.f32.mrf.mxu0  ;;  %2862 = vmatmul.mubr.f32.gmra.mxu0 %v633_v51  ;;  %v733_v51 = vld [vmem:[%s5117_s23 + $0x4b5] sm:$0xff] }
 0x1b1   : >> { %v2558_v63 = vpop.f32.mrf.mxu1  ;;  %3167 = vmatmul.mubr.f32.gmra.mxu1 %v825_v52  ;;  %2866 = vmatprep.mubr.f32.mxu0 %v730_v61  ;;  %v925_v52 = vld [vmem:[%s5117_s23 + $0x4b7] sm:$0xff] }
 0x1b2   : >> { %v5747_v0 = vadd.f32 %v2558_v63, %v2253_v62  ;;  %3171 = vmatprep.mubr.f32.mxu1 %v922_v1  ;;  %v2255_v8 = vpop.f32.mrf.mxu0  ;;  %v637_v1 = vld [vmem:[%s5117_s23 + $0x4b4] sm:$0xff] }
 0x1b3   : >> { %v2560_v10 = vpop.f32.mrf.mxu1  ;;  %v829_v62 = vld [vmem:[%s5117_s23 + $0x4b6] sm:$0xff]  ;;  %v926_v8 = vld [vmem:[%s5117_s23 + $0x4bf] sm:$0xff] }
 0x1b4   : >> { %v2258_v15 = vpop.f32.mrf.mxu0  ;;  %2867 = vmatmul.mubr.f32.gmra.mxu0 %v634_v2 }
 0x1b5   : >> { %v2563_v19 = vpop.f32.mrf.mxu1  ;;  %3172 = vmatmul.mubr.f32.gmra.mxu1 %v826_v5  ;;  %2871 = vmatprep.mubr.f32.mxu0 %v731_v12  ;;  %v734_v5 = vld [vmem:[%s5117_s23 + $0x4bd] sm:$0xff] }
 0x1b6   : >> { %v5753_v20 = vadd.f32 %v2563_v19, %v2258_v15  ;;  %3176 = vmatprep.mubr.f32.mxu1 %v923_v14  ;;  %v2260_v27 = vpop.f32.mrf.mxu0  ;;  %v638_v15 = vld [vmem:[%s5117_s23 + $0x4bc] sm:$0xff] }
 0x1b7   : >> { %v2565_v28 = vpop.f32.mrf.mxu1  ;;  %v830_v19 = vld [vmem:[%s5117_s23 + $0x4be] sm:$0xff] }
 0x1b8   : >> { %v2263_v34 = vpop.f32.mrf.mxu0  ;;  %2872 = vmatmul.mubr.f32.gmra.mxu0 %v635_v21  ;;  %v735_v27 = vld [vmem:[%s5117_s23 + $0x4c5] sm:$0xff] }
 0x1b9   : >> { %v2568_v37 = vpop.f32.mrf.mxu1  ;;  %3177 = vmatmul.mubr.f32.gmra.mxu1 %v827_v25  ;;  %2876 = vmatprep.mubr.f32.mxu0 %v732_v32  ;;  %v927_v28 = vld [vmem:[%s5117_s23 + $0x4c7] sm:$0xff] }
 0x1ba   : >> { %v5759_v38 = vadd.f32 %v2568_v37, %v2263_v34  ;;  %3181 = vmatprep.mubr.f32.mxu1 %v924_v33  ;;  %v2265_v45 = vpop.f32.mrf.mxu0  ;;  %v639_v37 = vld [vmem:[%s5117_s23 + $0x4c4] sm:$0xff] }
 0x1bb   : >> { %v2570_v48 = vpop.f32.mrf.mxu1 }
 0x1bc   : >> { %v2268_v55 = vpop.f32.mrf.mxu0  ;;  %2877 = vmatmul.mubr.f32.gmra.mxu0 %v636_v41  ;;  %v831_v41 = vld [vmem:[%s5117_s23 + $0x4c6] sm:$0xff]  ;;  %v736_v48 = vld [vmem:[%s5117_s23 + $0x4dd] sm:$0xff] }
 0x1bd   : >> { %v2573_v60 = vpop.f32.mrf.mxu1  ;;  %3182 = vmatmul.mubr.f32.gmra.mxu1 %v828_v43  ;;  %2881 = vmatprep.mubr.f32.mxu0 %v733_v51  ;;  %v928_v51 = vld [vmem:[%s5117_s23 + $0x4df] sm:$0xff] }
 0x1be   : >> { %v5765_v61 = vadd.f32 %v2573_v60, %v2268_v55  ;;  %3186 = vmatprep.mubr.f32.mxu1 %v925_v52  ;;  %v2270_v63 = vpop.f32.mrf.mxu0 }
 0x1bf   : >> { %v2575_v2 = vpop.f32.mrf.mxu1 }
 0x1c0   : >> { %v2273_v10 = vpop.f32.mrf.mxu0  ;;  %2882 = vmatmul.mubr.f32.gmra.mxu0 %v637_v1  ;;  %v640_v1 = vld [vmem:[%s5117_s23 + $0x4dc] sm:$0xff] }
 0x1c1   : >> { %v2578_v12 = vpop.f32.mrf.mxu1  ;;  %3187 = vmatmul.mubr.f32.gmra.mxu1 %v829_v62  ;;  %2886 = vmatprep.mubr.f32.mxu0 %v734_v5  ;;  %v832_v62 = vld [vmem:[%s5117_s23 + $0x4de] sm:$0xff] }
 0x1c2   : >> { %v5771_v14 = vadd.f32 %v2578_v12, %v2273_v10  ;;  %3191 = vmatprep.mubr.f32.mxu1 %v926_v8  ;;  %v2275_v21 = vpop.f32.mrf.mxu0  ;;  %v737_v5 = vld [vmem:[%s5117_s23 + $0x4e5] sm:$0xff] }
 0x1c3   : >> { %v2580_v25 = vpop.f32.mrf.mxu1  ;;  %v929_v8 = vld [vmem:[%s5117_s23 + $0x4e7] sm:$0xff] }
 0x1c4   : >> { %v2278_v32 = vpop.f32.mrf.mxu0  ;;  %2887 = vmatmul.mubr.f32.gmra.mxu0 %v638_v15  ;;  %v833_v21 = vld [vmem:[%s5117_s23 + $0x4e6] sm:$0xff] }
 0x1c5   : >> { %v2583_v33 = vpop.f32.mrf.mxu1  ;;  %3192 = vmatmul.mubr.f32.gmra.mxu1 %v830_v19  ;;  %2891 = vmatprep.mubr.f32.mxu0 %v735_v27  ;;  %v641_v19 = vld [vmem:[%s5117_s23 + $0x4e4] sm:$0xff] }
 0x1c6   : >> { %v5777_v34 = vadd.f32 %v2583_v33, %v2278_v32  ;;  %3196 = vmatprep.mubr.f32.mxu1 %v927_v28  ;;  %v2280_v43 = vpop.f32.mrf.mxu0  ;;  %v738_v28 = vld [vmem:[%s5117_s23 + $0x4ed] sm:$0xff] }
 0x1c7   : >> { %v2585_v45 = vpop.f32.mrf.mxu1  ;;  %v930_v32 = vld [vmem:[%s5117_s23 + $0x4ef] sm:$0xff] }
 0x1c8   : >> { %v2283_v52 = vpop.f32.mrf.mxu0  ;;  %2892 = vmatmul.mubr.f32.gmra.mxu0 %v639_v37  ;;  %v642_v43 = vld [vmem:[%s5117_s23 + $0x4ec] sm:$0xff] }
 0x1c9   : >> { %v2588_v55 = vpop.f32.mrf.mxu1  ;;  %3197 = vmatmul.mubr.f32.gmra.mxu1 %v831_v41  ;;  %2896 = vmatprep.mubr.f32.mxu0 %v736_v48  ;;  %v834_v45 = vld [vmem:[%s5117_s23 + $0x4ee] sm:$0xff] }
 0x1ca   : >> { %v5783_v60 = vadd.f32 %v2588_v55, %v2283_v52  ;;  %3201 = vmatprep.mubr.f32.mxu1 %v928_v51  ;;  %v2285_v63 = vpop.f32.mrf.mxu0  ;;  %v739_v52 = vld [vmem:[%s5117_s23 + $0x505] sm:$0xff] }
 0x1cb   : >> { %v2590_v2 = vpop.f32.mrf.mxu1  ;;  %v931_v55 = vld [vmem:[%s5117_s23 + $0x507] sm:$0xff] }
 0x1cc   : >> { %v2288_v10 = vpop.f32.mrf.mxu0  ;;  %2897 = vmatmul.mubr.f32.gmra.mxu0 %v640_v1  ;;  %v643_v2 = vld [vmem:[%s5117_s23 + $0x504] sm:$0xff] }
 0x1cd   : >> { %v2593_v12 = vpop.f32.mrf.mxu1  ;;  %3202 = vmatmul.mubr.f32.gmra.mxu1 %v832_v62  ;;  %2901 = vmatprep.mubr.f32.mxu0 %v737_v5  ;;  %v835_v5 = vld [vmem:[%s5117_s23 + $0x506] sm:$0xff] }
 0x1ce   : >> { %v5789_v15 = vadd.f32 %v2593_v12, %v2288_v10  ;;  %3206 = vmatprep.mubr.f32.mxu1 %v929_v8  ;;  %v2290_v25 = vpop.f32.mrf.mxu0  ;;  %v740_v12 = vld [vmem:[%s5117_s23 + $0x50d] sm:$0xff] }
 0x1cf   : >> { %v2595_v27 = vpop.f32.mrf.mxu1 }
 0x1d0   : >> { %v2293_v33 = vpop.f32.mrf.mxu0  ;;  %2902 = vmatmul.mubr.f32.gmra.mxu0 %v641_v19  ;;  %v932_v19 = vld [vmem:[%s5117_s23 + $0x50f] sm:$0xff] }
 0x1d1   : >> { %v2598_v37 = vpop.f32.mrf.mxu1  ;;  %3207 = vmatmul.mubr.f32.gmra.mxu1 %v833_v21  ;;  %2906 = vmatprep.mubr.f32.mxu0 %v738_v28  ;;  %v644_v28 = vld [vmem:[%s5117_s23 + $0x50c] sm:$0xff] }
 0x1d2   : >> { %v5795_v41 = vadd.f32 %v2598_v37, %v2293_v33  ;;  %3211 = vmatprep.mubr.f32.mxu1 %v930_v32  ;;  %v2295_v48 = vpop.f32.mrf.mxu0  ;;  %v836_v32 = vld [vmem:[%s5117_s23 + $0x50e] sm:$0xff] }
 0x1d3   : >> { %v2600_v51 = vpop.f32.mrf.mxu1 }
 0x1d4   : >> { %v2298_v1 = vpop.f32.mrf.mxu0  ;;  %2907 = vmatmul.mubr.f32.gmra.mxu0 %v642_v43  ;;  %v741_v43 = vld [vmem:[%s5117_s23 + $0x515] sm:$0xff] }
 0x1d5   : >> { %v2603_v62 = vpop.f32.mrf.mxu1  ;;  %3212 = vmatmul.mubr.f32.gmra.mxu1 %v834_v45  ;;  %2911 = vmatprep.mubr.f32.mxu0 %v739_v52  ;;  %v933_v45 = vld [vmem:[%s5117_s23 + $0x517] sm:$0xff] }
 0x1d6   : >> { %v5801_v63 = vadd.f32 %v2603_v62, %v2298_v1  ;;  %3216 = vmatprep.mubr.f32.mxu1 %v931_v55  ;;  %v2300_v8 = vpop.f32.mrf.mxu0  ;;  %v645_v55 = vld [vmem:[%s5117_s23 + $0x514] sm:$0xff] }
 0x1d7   : >> { %v2605_v10 = vpop.f32.mrf.mxu1  ;;  %v837_v1 = vld [vmem:[%s5117_s23 + $0x516] sm:$0xff] }
 0x1d8   : >> { %v2303_v21 = vpop.f32.mrf.mxu0  ;;  %2912 = vmatmul.mubr.f32.gmra.mxu0 %v643_v2  ;;  %v934_v8 = vld [vmem:[%s5117_s23 + $0x52f] sm:$0xff] }
 0x1d9   : >> { %v2608_v25 = vpop.f32.mrf.mxu1  ;;  %3217 = vmatmul.mubr.f32.gmra.mxu1 %v835_v5  ;;  %2916 = vmatprep.mubr.f32.mxu0 %v740_v12  ;;  %v742_v5 = vld [vmem:[%s5117_s23 + $0x52d] sm:$0xff] }
 0x1da   : >> { %v5807_v27 = vadd.f32 %v2608_v25, %v2303_v21  ;;  %3221 = vmatprep.mubr.f32.mxu1 %v932_v19  ;;  %v2305_v33 = vpop.f32.mrf.mxu0  ;;  %v646_v21 = vld [vmem:[%s5117_s23 + $0x52c] sm:$0xff] }
 0x1db   : >> { %v2610_v37 = vpop.f32.mrf.mxu1  ;;  %v838_v25 = vld [vmem:[%s5117_s23 + $0x52e] sm:$0xff] }
 0x1dc   : >> { %v2308_v48 = vpop.f32.mrf.mxu0  ;;  %2917 = vmatmul.mubr.f32.gmra.mxu0 %v644_v28  ;;  %v743_v33 = vld [vmem:[%s5117_s23 + $0x535] sm:$0xff] }
 0x1dd   : >> { %v2613_v51 = vpop.f32.mrf.mxu1  ;;  %3222 = vmatmul.mubr.f32.gmra.mxu1 %v836_v32  ;;  %2921 = vmatprep.mubr.f32.mxu0 %v741_v43  ;;  %v935_v37 = vld [vmem:[%s5117_s23 + $0x537] sm:$0xff] }
 0x1de   : >> { %v5813_v52 = vadd.f32 %v2613_v51, %v2308_v48  ;;  %3226 = vmatprep.mubr.f32.mxu1 %v933_v45  ;;  %v2310_v62 = vpop.f32.mrf.mxu0  ;;  %v647_v51 = vld [vmem:[%s5117_s23 + $0x534] sm:$0xff] }
 0x1df   : >> { %v2615_v2 = vpop.f32.mrf.mxu1 }
 0x1e0   : >> { %v2313_v10 = vpop.f32.mrf.mxu0  ;;  %2922 = vmatmul.mubr.f32.gmra.mxu0 %v645_v55  ;;  %v839_v55 = vld [vmem:[%s5117_s23 + $0x536] sm:$0xff] }
 0x1e1   : >> { %v2618_v12 = vpop.f32.mrf.mxu1  ;;  %3227 = vmatmul.mubr.f32.gmra.mxu1 %v837_v1  ;;  %2926 = vmatprep.mubr.f32.mxu0 %v742_v5  ;;  %v744_v2 = vld [vmem:[%s5117_s23 + $0x53d] sm:$0xff] }
 0x1e2   : >> { %v5819_v19 = vadd.f32 %v2618_v12, %v2313_v10  ;;  %3231 = vmatprep.mubr.f32.mxu1 %v934_v8  ;;  %v2315_v28 = vpop.f32.mrf.mxu0  ;;  %v936_v5 = vld [vmem:[%s5117_s23 + $0x53f] sm:$0xff] }
 0x1e3   : >> { %v2620_v32 = vpop.f32.mrf.mxu1 }
 0x1e4   : >> { %v2318_v43 = vpop.f32.mrf.mxu0  ;;  %2927 = vmatmul.mubr.f32.gmra.mxu0 %v646_v21  ;;  %v648_v21 = vld [vmem:[%s5117_s23 + $0x53c] sm:$0xff] }
 0x1e5   : >> { %v2623_v45 = vpop.f32.mrf.mxu1  ;;  %3232 = vmatmul.mubr.f32.gmra.mxu1 %v838_v25  ;;  %2931 = vmatprep.mubr.f32.mxu0 %v743_v33  ;;  %v840_v25 = vld [vmem:[%s5117_s23 + $0x53e] sm:$0xff]  ;;  %v1081_v33 = vld [vmem:[%s5117_s23 + $0x9] sm:$0xff] }
 0x1e6   : >> { %v5825_v48 = vadd.f32 %v2623_v45, %v2318_v43  ;;  %3236 = vmatprep.mubr.f32.mxu1 %v935_v37  ;;  %v2320_v1 = vpop.f32.mrf.mxu0  ;;  %v1117_v37 = vld [vmem:[%s5117_s23 + $0x4b9] sm:$0xff] }
 0x1e7   : >> { %v2625_v62 = vpop.f32.mrf.mxu1  ;;  %v1021_v1 = vld [vmem:[%s5117_s23 + $0x4b8] sm:$0xff] }
 0x1e8   : >> { %v2323_v8 = vpop.f32.mrf.mxu0  ;;  %2932 = vmatmul.mubr.f32.gmra.mxu0 %v647_v51 }
 0x1e9   : >> { %v2628_v10 = vpop.f32.mrf.mxu1  ;;  %3237 = vmatmul.mubr.f32.gmra.mxu1 %v839_v55  ;;  %2936 = vmatprep.mubr.f32.mxu0 %v744_v2  ;;  %v985_v55 = vld [vmem:[%s5117_s23 + $0x8] sm:$0xff] }
 0x1ea   : >> { %v5831_v12 = vadd.f32 %v2628_v10, %v2323_v8  ;;  %3241 = vmatprep.mubr.f32.mxu1 %v936_v5  ;;  %v2325_v28 = vpop.f32.mrf.mxu0  ;;  %v1082_v5 = vld [vmem:[%s5117_s23 + $0x11] sm:$0xff]  ;;  %v1118_v8 = vld [vmem:[%s5117_s23 + $0x4c1] sm:$0xff] }
 0x1eb   : >> { %v2630_v32 = vpop.f32.mrf.mxu1  ;;  %v2025_v10 = vld [vmem:[%s4995_s19 + $0x570] sm:$0xff] }
 0x1ec   : >> { %v2328_v43 = vpop.f32.mrf.mxu0  ;;  %2937 = vmatmul.mubr.f32.gmra.mxu0 %v648_v21 }
 0x1ed   : >> { %v2633_v45 = vpop.f32.mrf.mxu1  ;;  %3242 = vmatmul.mubr.f32.gmra.mxu1 %v840_v25  ;;  %3311 = vmatprep.mubr.f32.mxu0 %v1081_v33  ;;  %v986_v25 = vld [vmem:[%s5117_s23 + $0x10] sm:$0xff]  ;;  %v1022_v33 = vld [vmem:[%s5117_s23 + $0x4c0] sm:$0xff] }
 0x1ee   : >> { %v5837_v51 = vadd.f32 %v2633_v45, %v2328_v43  ;;  %3491 = vmatprep.mubr.f32.mxu1 %v1117_v37  ;;  %v2330_v62 = vpop.f32.mrf.mxu0  ;;  %v2024_v45 = vld [vmem:[%s4995_s19 + $0x568] sm:$0xff] }
 0x1ef   : >> { %v2635_v2 = vpop.f32.mrf.mxu1  ;;  %v1083_v62 = vld [vmem:[%s5117_s23 + $0x19] sm:$0xff] }
 0x1f0   : >> { %v2703_v28 = vpop.f32.mrf.mxu0  ;;  %3312 = vmatmul.mubr.f32.vlgmr.msra.gmra.mxu0 %v985_v55  ;;  %v1119_v55 = vld [vmem:[%s5117_s23 + $0x4c9] sm:$0xff] }
 0x1f1   : >> { %v3008_v32 = vpop.f32.mrf.mxu1  ;;  %3492 = vmatmul.mubr.f32.vlgmr.msra.gmra.mxu1 %v1021_v1  ;;  %v2704_v21 = vadd.f32 %v2703_v28, %v5458_v16  ;;  %3316 = vmatprep.mubr.f32.mxu0 %v1082_v5  ;;  %v1023_v28 = vld [vmem:[%s5117_s23 + $0x4c8] sm:$0xff] }
 0x1f2   : >> { %4584 = vmatpush3.msra.mxu1 %v5738_v49  ;;  %v2705_v37 = vpop.f32.mrf.mxu0  ;;  %3496 = vmatprep.mubr.f32.mxu1 %v1118_v8  ;;  %v2023_v49 = vld [vmem:[%s4995_s19 + $0x560] sm:$0xff]  ;;  %v987_v8 = vld [vmem:[%s5117_s23 + $0x18] sm:$0xff] }
 0x1f3   : >> { %v3010_v43 = vpop.f32.mrf.mxu1  ;;  %4585 = vmatprep.subr.mxu1 %v2025_v10  ;;  %v5850_v2 = vadd.f32 %v3008_v32, %v2704_v21 }
 0x1f4   : >> { %4586 = vmatpush3.msra.mxu1 %v2025_v10  ;;  %v2708_v16 = vpop.f32.mrf.mxu0  ;;  %3317 = vmatmul.mubr.f32.gmra.mxu0 %v986_v25  ;;  %v1084_v10 = vld [vmem:[%s5117_s23 + $0x31] sm:$0xff]  ;;  %v1120_v25 = vld [vmem:[%s5117_s23 + $0x4e1] sm:$0xff] }
 0x1f5   : >> { %v3013_v1 = vpop.f32.mrf.mxu1  ;;  %3497 = vmatmul.mubr.f32.gmra.mxu1 %v1022_v33  ;;  %v2709_v5 = vadd.f32 %v2708_v16, %v5467_v26  ;;  %4587 = vmatprep.subr.mxu1 %v2024_v45  ;;  %v2022_v33 = vld [vmem:[%s4995_s19 + $0x558] sm:$0xff]  ;;  %v988_v16 = vld [vmem:[%s5117_s23 + $0x30] sm:$0xff] }
 0x1f6   : >> { %3321 = vmatprep.mubr.f32.mxu0 %v1083_v62  ;;  %v2710_v37 = vpop.f32.mrf.mxu0  ;;  %3501 = vmatprep.mubr.f32.mxu1 %v1119_v55  ;;  %v1024_v55 = vld [vmem:[%s5117_s23 + $0x4e0] sm:$0xff] }
 0x1f7   : >> { %v3015_v32 = vpop.f32.mrf.mxu1  ;;  %4588 = vmatpush3.msra.mxu1 %v2024_v45  ;;  %v5858_v21 = vadd.f32 %v3013_v1, %v2709_v5  ;;  %v1085_v5 = vld [vmem:[%s5117_s23 + $0x39] sm:$0xff]  ;;  %v1121_v37 = vld [vmem:[%s5117_s23 + $0x4e9] sm:$0xff] }
 0x1f8   : >> { %4589 = vmatprep.subr.mxu1 %v2023_v49  ;;  %v2713_v43 = vpop.f32.mrf.mxu0  ;;  %3322 = vmatmul.mubr.f32.gmra.mxu0 %v987_v8  ;;  %v2021_v8 = vld [vmem:[%s4995_s19 + $0x550] sm:$0xff] }
 0x1f9   : >> { %v3018_v26 = vpop.f32.mrf.mxu1  ;;  %3502 = vmatmul.mubr.f32.gmra.mxu1 %v1023_v28  ;;  %v2714_v62 = vadd.f32 %v2713_v43, %v5476_v36  ;;  %3326 = vmatprep.mubr.f32.mxu0 %v1084_v10  ;;  %v989_v10 = vld [vmem:[%s5117_s23 + $0x38] sm:$0xff] }
 0x1fa   : >> { %4590 = vmatpush3.msra.mxu1 %v2023_v49  ;;  %v2715_v45 = vpop.f32.mrf.mxu0  ;;  %3506 = vmatprep.mubr.f32.mxu1 %v1120_v25  ;;  %v1025_v25 = vld [vmem:[%s5117_s23 + $0x4e8] sm:$0xff] }
 0x1fb   : >> { %v3020_v1 = vpop.f32.mrf.mxu1  ;;  %4591 = vmatprep.subr.mxu1 %v2022_v33  ;;  %v5867_v32 = vadd.f32 %v3018_v26, %v2714_v62  ;;  %v2020_v26 = vld [vmem:[%s4995_s19 + $0x548] sm:$0xff] }
 0x1fc   : >> { %4592 = vmatpush3.msra.mxu1 %v2022_v33  ;;  %v2718_v28 = vpop.f32.mrf.mxu0  ;;  %3327 = vmatmul.mubr.f32.gmra.mxu0 %v988_v16  ;;  %v1086_v33 = vld [vmem:[%s5117_s23 + $0x41] sm:$0xff]  ;;  %v1122_v16 = vld [vmem:[%s5117_s23 + $0x4f1] sm:$0xff] }
 0x1fd   : >> { %v3023_v36 = vpop.f32.mrf.mxu1  ;;  %3507 = vmatmul.mubr.f32.gmra.mxu1 %v1024_v55  ;;  %v2719_v49 = vadd.f32 %v2718_v28, %v5485_v46  ;;  %3331 = vmatprep.mubr.f32.mxu0 %v1085_v5  ;;  %v2019_v46 = vld [vmem:[%s4995_s19 + $0x540] sm:$0xff]  ;;  %v1026_v28 = vld [vmem:[%s5117_s23 + $0x4f0] sm:$0xff] }
 0x1fe   : >> { %3511 = vmatprep.mubr.f32.mxu1 %v1121_v37  ;;  %v2720_v43 = vpop.f32.mrf.mxu0  ;;  %4593 = vmatprep.subr.mxu1 %v2021_v8  ;;  %v990_v37 = vld [vmem:[%s5117_s23 + $0x40] sm:$0xff] }
 0x1ff   : >> { %v3025_v45 = vpop.f32.mrf.mxu1  ;;  %v5875_v62 = vadd.f32 %v3023_v36, %v2719_v49  ;;  %4594 = vmatpush3.msra.mxu1 %v2021_v8  ;;  %v1087_v8 = vld [vmem:[%s5117_s23 + $0x59] sm:$0xff] }
 0x200   : >> { %v2723_v55 = vpop.f32.mrf.mxu0  ;;  %3332 = vmatmul.mubr.f32.gmra.mxu0 %v989_v10  ;;  %4595 = vmatprep.subr.mxu1 %v2020_v26  ;;  %v1123_v10 = vld [vmem:[%s5117_s23 + $0x509] sm:$0xff] }
 0x201   : >> { %v3028_v1 = vpop.f32.mrf.mxu1  ;;  %3512 = vmatmul.mubr.f32.gmra.mxu1 %v1025_v25  ;;  %v2724_v5 = vadd.f32 %v2723_v55, %v5494_v56  ;;  %3336 = vmatprep.mubr.f32.mxu0 %v1086_v33  ;;  %v2018_v25 = vld [vmem:[%s4995_s19 + $0x538] sm:$0xff] }
 0x202   : >> { %v2725_v43 = vpop.f32.mrf.mxu0  ;;  %3516 = vmatprep.mubr.f32.mxu1 %v1122_v16  ;;  %4596 = vmatpush3.msra.mxu1 %v2020_v26  ;;  %v991_v55 = vld [vmem:[%s5117_s23 + $0x58] sm:$0xff]  ;;  %v1027_v16 = vld [vmem:[%s5117_s23 + $0x508] sm:$0xff] }
 0x203   : >> { %v3030_v36 = vpop.f32.mrf.mxu1  ;;  %v5883_v49 = vadd.f32 %v3028_v1, %v2724_v5  ;;  %4597 = vmatprep.subr.mxu1 %v2019_v46  ;;  %v1088_v5 = vld [vmem:[%s5117_s23 + $0x61] sm:$0xff]  ;;  %v1124_v43 = vld [vmem:[%s5117_s23 + $0x511] sm:$0xff] }
 0x204   : >> { %v2728_v45 = vpop.f32.mrf.mxu0  ;;  %3337 = vmatmul.mubr.f32.gmra.mxu0 %v990_v37  ;;  %4598 = vmatpush3.msra.mxu1 %v2019_v46  ;;  %v2017_v37 = vld [vmem:[%s4995_s19 + $0x530] sm:$0xff] }
 0x205   : >> { %v3033_v56 = vpop.f32.mrf.mxu1  ;;  %3517 = vmatmul.mubr.f32.gmra.mxu1 %v1026_v28  ;;  %v2729_v33 = vadd.f32 %v2728_v45, %v5503_v3  ;;  %3341 = vmatprep.mubr.f32.mxu0 %v1087_v8  ;;  %v992_v8 = vld [vmem:[%s5117_s23 + $0x60] sm:$0xff] }
 0x206   : >> { %v2730_v26 = vpop.f32.mrf.mxu0  ;;  %3521 = vmatprep.mubr.f32.mxu1 %v1123_v10  ;;  %4599 = vmatprep.subr.mxu1 %v2018_v25  ;;  %v1028_v10 = vld [vmem:[%s5117_s23 + $0x510] sm:$0xff] }
 0x207   : >> { %v3035_v1 = vpop.f32.mrf.mxu1  ;;  %v5892_v36 = vadd.f32 %v3033_v56, %v2729_v33  ;;  %4600 = vmatpush3.msra.mxu1 %v2018_v25  ;;  %v2016_v56 = vld [vmem:[%s4995_s19 + $0x528] sm:$0xff] }
 0x208   : >> { %v2733_v28 = vpop.f32.mrf.mxu0  ;;  %3342 = vmatmul.mubr.f32.gmra.mxu0 %v991_v55  ;;  %4601 = vmatprep.subr.mxu1 %v2017_v37  ;;  %v1089_v25 = vld [vmem:[%s5117_s23 + $0x69] sm:$0xff]  ;;  %v1125_v55 = vld [vmem:[%s5117_s23 + $0x519] sm:$0xff] }
 0x209   : >> { %v3038_v3 = vpop.f32.mrf.mxu1  ;;  %3522 = vmatmul.mubr.f32.gmra.mxu1 %v1027_v16  ;;  %v2734_v46 = vadd.f32 %v2733_v28, %v5512_v13  ;;  %3346 = vmatprep.mubr.f32.mxu0 %v1088_v5  ;;  %v2015_v13 = vld [vmem:[%s4995_s19 + $0x520] sm:$0xff]  ;;  %v1029_v28 = vld [vmem:[%s5117_s23 + $0x518] sm:$0xff] }
 0x20a   : >> { %3526 = vmatprep.mubr.f32.mxu1 %v1124_v43  ;;  %v2735_v45 = vpop.f32.mrf.mxu0  ;;  %4602 = vmatpush3.msra.mxu1 %v2017_v37  ;;  %v993_v43 = vld [vmem:[%s5117_s23 + $0x68] sm:$0xff] }
 0x20b   : >> { %v3040_v26 = vpop.f32.mrf.mxu1  ;;  %v5900_v33 = vadd.f32 %v3038_v3, %v2734_v46  ;;  %4603 = vmatprep.subr.mxu1 %v2016_v56  ;;  %v1090_v37 = vld [vmem:[%s5117_s23 + $0x81] sm:$0xff] }
 0x20c   : >> { %v2738_v16 = vpop.f32.mrf.mxu0  ;;  %3347 = vmatmul.mubr.f32.gmra.mxu0 %v992_v8  ;;  %4604 = vmatpush3.msra.mxu1 %v2016_v56  ;;  %v1126_v8 = vld [vmem:[%s5117_s23 + $0x531] sm:$0xff] }
 0x20d   : >> { %v3043_v1 = vpop.f32.mrf.mxu1  ;;  %3527 = vmatmul.mubr.f32.gmra.mxu1 %v1028_v10  ;;  %v2739_v5 = vadd.f32 %v2738_v16, %v5521_v24  ;;  %3351 = vmatprep.mubr.f32.mxu0 %v1089_v25  ;;  %v2014_v10 = vld [vmem:[%s4995_s19 + $0x518] sm:$0xff]  ;;  %v994_v16 = vld [vmem:[%s5117_s23 + $0x80] sm:$0xff] }
 0x20e   : >> { %v2740_v45 = vpop.f32.mrf.mxu0  ;;  %3531 = vmatprep.mubr.f32.mxu1 %v1125_v55  ;;  %4605 = vmatprep.subr.mxu1 %v2015_v13  ;;  %v1030_v55 = vld [vmem:[%s5117_s23 + $0x530] sm:$0xff] }
 0x20f   : >> { %v3045_v3 = vpop.f32.mrf.mxu1  ;;  %v5908_v46 = vadd.f32 %v3043_v1, %v2739_v5  ;;  %4606 = vmatpush3.msra.mxu1 %v2015_v13  ;;  %v1091_v5 = vld [vmem:[%s5117_s23 + $0x89] sm:$0xff]  ;;  %v1127_v45 = vld [vmem:[%s5117_s23 + $0x539] sm:$0xff] }
 0x210   : >> { %v2743_v26 = vpop.f32.mrf.mxu0  ;;  %3352 = vmatmul.mubr.f32.gmra.mxu0 %v993_v43  ;;  %4607 = vmatprep.subr.mxu1 %v2014_v10  ;;  %v2013_v43 = vld [vmem:[%s4995_s19 + $0x510] sm:$0xff] }
 0x211   : >> { %v3048_v24 = vpop.f32.mrf.mxu1  ;;  %3532 = vmatmul.mubr.f32.gmra.mxu1 %v1029_v28  ;;  %v2744_v25 = vadd.f32 %v2743_v26, %v5530_v35  ;;  %3356 = vmatprep.mubr.f32.mxu0 %v1090_v37  ;;  %v995_v37 = vld [vmem:[%s5117_s23 + $0x88] sm:$0xff] }
 0x212   : >> { %v2745_v56 = vpop.f32.mrf.mxu0  ;;  %3536 = vmatprep.mubr.f32.mxu1 %v1126_v8  ;;  %4608 = vmatpush3.msra.mxu1 %v2014_v10  ;;  %v1031_v8 = vld [vmem:[%s5117_s23 + $0x538] sm:$0xff] }
 0x213   : >> { %v3050_v1 = vpop.f32.mrf.mxu1  ;;  %v5917_v3 = vadd.f32 %v3048_v24, %v2744_v25  ;;  %4609 = vmatprep.subr.mxu1 %v2013_v43  ;;  %v2012_v24 = vld [vmem:[%s4995_s19 + $0x508] sm:$0xff]  ;;  %v1092_v10 = vld [vmem:[%s5117_s23 + $0x91] sm:$0xff] }
 0x214   : >> { %v2748_v28 = vpop.f32.mrf.mxu0  ;;  %3357 = vmatmul.mubr.f32.gmra.mxu0 %v994_v16  ;;  %4610 = vmatpush3.msra.mxu1 %v2013_v43  ;;  %v1128_v16 = vld [vmem:[%s5117_s23 + $0x541] sm:$0xff]  ;;  %v1093_v43 = vld [vmem:[%s5117_s23 + $0xa9] sm:$0xff] }
 0x215   : >> { %v3053_v35 = vpop.f32.mrf.mxu1  ;;  %3537 = vmatmul.mubr.f32.gmra.mxu1 %v1030_v55  ;;  %v2749_v13 = vadd.f32 %v2748_v28, %v5539_v47  ;;  %3361 = vmatprep.mubr.f32.mxu0 %v1091_v5  ;;  %v2011_v47 = vld [vmem:[%s4995_s19 + $0x500] sm:$0xff] }
 0x216   : >> { %3541 = vmatprep.mubr.f32.mxu1 %v1127_v45  ;;  %v2750_v26 = vpop.f32.mrf.mxu0  ;;  %4611 = vmatprep.subr.mxu1 %v2012_v24  ;;  %v996_v45 = vld [vmem:[%s5117_s23 + $0x90] sm:$0xff]  ;;  %v1032_v28 = vld [vmem:[%s5117_s23 + $0x540] sm:$0xff] }
 0x217   : >> { %v3055_v56 = vpop.f32.mrf.mxu1  ;;  %v5925_v25 = vadd.f32 %v3053_v35, %v2749_v13  ;;  %4612 = vmatpush3.msra.mxu1 %v2012_v24 }
 0x218   : >> { %v2753_v55 = vpop.f32.mrf.mxu0  ;;  %3362 = vmatmul.mubr.f32.gmra.mxu0 %v995_v37  ;;  %4613 = vmatprep.subr.mxu1 %v2011_v47  ;;  %v1177_v37 = vld [vmem:[%s5117_s23 + $0xa] sm:$0xff] }
 0x219   : >> { %v3058_v1 = vpop.f32.mrf.mxu1  ;;  %3542 = vmatmul.mubr.f32.gmra.mxu1 %v1031_v8  ;;  %v2754_v5 = vadd.f32 %v2753_v55, %v5548_v58  ;;  %3366 = vmatprep.mubr.f32.mxu0 %v1092_v10  ;;  %v997_v10 = vld [vmem:[%s5117_s23 + $0xa8] sm:$0xff] }
 0x21a   : >> { %v2755_v26 = vpop.f32.mrf.mxu0  ;;  %3546 = vmatprep.mubr.f32.mxu1 %v1128_v16  ;;  %4614 = vmatpush3.msra.mxu1 %v2011_v47  ;;  %v1178_v16 = vld [vmem:[%s5117_s23 + $0x12] sm:$0xff] }
 0x21b   : >> { %v3060_v35 = vpop.f32.mrf.mxu1  ;;  %v5933_v13 = vadd.f32 %v3058_v1, %v2754_v5  ;;  %v1094_v1 = vld [vmem:[%s5117_s23 + $0xb1] sm:$0xff]  ;;  %v1179_v5 = vld [vmem:[%s5117_s23 + $0x1a] sm:$0xff] }
 0x21c   : >> { %v2758_v8 = vpop.f32.mrf.mxu0  ;;  %3367 = vmatmul.mubr.f32.gmra.mxu0 %v996_v45  ;;  %v998_v47 = vld [vmem:[%s5117_s23 + $0xb0] sm:$0xff] }
 0x21d   : >> { %v3063_v56 = vpop.f32.mrf.mxu1  ;;  %3547 = vmatmul.mubr.f32.gmra.mxu1 %v1032_v28  ;;  %v2759_v58 = vadd.f32 %v2758_v8, %v5557_v6  ;;  %3371 = vmatprep.mubr.f32.mxu0 %v1093_v43  ;;  %v1180_v28 = vld [vmem:[%s5117_s23 + $0x32] sm:$0xff] }
 0x21e   : >> { %v2760_v24 = vpop.f32.mrf.mxu0  ;;  %4615 = vmatprep.mubr.f32.mxu1 %v1177_v37  ;;  %v1095_v8 = vld [vmem:[%s5117_s23 + $0xb9] sm:$0xff] }
 0x21f   : >> { %v3065_v55 = vpop.f32.mrf.mxu1  ;;  %v5941_v26 = vadd.f32 %v3063_v56, %v2759_v58  ;;  %v1181_v24 = vld [vmem:[%s5117_s23 + $0x3a] sm:$0xff] }
 0x220   : >> { %v2763_v35 = vpop.f32.mrf.mxu0  ;;  %3372 = vmatmul.mubr.f32.gmra.mxu0 %v997_v10  ;;  %v999_v10 = vld [vmem:[%s5117_s23 + $0xb8] sm:$0xff] }
 0x221   : >> { %v3068_v45 = vpop.f32.mrf.mxu1  ;;  %4616 = vmatmul.mubr.f32.vlgmr.msra.gmra.mxu1 %v1178_v16  ;;  %v2764_v6 = vadd.f32 %v2763_v35, %v5566_v18  ;;  %3376 = vmatprep.mubr.f32.mxu0 %v1094_v1  ;;  %v1182_v16 = vld [vmem:[%s5117_s23 + $0x42] sm:$0xff]  ;;  %v1096_v35 = vld [vmem:[%s5117_s23 + $0xd1] sm:$0xff] }
 0x222   : >> { %4618 = vmatprep.mubr.f32.mxu1 %v1179_v5  ;;  %v2765_v43 = vpop.f32.mrf.mxu0 }
 0x223   : >> { %v3070_v37 = vpop.f32.mrf.mxu1  ;;  %v5948_v56 = vadd.f32 %v3068_v45, %v2764_v6  ;;  %v1183_v43 = vld [vmem:[%s5117_s23 + $0x5a] sm:$0xff] }
 0x224   : >> { %v2768_v58 = vpop.f32.mrf.mxu0  ;;  %3377 = vmatmul.mubr.f32.gmra.mxu0 %v998_v47  ;;  %v1000_v47 = vld [vmem:[%s5117_s23 + $0xd0] sm:$0xff] }
 0x225   : >> { %v3073_v55 = vpop.f32.mrf.mxu1  ;;  %4619 = vmatmul.mubr.f32.gmra.mxu1 %v1180_v28  ;;  %v2769_v18 = vadd.f32 %v2768_v58, %v5575_v30  ;;  %3381 = vmatprep.mubr.f32.mxu0 %v1095_v8  ;;  %v1184_v28 = vld [vmem:[%s5117_s23 + $0x62] sm:$0xff]  ;;  %v1097_v58 = vld [vmem:[%s5117_s23 + $0xd9] sm:$0xff] }
 0x226   : >> { %4621 = vmatprep.mubr.f32.mxu1 %v1181_v24  ;;  %v2770_v1 = vpop.f32.mrf.mxu0 }
 0x227   : >> { %v3075_v5 = vpop.f32.mrf.mxu1  ;;  %v5955_v45 = vadd.f32 %v3073_v55, %v2769_v18  ;;  %v1185_v1 = vld [vmem:[%s5117_s23 + $0x6a] sm:$0xff] }
 0x228   : >> { %v2773_v6 = vpop.f32.mrf.mxu0  ;;  %3382 = vmatmul.mubr.f32.gmra.mxu0 %v999_v10  ;;  %v1001_v10 = vld [vmem:[%s5117_s23 + $0xd8] sm:$0xff] }
 0x229   : >> { %v3078_v37 = vpop.f32.mrf.mxu1  ;;  %4622 = vmatmul.mubr.f32.gmra.mxu1 %v1182_v16  ;;  %v2774_v30 = vadd.f32 %v2773_v6, %v5584_v42  ;;  %3386 = vmatprep.mubr.f32.mxu0 %v1096_v35  ;;  %v1186_v16 = vld [vmem:[%s5117_s23 + $0x82] sm:$0xff] }
 0x22a   : >> { %4624 = vmatprep.mubr.f32.mxu1 %v1183_v43  ;;  %v2775_v8 = vpop.f32.mrf.mxu0  ;;  %v1098_v6 = vld [vmem:[%s5117_s23 + $0xe1] sm:$0xff] }
 0x22b   : >> { %v3080_v24 = vpop.f32.mrf.mxu1  ;;  %v5962_v55 = vadd.f32 %v3078_v37, %v2774_v30  ;;  %v1187_v8 = vld [vmem:[%s5117_s23 + $0x8a] sm:$0xff] }
 0x22c   : >> { %v2778_v18 = vpop.f32.mrf.mxu0  ;;  %3387 = vmatmul.mubr.f32.gmra.mxu0 %v1000_v47  ;;  %v1002_v47 = vld [vmem:[%s5117_s23 + $0xe0] sm:$0xff] }
 0x22d   : >> { %v3083_v5 = vpop.f32.mrf.mxu1  ;;  %4625 = vmatmul.mubr.f32.gmra.mxu1 %v1184_v28  ;;  %v2779_v42 = vadd.f32 %v2778_v18, %v5593_v54  ;;  %3391 = vmatprep.mubr.f32.mxu0 %v1097_v58  ;;  %v1188_v28 = vld [vmem:[%s5117_s23 + $0x92] sm:$0xff] }
 0x22e   : >> { %4627 = vmatprep.mubr.f32.mxu1 %v1185_v1  ;;  %v2780_v35 = vpop.f32.mrf.mxu0  ;;  %v1099_v18 = vld [vmem:[%s5117_s23 + $0xf9] sm:$0xff] }
 0x22f   : >> { %v3085_v43 = vpop.f32.mrf.mxu1  ;;  %v5969_v37 = vadd.f32 %v3083_v5, %v2779_v42  ;;  %v1189_v35 = vld [vmem:[%s5117_s23 + $0xaa] sm:$0xff] }
 0x230   : >> { %v2783_v30 = vpop.f32.mrf.mxu0  ;;  %3392 = vmatmul.mubr.f32.gmra.mxu0 %v1001_v10  ;;  %v1003_v10 = vld [vmem:[%s5117_s23 + $0xf8] sm:$0xff] }
 0x231   : >> { %v3088_v24 = vpop.f32.mrf.mxu1  ;;  %4628 = vmatmul.mubr.f32.gmra.mxu1 %v1186_v16  ;;  %v2784_v54 = vadd.f32 %v2783_v30, %v5602_v4  ;;  %3396 = vmatprep.mubr.f32.mxu0 %v1098_v6  ;;  %v1190_v16 = vld [vmem:[%s5117_s23 + $0xb2] sm:$0xff]  ;;  %v1100_v30 = vld [vmem:[%s5117_s23 + $0x101] sm:$0xff] }
 0x232   : >> { %4630 = vmatprep.mubr.f32.mxu1 %v1187_v8  ;;  %v2785_v58 = vpop.f32.mrf.mxu0 }
 0x233   : >> { %v3090_v1 = vpop.f32.mrf.mxu1  ;;  %v5976_v5 = vadd.f32 %v3088_v24, %v2784_v54  ;;  %v1191_v58 = vld [vmem:[%s5117_s23 + $0xba] sm:$0xff] }
 0x234   : >> { %v2788_v42 = vpop.f32.mrf.mxu0  ;;  %3397 = vmatmul.mubr.f32.gmra.mxu0 %v1002_v47  ;;  %v1004_v47 = vld [vmem:[%s5117_s23 + $0x100] sm:$0xff] }
 0x235   : >> { %v3093_v43 = vpop.f32.mrf.mxu1  ;;  %4631 = vmatmul.mubr.f32.gmra.mxu1 %v1188_v28  ;;  %v2789_v4 = vadd.f32 %v2788_v42, %v5611_v17  ;;  %3401 = vmatprep.mubr.f32.mxu0 %v1099_v18  ;;  %v1192_v28 = vld [vmem:[%s5117_s23 + $0xd2] sm:$0xff]  ;;  %v1101_v42 = vld [vmem:[%s5117_s23 + $0x109] sm:$0xff] }
 0x236   : >> { %4633 = vmatprep.mubr.f32.mxu1 %v1189_v35  ;;  %v2790_v6 = vpop.f32.mrf.mxu0 }
 0x237   : >> { %v3095_v8 = vpop.f32.mrf.mxu1  ;;  %v5983_v24 = vadd.f32 %v3093_v43, %v2789_v4  ;;  %v1193_v6 = vld [vmem:[%s5117_s23 + $0xda] sm:$0xff] }
 0x238   : >> { %v2793_v54 = vpop.f32.mrf.mxu0  ;;  %3402 = vmatmul.mubr.f32.gmra.mxu0 %v1003_v10  ;;  %v1005_v10 = vld [vmem:[%s5117_s23 + $0x108] sm:$0xff] }
 0x239   : >> { %v3098_v1 = vpop.f32.mrf.mxu1  ;;  %4634 = vmatmul.mubr.f32.gmra.mxu1 %v1190_v16  ;;  %v2794_v17 = vadd.f32 %v2793_v54, %v5620_v31  ;;  %3406 = vmatprep.mubr.f32.mxu0 %v1100_v30  ;;  %v1194_v16 = vld [vmem:[%s5117_s23 + $0xe2] sm:$0xff] }
 0x23a   : >> { %4636 = vmatprep.mubr.f32.mxu1 %v1191_v58  ;;  %v2795_v18 = vpop.f32.mrf.mxu0  ;;  %v1102_v54 = vld [vmem:[%s5117_s23 + $0x121] sm:$0xff] }
 0x23b   : >> { %v3100_v35 = vpop.f32.mrf.mxu1  ;;  %v5990_v43 = vadd.f32 %v3098_v1, %v2794_v17  ;;  %v1195_v18 = vld [vmem:[%s5117_s23 + $0xfa] sm:$0xff] }
 0x23c   : >> { %v2798_v4 = vpop.f32.mrf.mxu0  ;;  %3407 = vmatmul.mubr.f32.gmra.mxu0 %v1004_v47  ;;  %v1006_v47 = vld [vmem:[%s5117_s23 + $0x120] sm:$0xff] }
 0x23d   : >> { %v3103_v8 = vpop.f32.mrf.mxu1  ;;  %4637 = vmatmul.mubr.f32.gmra.mxu1 %v1192_v28  ;;  %v2799_v31 = vadd.f32 %v2798_v4, %v5629_v44  ;;  %3411 = vmatprep.mubr.f32.mxu0 %v1101_v42  ;;  %v1196_v28 = vld [vmem:[%s5117_s23 + $0x102] sm:$0xff] }
 0x23e   : >> { %4639 = vmatprep.mubr.f32.mxu1 %v1193_v6  ;;  %v2800_v30 = vpop.f32.mrf.mxu0  ;;  %v1103_v4 = vld [vmem:[%s5117_s23 + $0x129] sm:$0xff] }
 0x23f   : >> { %v3105_v58 = vpop.f32.mrf.mxu1  ;;  %v5997_v1 = vadd.f32 %v3103_v8, %v2799_v31  ;;  %v1197_v30 = vld [vmem:[%s5117_s23 + $0x10a] sm:$0xff] }
 0x240   : >> { %v2803_v17 = vpop.f32.mrf.mxu0  ;;  %3412 = vmatmul.mubr.f32.gmra.mxu0 %v1005_v10  ;;  %v1007_v10 = vld [vmem:[%s5117_s23 + $0x128] sm:$0xff] }
 0x241   : >> { %v3108_v35 = vpop.f32.mrf.mxu1  ;;  %4640 = vmatmul.mubr.f32.gmra.mxu1 %v1194_v16  ;;  %v2804_v44 = vadd.f32 %v2803_v17, %v5638_v59  ;;  %3416 = vmatprep.mubr.f32.mxu0 %v1102_v54  ;;  %v1198_v16 = vld [vmem:[%s5117_s23 + $0x122] sm:$0xff]  ;;  %v1104_v17 = vld [vmem:[%s5117_s23 + $0x131] sm:$0xff] }
 0x242   : >> { %4642 = vmatprep.mubr.f32.mxu1 %v1195_v18  ;;  %v2805_v42 = vpop.f32.mrf.mxu0 }
 0x243   : >> { %v3110_v6 = vpop.f32.mrf.mxu1  ;;  %v6004_v8 = vadd.f32 %v3108_v35, %v2804_v44  ;;  %v1199_v42 = vld [vmem:[%s5117_s23 + $0x12a] sm:$0xff] }
 0x244   : >> { %v2808_v31 = vpop.f32.mrf.mxu0  ;;  %3417 = vmatmul.mubr.f32.gmra.mxu0 %v1006_v47  ;;  %v1008_v47 = vld [vmem:[%s5117_s23 + $0x130] sm:$0xff] }
 0x245   : >> { %v3113_v58 = vpop.f32.mrf.mxu1  ;;  %4643 = vmatmul.mubr.f32.gmra.mxu1 %v1196_v28  ;;  %v2809_v59 = vadd.f32 %v2808_v31, %v5647_v9  ;;  %3421 = vmatprep.mubr.f32.mxu0 %v1103_v4  ;;  %v1200_v28 = vld [vmem:[%s5117_s23 + $0x132] sm:$0xff] }
 0x246   : >> { %4645 = vmatprep.mubr.f32.mxu1 %v1197_v30  ;;  %v2810_v54 = vpop.f32.mrf.mxu0  ;;  %v1105_v31 = vld [vmem:[%s5117_s23 + $0x419] sm:$0xff] }
 0x247   : >> { %v3115_v18 = vpop.f32.mrf.mxu1  ;;  %v6011_v35 = vadd.f32 %v3113_v58, %v2809_v59  ;;  %v1201_v54 = vld [vmem:[%s5117_s23 + $0x41a] sm:$0xff] }
 0x248   : >> { %v2813_v44 = vpop.f32.mrf.mxu0  ;;  %3422 = vmatmul.mubr.f32.gmra.mxu0 %v1007_v10  ;;  %v1009_v10 = vld [vmem:[%s5117_s23 + $0x418] sm:$0xff] }
 0x249   : >> { %v3118_v6 = vpop.f32.mrf.mxu1  ;;  %4646 = vmatmul.mubr.f32.gmra.mxu1 %v1198_v16  ;;  %v2814_v9 = vadd.f32 %v2813_v44, %v5656_v23  ;;  %3426 = vmatprep.mubr.f32.mxu0 %v1104_v17  ;;  %v1202_v16 = vld [vmem:[%s5117_s23 + $0x422] sm:$0xff] }
 0x24a   : >> { %4648 = vmatprep.mubr.f32.mxu1 %v1199_v42  ;;  %v2815_v4 = vpop.f32.mrf.mxu0  ;;  %v1106_v44 = vld [vmem:[%s5117_s23 + $0x421] sm:$0xff] }
 0x24b   : >> { %v3120_v30 = vpop.f32.mrf.mxu1  ;;  %v6018_v58 = vadd.f32 %v3118_v6, %v2814_v9  ;;  %v1203_v4 = vld [vmem:[%s5117_s23 + $0x42a] sm:$0xff] }
 0x24c   : >> { %v2818_v59 = vpop.f32.mrf.mxu0  ;;  %3427 = vmatmul.mubr.f32.gmra.mxu0 %v1008_v47  ;;  %v1010_v47 = vld [vmem:[%s5117_s23 + $0x420] sm:$0xff] }
 0x24d   : >> { %v3123_v18 = vpop.f32.mrf.mxu1  ;;  %4649 = vmatmul.mubr.f32.gmra.mxu1 %v1200_v28  ;;  %v2819_v23 = vadd.f32 %v2818_v59, %v5665_v39  ;;  %3431 = vmatprep.mubr.f32.mxu0 %v1105_v31  ;;  %v1204_v28 = vld [vmem:[%s5117_s23 + $0x442] sm:$0xff] }
 0x24e   : >> { %4651 = vmatprep.mubr.f32.mxu1 %v1201_v54  ;;  %v2820_v17 = vpop.f32.mrf.mxu0  ;;  %v1107_v59 = vld [vmem:[%s5117_s23 + $0x429] sm:$0xff] }
 0x24f   : >> { %v3125_v42 = vpop.f32.mrf.mxu1  ;;  %v6025_v6 = vadd.f32 %v3123_v18, %v2819_v23  ;;  %v1205_v17 = vld [vmem:[%s5117_s23 + $0x44a] sm:$0xff] }
 0x250   : >> { %v2823_v9 = vpop.f32.mrf.mxu0  ;;  %3432 = vmatmul.mubr.f32.gmra.mxu0 %v1009_v10  ;;  %v1011_v10 = vld [vmem:[%s5117_s23 + $0x428] sm:$0xff] }
 0x251   : >> { %v3128_v30 = vpop.f32.mrf.mxu1  ;;  %4652 = vmatmul.mubr.f32.gmra.mxu1 %v1202_v16  ;;  %v2824_v39 = vadd.f32 %v2823_v9, %v5674_v53  ;;  %3436 = vmatprep.mubr.f32.mxu0 %v1106_v44  ;;  %v1206_v16 = vld [vmem:[%s5117_s23 + $0x452] sm:$0xff]  ;;  %v1108_v9 = vld [vmem:[%s5117_s23 + $0x441] sm:$0xff] }
 0x252   : >> { %4654 = vmatprep.mubr.f32.mxu1 %v1203_v4  ;;  %v2825_v31 = vpop.f32.mrf.mxu0 }
 0x253   : >> { %v3130_v54 = vpop.f32.mrf.mxu1  ;;  %v6032_v18 = vadd.f32 %v3128_v30, %v2824_v39  ;;  %v1207_v31 = vld [vmem:[%s5117_s23 + $0x46a] sm:$0xff] }
 0x254   : >> { %v2828_v23 = vpop.f32.mrf.mxu0  ;;  %3437 = vmatmul.mubr.f32.gmra.mxu0 %v1010_v47  ;;  %v1012_v47 = vld [vmem:[%s5117_s23 + $0x440] sm:$0xff] }
 0x255   : >> { %v3133_v42 = vpop.f32.mrf.mxu1  ;;  %4655 = vmatmul.mubr.f32.gmra.mxu1 %v1204_v28  ;;  %v2829_v53 = vadd.f32 %v2828_v23, %v5683_v7  ;;  %3441 = vmatprep.mubr.f32.mxu0 %v1107_v59  ;;  %v1208_v28 = vld [vmem:[%s5117_s23 + $0x472] sm:$0xff]  ;;  %v1109_v23 = vld [vmem:[%s5117_s23 + $0x449] sm:$0xff] }
 0x256   : >> { %4657 = vmatprep.mubr.f32.mxu1 %v1205_v17  ;;  %v2830_v44 = vpop.f32.mrf.mxu0 }
 0x257   : >> { %v3135_v4 = vpop.f32.mrf.mxu1  ;;  %v6039_v30 = vadd.f32 %v3133_v42, %v2829_v53  ;;  %v1209_v44 = vld [vmem:[%s5117_s23 + $0x47a] sm:$0xff] }
 0x258   : >> { %v2833_v39 = vpop.f32.mrf.mxu0  ;;  %3442 = vmatmul.mubr.f32.gmra.mxu0 %v1011_v10  ;;  %v1013_v10 = vld [vmem:[%s5117_s23 + $0x448] sm:$0xff] }
 0x259   : >> { %v3138_v54 = vpop.f32.mrf.mxu1  ;;  %4658 = vmatmul.mubr.f32.gmra.mxu1 %v1206_v16  ;;  %v2834_v7 = vadd.f32 %v2833_v39, %v5692_v22  ;;  %3446 = vmatprep.mubr.f32.mxu0 %v1108_v9  ;;  %v1210_v16 = vld [vmem:[%s5117_s23 + $0x492] sm:$0xff] }
 0x25a   : >> { %4660 = vmatprep.mubr.f32.mxu1 %v1207_v31  ;;  %v2835_v59 = vpop.f32.mrf.mxu0  ;;  %v1110_v39 = vld [vmem:[%s5117_s23 + $0x451] sm:$0xff] }
 0x25b   : >> { %v3140_v17 = vpop.f32.mrf.mxu1  ;;  %v6046_v42 = vadd.f32 %v3138_v54, %v2834_v7  ;;  %v1211_v59 = vld [vmem:[%s5117_s23 + $0x49a] sm:$0xff] }
 0x25c   : >> { %v2838_v53 = vpop.f32.mrf.mxu0  ;;  %3447 = vmatmul.mubr.f32.gmra.mxu0 %v1012_v47  ;;  %v1014_v47 = vld [vmem:[%s5117_s23 + $0x450] sm:$0xff] }
 0x25d   : >> { %v3143_v4 = vpop.f32.mrf.mxu1  ;;  %4661 = vmatmul.mubr.f32.gmra.mxu1 %v1208_v28  ;;  %v2839_v22 = vadd.f32 %v2838_v53, %v5701_v40  ;;  %3451 = vmatprep.mubr.f32.mxu0 %v1109_v23  ;;  %v1212_v28 = vld [vmem:[%s5117_s23 + $0x4a2] sm:$0xff] }
 0x25e   : >> { %4663 = vmatprep.mubr.f32.mxu1 %v1209_v44  ;;  %v2840_v9 = vpop.f32.mrf.mxu0  ;;  %v1111_v53 = vld [vmem:[%s5117_s23 + $0x469] sm:$0xff] }
 0x25f   : >> { %v3145_v31 = vpop.f32.mrf.mxu1  ;;  %v6053_v54 = vadd.f32 %v3143_v4, %v2839_v22  ;;  %v1213_v9 = vld [vmem:[%s5117_s23 + $0x4ba] sm:$0xff] }
 0x260   : >> { %v2843_v7 = vpop.f32.mrf.mxu0  ;;  %3452 = vmatmul.mubr.f32.gmra.mxu0 %v1013_v10  ;;  %v1015_v10 = vld [vmem:[%s5117_s23 + $0x468] sm:$0xff] }
 0x261   : >> { %v3148_v17 = vpop.f32.mrf.mxu1  ;;  %4664 = vmatmul.mubr.f32.gmra.mxu1 %v1210_v16  ;;  %v2844_v40 = vadd.f32 %v2843_v7, %v5710_v57  ;;  %3456 = vmatprep.mubr.f32.mxu0 %v1110_v39  ;;  %v1214_v16 = vld [vmem:[%s5117_s23 + $0x4c2] sm:$0xff]  ;;  %v1112_v7 = vld [vmem:[%s5117_s23 + $0x471] sm:$0xff] }
 0x262   : >> { %4666 = vmatprep.mubr.f32.mxu1 %v1211_v59  ;;  %v2845_v23 = vpop.f32.mrf.mxu0 }
 0x263   : >> { %v3150_v44 = vpop.f32.mrf.mxu1  ;;  %v6060_v4 = vadd.f32 %v3148_v17, %v2844_v40  ;;  %v1215_v23 = vld [vmem:[%s5117_s23 + $0x4ca] sm:$0xff] }
 0x264   : >> { %v2848_v22 = vpop.f32.mrf.mxu0  ;;  %3457 = vmatmul.mubr.f32.gmra.mxu0 %v1014_v47  ;;  %v1016_v47 = vld [vmem:[%s5117_s23 + $0x470] sm:$0xff] }
 0x265   : >> { %v3153_v31 = vpop.f32.mrf.mxu1  ;;  %4667 = vmatmul.mubr.f32.gmra.mxu1 %v1212_v28  ;;  %v2849_v57 = vadd.f32 %v2848_v22, %v5719_v11  ;;  %3461 = vmatprep.mubr.f32.mxu0 %v1111_v53  ;;  %v1216_v28 = vld [vmem:[%s5117_s23 + $0x4e2] sm:$0xff]  ;;  %v1113_v22 = vld [vmem:[%s5117_s23 + $0x479] sm:$0xff] }
 0x266   : >> { %4669 = vmatprep.mubr.f32.mxu1 %v1213_v9  ;;  %v2850_v39 = vpop.f32.mrf.mxu0 }
 0x267   : >> { %v3155_v59 = vpop.f32.mrf.mxu1  ;;  %v6067_v17 = vadd.f32 %v3153_v31, %v2849_v57  ;;  %v1217_v39 = vld [vmem:[%s5117_s23 + $0x4ea] sm:$0xff] }
 0x268   : >> { %v2853_v40 = vpop.f32.mrf.mxu0  ;;  %3462 = vmatmul.mubr.f32.gmra.mxu0 %v1015_v10  ;;  %v1017_v10 = vld [vmem:[%s5117_s23 + $0x478] sm:$0xff] }
 0x269   : >> { %v3158_v44 = vpop.f32.mrf.mxu1  ;;  %4670 = vmatmul.mubr.f32.gmra.mxu1 %v1214_v16  ;;  %v2854_v11 = vadd.f32 %v2853_v40, %v5728_v29  ;;  %3466 = vmatprep.mubr.f32.mxu0 %v1112_v7  ;;  %v1218_v16 = vld [vmem:[%s5117_s23 + $0x4f2] sm:$0xff] }
 0x26a   : >> { %4672 = vmatprep.mubr.f32.mxu1 %v1215_v23  ;;  %v2855_v53 = vpop.f32.mrf.mxu0  ;;  %v1114_v40 = vld [vmem:[%s5117_s23 + $0x491] sm:$0xff] }
 0x26b   : >> { %v3160_v9 = vpop.f32.mrf.mxu1  ;;  %v6074_v31 = vadd.f32 %v3158_v44, %v2854_v11  ;;  %v1219_v53 = vld [vmem:[%s5117_s23 + $0x50a] sm:$0xff] }
 0x26c   : >> { %v2858_v57 = vpop.f32.mrf.mxu0  ;;  %3467 = vmatmul.mubr.f32.gmra.mxu0 %v1016_v47  ;;  %v1018_v47 = vld [vmem:[%s5117_s23 + $0x490] sm:$0xff] }
 0x26d   : >> { %v3163_v59 = vpop.f32.mrf.mxu1  ;;  %4673 = vmatmul.mubr.f32.gmra.mxu1 %v1216_v28  ;;  %v2859_v29 = vadd.f32 %v2858_v57, %v5740_v50  ;;  %3471 = vmatprep.mubr.f32.mxu0 %v1113_v22  ;;  %v1220_v28 = vld [vmem:[%s5117_s23 + $0x512] sm:$0xff] }
 0x26e   : >> { %4675 = vmatprep.mubr.f32.mxu1 %v1217_v39  ;;  %v2860_v7 = vpop.f32.mrf.mxu0  ;;  %v1115_v57 = vld [vmem:[%s5117_s23 + $0x499] sm:$0xff] }
 0x26f   : >> { %v3165_v23 = vpop.f32.mrf.mxu1  ;;  %v6081_v44 = vadd.f32 %v3163_v59, %v2859_v29  ;;  %v1221_v7 = vld [vmem:[%s5117_s23 + $0x51a] sm:$0xff] }
 0x270   : >> { %v2863_v11 = vpop.f32.mrf.mxu0  ;;  %3472 = vmatmul.mubr.f32.gmra.mxu0 %v1017_v10  ;;  %v1019_v10 = vld [vmem:[%s5117_s23 + $0x498] sm:$0xff] }
 0x271   : >> { %v3168_v9 = vpop.f32.mrf.mxu1  ;;  %4676 = vmatmul.mubr.f32.gmra.mxu1 %v1218_v16  ;;  %v2864_v50 = vadd.f32 %v2863_v11, %v5747_v0  ;;  %3476 = vmatprep.mubr.f32.mxu0 %v1114_v40  ;;  %v1222_v16 = vld [vmem:[%s5117_s23 + $0x532] sm:$0xff]  ;;  %v1116_v11 = vld [vmem:[%s5117_s23 + $0x4a1] sm:$0xff] }
 0x272   : >> { %4678 = vmatprep.mubr.f32.mxu1 %v1219_v53  ;;  %v2865_v22 = vpop.f32.mrf.mxu0 }
 0x273   : >> { %v3170_v39 = vpop.f32.mrf.mxu1  ;;  %v6088_v59 = vadd.f32 %v3168_v9, %v2864_v50  ;;  %v1223_v22 = vld [vmem:[%s5117_s23 + $0x53a] sm:$0xff] }
 0x274   : >> { %v2868_v29 = vpop.f32.mrf.mxu0  ;;  %3477 = vmatmul.mubr.f32.gmra.mxu0 %v1018_v47 }
 0x275   : >> { %6453 = vst [vmem:[#allocation5_spill] sm:$0xff] %v6088_v59  ;;  %v3173_v23 = vpop.f32.mrf.mxu1  ;;  %4679 = vmatmul.mubr.f32.gmra.mxu1 %v1220_v28  ;;  %v2869_v0 = vadd.f32 %v2868_v29, %v5753_v20  ;;  %3481 = vmatprep.mubr.f32.mxu0 %v1115_v57  ;;  %v1020_v20 = vld [vmem:[%s5117_s23 + $0x4a0] sm:$0xff] }
 0x276   : >> { %4681 = vmatprep.mubr.f32.mxu1 %v1221_v7  ;;  %v2870_v40 = vpop.f32.mrf.mxu0  ;;  %v1224_v28 = vld [vmem:[%s5117_s23 + $0x542] sm:$0xff] }
 0x277   : >> { %v3175_v53 = vpop.f32.mrf.mxu1  ;;  %v6095_v39 = vadd.f32 %v3173_v23, %v2869_v0 }
 0x278   : >> { %v2873_v9 = vpop.f32.mrf.mxu0  ;;  %3482 = vmatmul.mubr.f32.gmra.mxu0 %v1019_v10 }
 0x279   : >> { %6454 = vst [vmem:[#allocation6_spill] sm:$0xff] %v6095_v39  ;;  %v3178_v50 = vpop.f32.mrf.mxu1  ;;  %4682 = vmatmul.mubr.f32.gmra.mxu1 %v1222_v16  ;;  %v2874_v47 = vadd.f32 %v2873_v9, %v5759_v38  ;;  %3486 = vmatprep.mubr.f32.mxu0 %v1116_v11 }
 0x27a   : >> { %4684 = vmatprep.mubr.f32.mxu1 %v1223_v22  ;;  %v2875_v57 = vpop.f32.mrf.mxu0 }
 0x27b   : >> { %v3180_v7 = vpop.f32.mrf.mxu1  ;;  %v6100_v29 = vadd.f32 %v3178_v50, %v2874_v47 }
 0x27c   : >> { %v2878_v40 = vpop.f32.mrf.mxu0  ;;  %3487 = vmatmul.mubr.f32.gmra.mxu0 %v1020_v20 }
 0x27d   : >> { %6455 = vst [vmem:[#allocation7_spill] sm:$0xff] %v6100_v29  ;;  %v3183_v53 = vpop.f32.mrf.mxu1  ;;  %4685 = vmatmul.mubr.f32.gmra.mxu1 %v1224_v28  ;;  %v2879_v23 = vadd.f32 %v2878_v40, %v5765_v61 }
 0x27e   : >> { %v2880_v0 = vpop.f32.mrf.mxu0 }
 0x27f   : >> { %v3185_v39 = vpop.f32.mrf.mxu1  ;;  %v6103_v10 = vadd.f32 %v3183_v53, %v2879_v23 }
 0x280   : >> { %v2883_v16 = vpop.f32.mrf.mxu0 }
 0x281   : >> { %6456 = vst [vmem:[#allocation8_spill] sm:$0xff] %v6103_v10  ;;  %v3188_v38 = vpop.f32.mrf.mxu1  ;;  %v2884_v11 = vadd.f32 %v2883_v16, %v5771_v14 }
 0x282   : >> { %v2885_v22 = vpop.f32.mrf.mxu0 }
 0x283   : >> { %v3190_v9 = vpop.f32.mrf.mxu1  ;;  %v6106_v57 = vadd.f32 %v3188_v38, %v2884_v11 }
 0x284   : >> { %v2888_v50 = vpop.f32.mrf.mxu0 }
 0x285   : >> { %v3193_v47 = vpop.f32.mrf.mxu1  ;;  %v2889_v7 = vadd.f32 %v2888_v50, %v5777_v34 }
 0x286   : >> { %v2890_v20 = vpop.f32.mrf.mxu0 }
 0x287   : >> { %v3195_v28 = vpop.f32.mrf.mxu1  ;;  %v6109_v29 = vadd.f32 %v3193_v47, %v2889_v7 }
 0x288   : >> { %v2893_v61 = vpop.f32.mrf.mxu0 }
 0x289   : >> { %v3198_v39 = vpop.f32.mrf.mxu1  ;;  %v2894_v40 = vadd.f32 %v2893_v61, %v5783_v60 }
 0x28a   : >> { %v2895_v53 = vpop.f32.mrf.mxu0 }
 0x28b   : >> { %v3200_v23 = vpop.f32.mrf.mxu1  ;;  %v6112_v0 = vadd.f32 %v3198_v39, %v2894_v40 }
 0x28c   : >> { %v2898_v14 = vpop.f32.mrf.mxu0 }
 0x28d   : >> { %v3203_v16 = vpop.f32.mrf.mxu1  ;;  %v2899_v38 = vadd.f32 %v2898_v14, %v5789_v15 }
 0x28e   : >> { %v2900_v11 = vpop.f32.mrf.mxu0 }
 0x28f   : >> { %v3205_v22 = vpop.f32.mrf.mxu1  ;;  %v6115_v9 = vadd.f32 %v3203_v16, %v2899_v38 }
 0x290   : >> { %v2903_v34 = vpop.f32.mrf.mxu0 }
 0x291   : >> { %v3208_v50 = vpop.f32.mrf.mxu1  ;;  %v2904_v47 = vadd.f32 %v2903_v34, %v5795_v41 }
 0x292   : >> { %v2905_v7 = vpop.f32.mrf.mxu0 }
 0x293   : >> { %v3210_v20 = vpop.f32.mrf.mxu1  ;;  %v6118_v28 = vadd.f32 %v3208_v50, %v2904_v47 }
 0x294   : >> { %v2908_v60 = vpop.f32.mrf.mxu0 }
 0x295   : >> { %v3213_v61 = vpop.f32.mrf.mxu1  ;;  %v2909_v39 = vadd.f32 %v2908_v60, %v5801_v63 }
 0x296   : >> { %v2910_v40 = vpop.f32.mrf.mxu0 }
 0x297   : >> { %v3215_v53 = vpop.f32.mrf.mxu1  ;;  %v6121_v23 = vadd.f32 %v3213_v61, %v2909_v39 }
 0x298   : >> { %v2913_v15 = vpop.f32.mrf.mxu0 }
 0x299   : >> { %v3218_v14 = vpop.f32.mrf.mxu1  ;;  %v2914_v16 = vadd.f32 %v2913_v15, %v5807_v27 }
 0x29a   : >> { %v2915_v38 = vpop.f32.mrf.mxu0 }
 0x29b   : >> { %v3220_v11 = vpop.f32.mrf.mxu1  ;;  %v6124_v22 = vadd.f32 %v3218_v14, %v2914_v16 }
 0x29c   : >> { %v2918_v41 = vpop.f32.mrf.mxu0 }
 0x29d   : >> { %v3223_v34 = vpop.f32.mrf.mxu1  ;;  %v2919_v50 = vadd.f32 %v2918_v41, %v5813_v52 }
 0x29e   : >> { %v2920_v47 = vpop.f32.mrf.mxu0 }
 0x29f   : >> { %v3225_v7 = vpop.f32.mrf.mxu1  ;;  %v3224_v20 = vadd.f32 %v3223_v34, %v2919_v50 }
 0x2a0   : >> { %v2923_v63 = vpop.f32.mrf.mxu0 }
 0x2a1   : >> { %v3228_v60 = vpop.f32.mrf.mxu1  ;;  %v2924_v61 = vadd.f32 %v2923_v63, %v5819_v19 }
 0x2a2   : >> { %v2925_v39 = vpop.f32.mrf.mxu0 }
 0x2a3   : >> { %v3230_v40 = vpop.f32.mrf.mxu1  ;;  %v3229_v53 = vadd.f32 %v3228_v60, %v2924_v61 }
 0x2a4   : >> { %v2928_v10 = vpop.f32.mrf.mxu0 }
 0x2a5   : >> { %v3233_v27 = vpop.f32.mrf.mxu1  ;;  %v2929_v15 = vadd.f32 %v2928_v10, %v5825_v48 }
 0x2a6   : >> { %v2930_v14 = vpop.f32.mrf.mxu0 }
 0x2a7   : >> { %v3235_v16 = vpop.f32.mrf.mxu1  ;;  %v3234_v38 = vadd.f32 %v3233_v27, %v2929_v15 }
 0x2a8   : >> { %v2933_v11 = vpop.f32.mrf.mxu0 }
 0x2a9   : >> { %v3238_v59 = vpop.f32.mrf.mxu1  ;;  %v2934_v52 = vadd.f32 %v2933_v11, %v5831_v12 }
 0x2aa   : >> { %v2935_v41 = vpop.f32.mrf.mxu0 }
 0x2ab   : >> { %v3240_v34 = vpop.f32.mrf.mxu1  ;;  %v3239_v50 = vadd.f32 %v3238_v59, %v2934_v52 }
 0x2ac   : >> { %v2938_v47 = vpop.f32.mrf.mxu0 }
 0x2ad   : >> { %v3243_v7 = vpop.f32.mrf.mxu1  ;;  %v2939_v19 = vadd.f32 %v2938_v47, %v5837_v51 }
 0x2ae   : >> { %v2940_v63 = vpop.f32.mrf.mxu0 }
 0x2af   : >> { %v3245_v60 = vpop.f32.mrf.mxu1  ;;  %v3244_v61 = vadd.f32 %v3243_v7, %v2939_v19 }
 0x2b0   : >> { %v6131_v39 = vpop.f32.mrf.mxu0 }
 0x2b1   : >> { %v3493_v48 = vpop.f32.mrf.mxu1 }
 0x2b2   : >> { %v6134_v10 = vadd.f32 %v3493_v48, %v6106_v57  ;;  %v3315_v40 = vpop.f32.mrf.mxu0 }
 0x2b3   : >> { %v3495_v27 = vpop.f32.mrf.mxu1 }
 0x2b4   : >> { %v3318_v15 = vpop.f32.mrf.mxu0 }
 0x2b5   : >> { %v3498_v12 = vpop.f32.mrf.mxu1 }
 0x2b6   : >> { %v6137_v14 = vadd.f32 %v3498_v12, %v6109_v29  ;;  %v3320_v59 = vpop.f32.mrf.mxu0 }
 0x2b7   : >> { %v3500_v16 = vpop.f32.mrf.mxu1 }
 0x2b8   : >> { %v6139_v11 = vpop.f32.mrf.mxu0 }
 0x2b9   : >> { %v3503_v51 = vpop.f32.mrf.mxu1 }
 0x2ba   : >> { %v6142_v52 = vadd.f32 %v3503_v51, %v6112_v0  ;;  %v3325_v41 = vpop.f32.mrf.mxu0 }
 0x2bb   : >> { %v3505_v34 = vpop.f32.mrf.mxu1 }
 0x2bc   : >> { %6457 = vst [vmem:[#allocation9_spill] sm:$0xff] %v6142_v52  ;;  %v3328_v47 = vpop.f32.mrf.mxu0 }
 0x2bd   : >> { %v3508_v57 = vpop.f32.mrf.mxu1 }
 0x2be   : >> { %v6145_v7 = vadd.f32 %v3508_v57, %v6115_v9  ;;  %v3330_v19 = vpop.f32.mrf.mxu0 }
 0x2bf   : >> { %v3510_v63 = vpop.f32.mrf.mxu1 }
 0x2c0   : >> { %v6147_v60 = vpop.f32.mrf.mxu0 }
 0x2c1   : >> { %v3513_v29 = vpop.f32.mrf.mxu1 }
 0x2c2   : >> { %v6150_v48 = vadd.f32 %v3513_v29, %v6118_v28  ;;  %v3335_v40 = vpop.f32.mrf.mxu0 }
 0x2c3   : >> { %v3515_v27 = vpop.f32.mrf.mxu1 }
 0x2c4   : >> { %6458 = vst [vmem:[#allocation10_spill] sm:$0xff] %v6150_v48  ;;  %v3338_v12 = vpop.f32.mrf.mxu0 }
 0x2c5   : >> { %v3518_v0 = vpop.f32.mrf.mxu1 }
 0x2c6   : >> { %v6153_v59 = vadd.f32 %v3518_v0, %v6121_v23  ;;  %v3340_v16 = vpop.f32.mrf.mxu0 }
 0x2c7   : >> { %v3520_v51 = vpop.f32.mrf.mxu1 }
 0x2c8   : >> { %6459 = vst [vmem:[#allocation11_spill] sm:$0xff] %v6153_v59  ;;  %v6155_v41 = vpop.f32.mrf.mxu0 }
 0x2c9   : >> { %v3523_v9 = vpop.f32.mrf.mxu1 }
 0x2ca   : >> { %v6158_v34 = vadd.f32 %v3523_v9, %v6124_v22  ;;  %v3345_v57 = vpop.f32.mrf.mxu0 }
 0x2cb   : >> { %v3525_v19 = vpop.f32.mrf.mxu1 }
 0x2cc   : >> { %6460 = vst [vmem:[#allocation12_spill] sm:$0xff] %v6158_v34  ;;  %v3348_v63 = vpop.f32.mrf.mxu0 }
 0x2cd   : >> { %v3528_v28 = vpop.f32.mrf.mxu1 }
 0x2ce   : >> { %v6160_v29 = vadd.f32 %v3528_v28, %v3224_v20  ;;  %v3350_v40 = vpop.f32.mrf.mxu0 }
 0x2cf   : >> { %v3530_v27 = vpop.f32.mrf.mxu1 }
 0x2d0   : >> { %6461 = vst [vmem:[#allocation13_spill] sm:$0xff] %v6160_v29  ;;  %v6162_v48 = vpop.f32.mrf.mxu0 }
 0x2d1   : >> { %v3533_v23 = vpop.f32.mrf.mxu1 }
 0x2d2   : >> { %v6164_v0 = vadd.f32 %v3533_v23, %v3229_v53  ;;  %v3355_v16 = vpop.f32.mrf.mxu0 }
 0x2d3   : >> { %v3535_v51 = vpop.f32.mrf.mxu1 }
 0x2d4   : >> { %6462 = vst [vmem:[#allocation14_spill] sm:$0xff] %v6164_v0  ;;  %v6166_v59 = vpop.f32.mrf.mxu0  ;;  %v3319_v0 = vadd.f32 %v3318_v15, %v5858_v21  ;;  %v3324_v21 = vadd.f32 %v6139_v11, %v5867_v32 }
 0x2d5   : >> { %v3538_v52 = vpop.f32.mrf.mxu1 }
 0x2d6   : >> { %v6168_v22 = vadd.f32 %v3538_v52, %v3234_v38  ;;  %v3360_v9 = vpop.f32.mrf.mxu0  ;;  %v1274_v52 = vld [vmem:[#allocation2 + $0xd0] sm:$0xff] }
 0x2d7   : >> { %v3540_v57 = vpop.f32.mrf.mxu1 }
 0x2d8   : >> { %6463 = vst [vmem:[#allocation15_spill] sm:$0xff] %v6168_v22  ;;  %v6170_v19 = vpop.f32.mrf.mxu0  ;;  %v3314_v57 = vadd.f32 %v6131_v39, %v5850_v2  ;;  %v1275_v2 = vld [vmem:[#allocation2 + $0x10] sm:$0xff] }
 0x2d9   : >> { %v3543_v20 = vpop.f32.mrf.mxu1 }
 0x2da   : >> { %v6172_v28 = vadd.f32 %v3543_v20, %v3239_v50  ;;  %v3365_v40 = vpop.f32.mrf.mxu0 }
 0x2db   : >> { %v3545_v27 = vpop.f32.mrf.mxu1  ;;  %v1273_v40 = vld [vmem:[#allocation2 + $0xb0] sm:$0xff] }
 0x2dc   : >> { %6464 = vst [vmem:[#allocation16_spill] sm:$0xff] %v6172_v28  ;;  %v6174_v34 = vpop.f32.mrf.mxu0  ;;  %v3329_v28 = vadd.f32 %v3328_v47, %v5875_v62 }
 0x2dd   : >> { %v3548_v53 = vpop.f32.mrf.mxu1 }
 0x2de   : >> { %v6176_v23 = vadd.f32 %v3548_v53, %v3244_v61  ;;  %v3370_v16 = vpop.f32.mrf.mxu0 }
 0x2df   : >> { %v3550_v51 = vpop.f32.mrf.mxu1  ;;  %v1276_v16 = vld [vmem:[#allocation2 + $0x48] sm:$0xff] }
 0x2e0   : >> { %6465 = vst [vmem:[#allocation17_spill] sm:$0xff] %v6176_v23  ;;  %v6179_v38 = vpop.f32.mrf.mxu0 }
 0x2e1   : >> { %v4617_v9 = vpop.f32.mrf.mxu1 }
 0x2e2   : >> { %v3624_v50 = vadd.f32 %v4617_v9, %v3319_v0  ;;  %v3375_v20 = vpop.f32.mrf.mxu0  ;;  %v3339_v0 = vadd.f32 %v3338_v12, %v5892_v36 }
 0x2e3   : >> { %v3618_v27 = vpop.f32.mrf.mxu1  ;;  %v3349_v20 = vadd.f32 %v3348_v63, %v5908_v46 }
 0x2e4   : >> { %v3858_v22 = vadd.f32 %v3624_v50, %v1274_v52  ;;  %v3619_v61 = vadd.f32 %v3618_v27, %v3314_v57  ;;  %v6184_v53 = vpop.f32.mrf.mxu0  ;;  %v1278_v52 = vld [vmem:[#allocation2 + $0x128] sm:$0xff]  ;;  %v3334_v50 = vadd.f32 %v6147_v60, %v5883_v49 }
 0x2e5   : >> { %v4620_v51 = vpop.f32.mrf.mxu1 }
 0x2e6   : >> { %3906 = vst [vmem:[#allocation2 + $0xd0] sm:$0xff] %v3858_v22  ;;  %v3857_v15 = vadd.f32 %v3619_v61, %v1273_v40  ;;  %v3634_v23 = vadd.f32 %v4620_v51, %v3329_v28  ;;  %v3380_v29 = vpop.f32.mrf.mxu0  ;;  %v1277_v28 = vld [vmem:[#allocation2 + $0x160] sm:$0xff]  ;;  %v1280_v40 = vld [vmem:[#allocation2 + $0x178] sm:$0xff]  ;;  %v3344_v61 = vadd.f32 %v6155_v41, %v5900_v33 }
 0x2e7   : >> { %v3628_v39 = vpop.f32.mrf.mxu1  ;;  %v1279_v51 = vld [vmem:[#allocation2 + $0x40] sm:$0xff] }
 0x2e8   : >> { %3905 = vst [vmem:[#allocation2 + $0xb0] sm:$0xff] %v3857_v15  ;;  %v3860_v9 = vadd.f32 %v3634_v23, %v1276_v16  ;;  %v3629_v62 = vadd.f32 %v3628_v39, %v3324_v21  ;;  %v6189_v47 = vpop.f32.mrf.mxu0  ;;  %v3359_v15 = vadd.f32 %v6166_v59, %v5925_v25  ;;  %v1282_v39 = vld [vmem:[#allocation2 + $0x110] sm:$0xff] }
 0x2e9   : >> { %v4623_v57 = vpop.f32.mrf.mxu1 }
 0x2ea   : >> { %3908 = vst [vmem:[#allocation2 + $0x48] sm:$0xff] %v3860_v9  ;;  %v3859_v32 = vadd.f32 %v3629_v62, %v1275_v2  ;;  %v3644_v11 = vadd.f32 %v4623_v57, %v3339_v0  ;;  %v3385_v22 = vpop.f32.mrf.mxu0  ;;  %v3354_v9 = vadd.f32 %v6162_v48, %v5917_v3 }
 0x2eb   : >> { %v3638_v29 = vpop.f32.mrf.mxu1 }
 0x2ec   : >> { %3907 = vst [vmem:[#allocation2 + $0x10] sm:$0xff] %v3859_v32  ;;  %v3862_v36 = vadd.f32 %v3644_v11, %v1278_v52  ;;  %v3639_v12 = vadd.f32 %v3638_v29, %v3334_v50  ;;  %v3388_v23 = vpop.f32.mrf.mxu0  ;;  %v1281_v52 = vld [vmem:[#allocation2 + $0x108] sm:$0xff]  ;;  %v3369_v50 = vadd.f32 %v6174_v34, %v5941_v26  ;;  %v1284_v11 = vld [vmem:[#allocation2 + $0x118] sm:$0xff] }
 0x2ed   : >> { %v4626_v27 = vpop.f32.mrf.mxu1 }
 0x2ee   : >> { %3910 = vst [vmem:[#allocation2 + $0x128] sm:$0xff] %v3862_v36  ;;  %v3861_v16 = vadd.f32 %v3639_v12, %v1277_v28  ;;  %v3654_v49 = vadd.f32 %v4626_v27, %v3349_v20  ;;  %v3390_v60 = vpop.f32.mrf.mxu0  ;;  %v3364_v28 = vadd.f32 %v6170_v19, %v5933_v13  ;;  %v1283_v20 = vld [vmem:[#allocation2 + $0x90] sm:$0xff]  ;;  %v3379_v12 = vadd.f32 %v6184_v53, %v5955_v45  ;;  %v1286_v27 = vld [vmem:[#allocation2 + $0x100] sm:$0xff] }
 0x2ef   : >> { %v3648_v21 = vpop.f32.mrf.mxu1  ;;  %v1285_v60 = vld [vmem:[#allocation2 + $0x148] sm:$0xff] }
 0x2f0   : >> { %3909 = vst [vmem:[#allocation2 + $0x160] sm:$0xff] %v3861_v16  ;;  %v3864_v46 = vadd.f32 %v3654_v49, %v1280_v40  ;;  %v3649_v63 = vadd.f32 %v3648_v21, %v3344_v61  ;;  %v3393_v2 = vpop.f32.mrf.mxu0  ;;  %v3374_v16 = vadd.f32 %v6179_v38, %v5948_v56  ;;  %v3389_v21 = vadd.f32 %v3388_v23, %v5969_v37 }
 0x2f1   : >> { %v4629_v0 = vpop.f32.mrf.mxu1 }
 0x2f2   : >> { %3912 = vst [vmem:[#allocation2 + $0x178] sm:$0xff] %v3864_v46  ;;  %v3863_v33 = vadd.f32 %v3649_v63, %v1279_v51  ;;  %v3664_v41 = vadd.f32 %v4629_v0, %v3359_v15  ;;  %v3395_v62 = vpop.f32.mrf.mxu0  ;;  %v1288_v46 = vld [vmem:[#allocation2 + $0xd8] sm:$0xff] }
 0x2f3   : >> { %v3658_v57 = vpop.f32.mrf.mxu1 }
 0x2f4   : >> { %3911 = vst [vmem:[#allocation2 + $0x40] sm:$0xff] %v3863_v33  ;;  %v3866_v25 = vadd.f32 %v3664_v41, %v1282_v39  ;;  %v3659_v59 = vadd.f32 %v3658_v57, %v3354_v9  ;;  %v3398_v32 = vpop.f32.mrf.mxu0  ;;  %v3384_v39 = vadd.f32 %v6189_v47, %v5962_v55  ;;  %v1287_v9 = vld [vmem:[#allocation2 + $0x58] sm:$0xff]  ;;  %v1289_v47 = vld [vmem:[#allocation2 + $0x80] sm:$0xff] }
 0x2f5   : >> { %v4632_v22 = vpop.f32.mrf.mxu1  ;;  %v3399_v41 = vadd.f32 %v3398_v32, %v5983_v24  ;;  %v1292_v32 = vld [vmem:[#allocation2 + $0x120] sm:$0xff] }
 0x2f6   : >> { %3914 = vst [vmem:[#allocation2 + $0x110] sm:$0xff] %v3866_v25  ;;  %v3865_v3 = vadd.f32 %v3659_v59, %v1281_v52  ;;  %v3674_v48 = vadd.f32 %v4632_v22, %v3369_v50  ;;  %v3400_v29 = vpop.f32.mrf.mxu0  ;;  %v1290_v52 = vld [vmem:[#allocation2 + $0x130] sm:$0xff]  ;;  %v3394_v50 = vadd.f32 %v3393_v2, %v5976_v5  ;;  %v1291_v2 = vld [vmem:[#allocation2 + $0x138] sm:$0xff] }
 0x2f7   : >> { %v3668_v36 = vpop.f32.mrf.mxu1 }
 0x2f8   : >> { %3913 = vst [vmem:[#allocation2 + $0x108] sm:$0xff] %v3865_v3  ;;  %v3868_v26 = vadd.f32 %v3674_v48, %v1284_v11  ;;  %v3669_v34 = vadd.f32 %v3668_v36, %v3364_v28  ;;  %v3403_v40 = vpop.f32.mrf.mxu0 }
 0x2f9   : >> { %v4635_v61 = vpop.f32.mrf.mxu1  ;;  %v3404_v29 = vadd.f32 %v3403_v40, %v5990_v43  ;;  %v1293_v40 = vld [vmem:[#allocation2 + $0xe0] sm:$0xff] }
 0x2fa   : >> { %3916 = vst [vmem:[#allocation2 + $0x118] sm:$0xff] %v3868_v26  ;;  %v3867_v13 = vadd.f32 %v3669_v34, %v1283_v20  ;;  %v3684_v19 = vadd.f32 %v4635_v61, %v3379_v12  ;;  %v3405_v49 = vpop.f32.mrf.mxu0  ;;  %v1294_v61 = vld [vmem:[#allocation2 + $0xa8] sm:$0xff] }
 0x2fb   : >> { %v3678_v51 = vpop.f32.mrf.mxu1 }
 0x2fc   : >> { %3915 = vst [vmem:[#allocation2 + $0x90] sm:$0xff] %v3867_v13  ;;  %v3870_v15 = vadd.f32 %v3684_v19, %v1286_v27  ;;  %v3679_v45 = vadd.f32 %v3678_v51, %v3374_v16  ;;  %v3408_v53 = vpop.f32.mrf.mxu0 }
 0x2fd   : >> { %v4638_v63 = vpop.f32.mrf.mxu1  ;;  %v3409_v22 = vadd.f32 %v3408_v53, %v5997_v1 }
 0x2fe   : >> { %3918 = vst [vmem:[#allocation2 + $0x100] sm:$0xff] %v3870_v15  ;;  %v3869_v0 = vadd.f32 %v3679_v45, %v1285_v60  ;;  %v3694_v56 = vadd.f32 %v4638_v63, %v3389_v21  ;;  %v3410_v38 = vpop.f32.mrf.mxu0  ;;  %v1296_v63 = vld [vmem:[#allocation2 + $0x168] sm:$0xff] }
 0x2ff   : >> { %v3688_v33 = vpop.f32.mrf.mxu1 }
 0x300   : >> { %3917 = vst [vmem:[#allocation2 + $0x148] sm:$0xff] %v3869_v0  ;;  %v3872_v62 = vadd.f32 %v3694_v56, %v1288_v46  ;;  %v3689_v37 = vadd.f32 %v3688_v33, %v3384_v39  ;;  %v3413_v23 = vpop.f32.mrf.mxu0 }
 0x301   : >> { %v4641_v57 = vpop.f32.mrf.mxu1  ;;  %v3414_v13 = vadd.f32 %v3413_v23, %v6004_v8  ;;  %v1295_v8 = vld [vmem:[#allocation2 + $0xb8] sm:$0xff] }
 0x302   : >> { %3920 = vst [vmem:[#allocation2 + $0xd8] sm:$0xff] %v3872_v62  ;;  %v3871_v25 = vadd.f32 %v3689_v37, %v1287_v9  ;;  %v3704_v59 = vadd.f32 %v4641_v57, %v3399_v41  ;;  %v3415_v55 = vpop.f32.mrf.mxu0 }
 0x303   : >> { %v3698_v11 = vpop.f32.mrf.mxu1  ;;  %v1298_v55 = vld [vmem:[#allocation2 + $0xf8] sm:$0xff] }
 0x304   : >> { %3919 = vst [vmem:[#allocation2 + $0x58] sm:$0xff] %v3871_v25  ;;  %v3874_v28 = vadd.f32 %v3704_v59, %v1290_v52  ;;  %v3699_v3 = vadd.f32 %v3698_v11, %v3394_v50  ;;  %v3418_v24 = vpop.f32.mrf.mxu0  ;;  %v1297_v52 = vld [vmem:[#allocation2 + $0xe8] sm:$0xff] }
 0x305   : >> { %v4644_v48 = vpop.f32.mrf.mxu1  ;;  %v3419_v26 = vadd.f32 %v3418_v24, %v6011_v35 }
 0x306   : >> { %3922 = vst [vmem:[#allocation2 + $0x130] sm:$0xff] %v3874_v28  ;;  %v3873_v20 = vadd.f32 %v3699_v3, %v1289_v47  ;;  %v3714_v36 = vadd.f32 %v4644_v48, %v3409_v22  ;;  %v3420_v5 = vpop.f32.mrf.mxu0 }
 0x307   : >> { %v3708_v12 = vpop.f32.mrf.mxu1 }
 0x308   : >> { %3921 = vst [vmem:[#allocation2 + $0x80] sm:$0xff] %v3873_v20  ;;  %v3876_v34 = vadd.f32 %v3714_v36, %v1292_v32  ;;  %v3709_v27 = vadd.f32 %v3708_v12, %v3404_v29  ;;  %v3423_v1 = vpop.f32.mrf.mxu0  ;;  %v1299_v32 = vld [vmem:[#allocation2 + $0x20] sm:$0xff]  ;;  %v1300_v12 = vld [vmem:[#allocation2 + $0x88] sm:$0xff] }
 0x309   : >> { %v4647_v16 = vpop.f32.mrf.mxu1  ;;  %v3424_v35 = vadd.f32 %v3423_v1, %v6018_v58 }
 0x30a   : >> { %3924 = vst [vmem:[#allocation2 + $0x120] sm:$0xff] %v3876_v34  ;;  %v3875_v19 = vadd.f32 %v3709_v27, %v1291_v2  ;;  %v3724_v49 = vadd.f32 %v4647_v16, %v3419_v26  ;;  %v3425_v43 = vpop.f32.mrf.mxu0 }
 0x30b   : >> { %v3718_v60 = vpop.f32.mrf.mxu1 }
 0x30c   : >> { %3923 = vst [vmem:[#allocation2 + $0x138] sm:$0xff] %v3875_v19  ;;  %v3878_v51 = vadd.f32 %v3724_v49, %v1294_v61  ;;  %v3719_v21 = vadd.f32 %v3718_v60, %v3414_v13  ;;  %v3428_v15 = vpop.f32.mrf.mxu0  ;;  %v1301_v13 = vld [vmem:[#allocation2 + $0xa0] sm:$0xff] }
 0x30d   : >> { %v4650_v45 = vpop.f32.mrf.mxu1  ;;  %v3429_v46 = vadd.f32 %v3428_v15, %v6025_v6 }
 0x30e   : >> { %3926 = vst [vmem:[#allocation2 + $0xa8] sm:$0xff] %v3878_v51  ;;  %v3877_v53 = vadd.f32 %v3719_v21, %v1293_v40  ;;  %v3430_v39 = vpop.f32.mrf.mxu0  ;;  %v1302_v21 = vld [vmem:[#allocation2 + $0x170] sm:$0xff] }
 0x30f   : >> { %v3728_v0 = vpop.f32.mrf.mxu1  ;;  %v3734_v56 = vadd.f32 %v4650_v45, %v3429_v46  ;;  %v1310_v46 = vld [vmem:[#allocation2 + $0x18] sm:$0xff] }
 0x310   : >> { %3925 = vst [vmem:[#allocation2 + $0xe0] sm:$0xff] %v3877_v53  ;;  %v3729_v38 = vadd.f32 %v3728_v0, %v3424_v35  ;;  %v3433_v9 = vpop.f32.mrf.mxu0  ;;  %v1303_v0 = vld [vmem:[#allocation2 + $0xf0] sm:$0xff] }
 0x311   : >> { %v4653_v33 = vpop.f32.mrf.mxu1  ;;  %v3880_v41 = vadd.f32 %v3734_v56, %v1296_v63  ;;  %v3434_v37 = vadd.f32 %v3433_v9, %v6032_v18 }
 0x312   : >> { %v3879_v62 = vadd.f32 %v3729_v38, %v1295_v8  ;;  %v3435_v23 = vpop.f32.mrf.mxu0  ;;  %v1309_v38 = vld [vmem:[#allocation2 + $0xc0] sm:$0xff] }
 0x313   : >> { %v3738_v58 = vpop.f32.mrf.mxu1  ;;  %3928 = vst [vmem:[#allocation2 + $0x168] sm:$0xff] %v3880_v41 }
 0x314   : >> { %3927 = vst [vmem:[#allocation2 + $0xb8] sm:$0xff] %v3879_v62  ;;  %v3739_v57 = vadd.f32 %v3738_v58, %v3434_v37  ;;  %v3438_v6 = vpop.f32.mrf.mxu0  ;;  %v1312_v37 = vld [vmem:[#allocation2 + $0x8] sm:$0xff] }
 0x315   : >> { %v4656_v50 = vpop.f32.mrf.mxu1  ;;  %v3439_v59 = vadd.f32 %v3438_v6, %v6039_v30 }
 0x316   : >> { %v3881_v25 = vadd.f32 %v3739_v57, %v1297_v52  ;;  %v3440_v47 = vpop.f32.mrf.mxu0 }
 0x317   : >> { %v3748_v11 = vpop.f32.mrf.mxu1  ;;  %v3744_v22 = vadd.f32 %v4653_v33, %v3439_v59  ;;  %v6466_v47 = vld [vmem:[#allocation9_spill] sm:$0xff] }
 0x318   : >> { %3929 = vst [vmem:[#allocation2 + $0xe8] sm:$0xff] %v3881_v25  ;;  %v3443_v28 = vpop.f32.mrf.mxu0 }
 0x319   : >> { %v4659_v3 = vpop.f32.mrf.mxu1  ;;  %v3882_v24 = vadd.f32 %v3744_v22, %v1298_v55  ;;  %v3444_v18 = vadd.f32 %v3443_v28, %v6046_v42  ;;  %v1314_v22 = vld [vmem:[#allocation2 + $0x78] sm:$0xff] }
 0x31a   : >> { %v3445_v48 = vpop.f32.mrf.mxu0 }
 0x31b   : >> { %v3758_v29 = vpop.f32.mrf.mxu1  ;;  %3930 = vst [vmem:[#allocation2 + $0xf8] sm:$0xff] %v3882_v24  ;;  %v3749_v20 = vadd.f32 %v3748_v11, %v3444_v18  ;;  %v6467_v18 = vld [vmem:[#allocation5_spill] sm:$0xff] }
 0x31c   : >> { %v3448_v36 = vpop.f32.mrf.mxu0  ;;  %v1305_v48 = vld [vmem:[#allocation2 + $0x60] sm:$0xff] }
 0x31d   : >> { %v4662_v5 = vpop.f32.mrf.mxu1  ;;  %v3883_v2 = vadd.f32 %v3749_v20, %v1299_v32  ;;  %v3449_v30 = vadd.f32 %v3448_v36, %v6053_v54  ;;  %v6468_v32 = vld [vmem:[#allocation11_spill] sm:$0xff]  ;;  %v1313_v20 = vld [vmem:[#allocation2] sm:$0xff] }
 0x31e   : >> { %v3450_v26 = vpop.f32.mrf.mxu0 }
 0x31f   : >> { %v3768_v34 = vpop.f32.mrf.mxu1  ;;  %3931 = vst [vmem:[#allocation2 + $0x20] sm:$0xff] %v3883_v2  ;;  %v3754_v27 = vadd.f32 %v4656_v50, %v3449_v30  ;;  %v1311_v50 = vld [vmem:[#allocation2 + $0x98] sm:$0xff]  ;;  %v6469_v30 = vld [vmem:[#allocation10_spill] sm:$0xff] }
 0x320   : >> { %v3453_v1 = vpop.f32.mrf.mxu0 }
 0x321   : >> { %v6223_v61 = vpop.f32.mrf.mxu1  ;;  %v3884_v16 = vadd.f32 %v3754_v27, %v1300_v12  ;;  %v3454_v42 = vadd.f32 %v3453_v1, %v6060_v4 }
 0x322   : >> { %v3455_v19 = vpop.f32.mrf.mxu0 }
 0x323   : >> { %v3778_v49 = vpop.f32.mrf.mxu1  ;;  %3932 = vst [vmem:[#allocation2 + $0x88] sm:$0xff] %v3884_v16  ;;  %v3759_v43 = vadd.f32 %v3758_v29, %v3454_v42  ;;  %v6470_v42 = vld [vmem:[#allocation6_spill] sm:$0xff]  ;;  %v6471_v19 = vld [vmem:[#allocation13_spill] sm:$0xff] }
 0x324   : >> { %v3458_v40 = vpop.f32.mrf.mxu0 }
 0x325   : >> { %v6226_v60 = vpop.f32.mrf.mxu1  ;;  %v3885_v54 = vadd.f32 %v3759_v43, %v1301_v13  ;;  %v3459_v51 = vadd.f32 %v3458_v40, %v6067_v17  ;;  %v1306_v40 = vld [vmem:[#allocation2 + $0xc8] sm:$0xff] }
 0x326   : >> { %v3460_v15 = vpop.f32.mrf.mxu0 }
 0x327   : >> { %v6229_v45 = vpop.f32.mrf.mxu1  ;;  %3933 = vst [vmem:[#allocation2 + $0xa0] sm:$0xff] %v3885_v54  ;;  %v3764_v35 = vadd.f32 %v4659_v3, %v3459_v51  ;;  %v1315_v51 = vld [vmem:[#allocation2 + $0x50] sm:$0xff] }
 0x328   : >> { %v3463_v53 = vpop.f32.mrf.mxu0 }
 0x329   : >> { %v4671_v4 = vpop.f32.mrf.mxu1  ;;  %v3886_v63 = vadd.f32 %v3764_v35, %v1302_v21  ;;  %v3464_v39 = vadd.f32 %v3463_v53, %v6074_v31  ;;  %v6472_v35 = vld [vmem:[#allocation12_spill] sm:$0xff] }
 0x32a   : >> { %v3804_v8 = vadd.f32 %v4671_v4, %v6137_v14  ;;  %v3465_v56 = vpop.f32.mrf.mxu0  ;;  %v1304_v14 = vld [vmem:[#allocation2 + $0x140] sm:$0xff]  ;;  %v1318_v4 = vld [vmem:[#allocation2 + $0x30] sm:$0xff] }
 0x32b   : >> { %v3798_v9 = vpop.f32.mrf.mxu1  ;;  %3934 = vst [vmem:[#allocation2 + $0x170] sm:$0xff] %v3886_v63  ;;  %v3769_v17 = vadd.f32 %v3768_v34, %v3464_v39  ;;  %v1316_v34 = vld [vmem:[#allocation2 + $0x68] sm:$0xff] }
 0x32c   : >> { %v3894_v33 = vadd.f32 %v3804_v8, %v1310_v46  ;;  %v3799_v41 = vadd.f32 %v3798_v9, %v6134_v10  ;;  %v3468_v62 = vpop.f32.mrf.mxu0 }
 0x32d   : >> { %v4674_v23 = vpop.f32.mrf.mxu1  ;;  %v3887_v52 = vadd.f32 %v3769_v17, %v1303_v0  ;;  %v3469_v57 = vadd.f32 %v3468_v62, %v6081_v44  ;;  %v6473_v0 = vld [vmem:[#allocation7_spill] sm:$0xff]  ;;  %v1307_v17 = vld [vmem:[#allocation2 + $0x28] sm:$0xff] }
 0x32e   : >> { %3942 = vst [vmem:[#allocation2 + $0x18] sm:$0xff] %v3894_v33  ;;  %v3893_v58 = vadd.f32 %v3799_v41, %v1309_v38  ;;  %v3814_v31 = vadd.f32 %v4674_v23, %v6145_v7  ;;  %v3470_v6 = vpop.f32.mrf.mxu0  ;;  %v6474_v38 = vld [vmem:[#allocation15_spill] sm:$0xff]  ;;  %v6475_v23 = vld [vmem:[#allocation14_spill] sm:$0xff] }
 0x32f   : >> { %v3808_v25 = vpop.f32.mrf.mxu1  ;;  %3935 = vst [vmem:[#allocation2 + $0xf0] sm:$0xff] %v3887_v52  ;;  %v3774_v59 = vadd.f32 %v4662_v5, %v3469_v57  ;;  %v1317_v41 = vld [vmem:[#allocation2 + $0x70] sm:$0xff] }
 0x330   : >> { %3941 = vst [vmem:[#allocation2 + $0xc0] sm:$0xff] %v3893_v58  ;;  %v3896_v55 = vadd.f32 %v3814_v31, %v1312_v37  ;;  %v3809_v10 = vadd.f32 %v3808_v25, %v6466_v47  ;;  %v3473_v11 = vpop.f32.mrf.mxu0  ;;  %v1320_v57 = vld [vmem:[#allocation2 + $0x150] sm:$0xff]  ;;  %v1308_v47 = vld [vmem:[#allocation2 + $0x38] sm:$0xff] }
 0x331   : >> { %v4677_v28 = vpop.f32.mrf.mxu1  ;;  %v3888_v3 = vadd.f32 %v3774_v59, %v1304_v14  ;;  %v3474_v44 = vadd.f32 %v3473_v11, %v6467_v18  ;;  %v6477_v59 = vld [vmem:[#allocation17_spill] sm:$0xff]  ;;  %v1319_v11 = vld [vmem:[#allocation2 + $0x158] sm:$0xff] }
 0x332   : >> { %3944 = vst [vmem:[#allocation2 + $0x8] sm:$0xff] %v3896_v55  ;;  %v3895_v24 = vadd.f32 %v3809_v10, %v1311_v50  ;;  %v3824_v7 = vadd.f32 %v4677_v28, %v6468_v32  ;;  %v3475_v29 = vpop.f32.mrf.mxu0  ;;  %v6476_v50 = vld [vmem:[#allocation8_spill] sm:$0xff]  ;;  %v3953_v32 = vld [vmem:[#allocation2 + $0xb0] sm:$0xff] (%p210_p10) }
 0x333   : >> { %v3818_v36 = vpop.f32.mrf.mxu1  ;;  %3936 = vst [vmem:[#allocation2 + $0x140] sm:$0xff] %v3888_v3  ;;  %v3779_v5 = vadd.f32 %v3778_v49, %v3474_v44  ;;  %v6478_v3 = vld [vmem:[#allocation16_spill] sm:$0xff]  ;;  %vm4001_vm0 = vcmp.gt.f32.partialorder (%p210_p10), %v3953_v32, 0.0 }
 0x334   : >> { %3943 = vst [vmem:[#allocation2 + $0x98] sm:$0xff] %v3895_v24  ;;  %v3898_v2 = vadd.f32 %v3824_v7, %v1314_v22  ;;  %v3819_v12 = vadd.f32 %v3818_v36, %v6469_v30  ;;  %v3478_v26 = vpop.f32.mrf.mxu0  ;;  %v3954_v7 = vld [vmem:[#allocation2 + $0xd0] sm:$0xff] (%p210_p10)  ;;  %v3956_v36 = vld [vmem:[#allocation2 + $0x48] sm:$0xff] (%p210_p10) }
 0x335   : >> { %v4680_v27 = vpop.f32.mrf.mxu1  ;;  %v3889_v1 = vadd.f32 %v3779_v5, %v1305_v48  ;;  %v3479_v13 = vadd.f32 %v3478_v26, %v6470_v42  ;;  %v3955_v48 = vld [vmem:[#allocation2 + $0x10] sm:$0xff] (%p210_p10)  ;;  %vm4002_vm1 = vcmp.gt.f32.partialorder (%p210_p10), %v3954_v7, 0.0  ;;  %v4050_v29 = vmul.f32 (%p210_p10), -0.4, %v3954_v7  ;;  %v3957_v5 = vld [vmem:[#allocation2 + $0x160] sm:$0xff] (%p210_p10) }
 0x336   : >> { %3946 = vst [vmem:[#allocation2 + $0x78] sm:$0xff] %v3898_v2  ;;  %v3897_v16 = vadd.f32 %v3819_v12, %v1313_v20  ;;  %v3834_v43 = vadd.f32 %v4680_v27, %v6471_v19  ;;  %v3480_v54 = vpop.f32.mrf.mxu0  ;;  %vm4003_vm2 = vcmp.gt.f32.partialorder (%p210_p10), %v3955_v48, 0.0  ;;  %v4051_v20 = vmul.f32 (%p210_p10), -0.4, %v3955_v48  ;;  %v3958_v2 = vld [vmem:[#allocation2 + $0x128] sm:$0xff] (%p210_p10)  ;;  %v3960_v27 = vld [vmem:[#allocation2 + $0x178] sm:$0xff] (%p210_p10) }
 0x337   : >> { %v3828_v21 = vpop.f32.mrf.mxu1  ;;  %3937 = vst [vmem:[#allocation2 + $0x60] sm:$0xff] %v3889_v1  ;;  %v3784_v49 = vadd.f32 %v6223_v61, %v3479_v13  ;;  %v4098_v12 = vsel (%p210_p10), %vm4002_vm1, %v3954_v7, %v4050_v29  ;;  %vm4004_vm3 = vcmp.gt.f32.partialorder (%p210_p10), %v3956_v36, 0.0  ;;  %v4052_v26 = vmul.f32 (%p210_p10), -0.4, %v3956_v36  ;;  %v3961_v1 = vld [vmem:[#allocation2 + $0x108] sm:$0xff] (%p210_p10)  ;;  %v3962_v13 = vld [vmem:[#allocation2 + $0x110] sm:$0xff] (%p210_p10) }
 0x338   : >> { %3945 = vst [vmem:[#allocation2] sm:$0xff] %v3897_v16  ;;  %v3900_v15 = vadd.f32 %v3834_v43, %v1316_v34  ;;  %v3829_v53 = vadd.f32 %v3828_v21, %v6472_v35  ;;  %v3483_v46 = vpop.f32.mrf.mxu0  ;;  %v3959_v34 = vld [vmem:[#allocation2 + $0x40] sm:$0xff] (%p210_p10)  ;;  %4146 = vst [vmem:[%s4982_s6 + $0x8] sm:$0xff] (%p210_p10), %v4098_v12  ;;  %v4099_v16 = vsel (%p210_p10), %vm4003_vm2, %v3955_v48, %v4051_v20  ;;  %vm4005_vm4 = vcmp.gt.f32.partialorder (%p210_p10), %v3957_v5, 0.0  ;;  %v3963_v54 = vld [vmem:[#allocation2 + $0x90] sm:$0xff] (%p210_p10) }
 0x339   : >> { %v4683_v63 = vpop.f32.mrf.mxu1  ;;  %v3890_v39 = vadd.f32 %v3784_v49, %v1306_v40  ;;  %v3484_v56 = vadd.f32 %v3483_v46, %v6473_v0  ;;  %v4053_v42 = vmul.f32 (%p210_p10), -0.4, %v3957_v5  ;;  %vm4006_vm5 = vcmp.gt.f32.partialorder (%p210_p10), %v3958_v2, 0.0  ;;  %4147 = vst [vmem:[%s4982_s6 + $0x10] sm:$0xff] (%p210_p10), %v4099_v16  ;;  %v3964_v49 = vld [vmem:[#allocation2 + $0x118] sm:$0xff] (%p210_p10)  ;;  %v3979_v20 = vld [vmem:[#allocation2 + $0x20] sm:$0xff] (%p210_p10) }
 0x33a   : >> { %3948 = vst [vmem:[#allocation2 + $0x68] sm:$0xff] %v3900_v15  ;;  %v3899_v8 = vadd.f32 %v3829_v53, %v1315_v51  ;;  %v3844_v9 = vadd.f32 %v4683_v63, %v6474_v38  ;;  %v3485_v33 = vpop.f32.mrf.mxu0  ;;  %v4100_v19 = vsel (%p210_p10), %vm4004_vm3, %v3956_v36, %v4052_v26  ;;  %v4054_v43 = vmul.f32 (%p210_p10), -0.4, %v3958_v2  ;;  %v3965_v15 = vld [vmem:[#allocation2 + $0x148] sm:$0xff] (%p210_p10)  ;;  %v3967_v0 = vld [vmem:[#allocation2 + $0x58] sm:$0xff] (%p210_p10) }
 0x33b   : >> { %v3838_v62 = vpop.f32.mrf.mxu1  ;;  %3938 = vst [vmem:[#allocation2 + $0xc8] sm:$0xff] %v3890_v39  ;;  %v3789_v61 = vadd.f32 %v6229_v45, %v3484_v56  ;;  %vm4007_vm6 = vcmp.gt.f32.partialorder (%p210_p10), %v3959_v34, 0.0  ;;  %v4055_v40 = vmul.f32 (%p210_p10), -0.4, %v3959_v34  ;;  %4148 = vst [vmem:[%s4982_s6 + $0x18] sm:$0xff] (%p210_p10), %v4100_v19  ;;  %v4101_v51 = vsel (%p210_p10), %vm4005_vm4, %v3957_v5, %v4053_v42  ;;  %v3978_v7 = vld [vmem:[#allocation2 + $0xf8] sm:$0xff] (%p210_p10) }
 0x33c   : >> { %3947 = vst [vmem:[#allocation2 + $0x50] sm:$0xff] %v3899_v8  ;;  %v3902_v37 = vadd.f32 %v3844_v9, %v1318_v4  ;;  %v3839_v52 = vadd.f32 %v3838_v62, %v6475_v23  ;;  %v3488_v58 = vpop.f32.mrf.mxu0  ;;  %vm4008_vm7 = vcmp.gt.f32.partialorder (%p210_p10), %v3960_v27, 0.0  ;;  %v4056_v21 = vmul.f32 (%p210_p10), -0.4, %v3960_v27  ;;  %4149 = vst [vmem:[%s4982_s6 + $0x20] sm:$0xff] (%p210_p10), %v4101_v51  ;;  %v3966_v4 = vld [vmem:[#allocation2 + $0x100] sm:$0xff] (%p210_p10) }
 0x33d   : >> { %v4686_v31 = vpop.f32.mrf.mxu1  ;;  %v3891_v14 = vadd.f32 %v3789_v61, %v1307_v17  ;;  %v3489_v25 = vadd.f32 %v3488_v58, %v6476_v50  ;;  %vm4009_vm8 = vcmp.gt.f32.partialorder (%p210_p10), %v3961_v1, 0.0  ;;  %v4102_v35 = vsel (%p210_p10), %vm4006_vm5, %v3958_v2, %v4054_v43  ;;  %v3968_v9 = vld [vmem:[#allocation2 + $0xd8] sm:$0xff] (%p210_p10)  ;;  %v3969_v17 = vld [vmem:[#allocation2 + $0x80] sm:$0xff] (%p210_p10)  ;;  %v3970_v61 = vld [vmem:[#allocation2 + $0x130] sm:$0xff] (%p210_p10) }
 0x33e   : >> { %3950 = vst [vmem:[#allocation2 + $0x30] sm:$0xff] %v3902_v37  ;;  %v3901_v6 = vadd.f32 %v3839_v52, %v1317_v41  ;;  %v3854_v55 = vadd.f32 %v4686_v31, %v6477_v59  ;;  %v3490_v10 = vpop.f32.mrf.mxu0  ;;  %v4103_v53 = vsel (%p210_p10), %vm4007_vm6, %v3959_v34, %v4055_v40  ;;  %v4057_v46 = vmul.f32 (%p210_p10), -0.4, %v3961_v1  ;;  %4150 = vst [vmem:[%s4982_s6 + $0x28] sm:$0xff] (%p210_p10), %v4102_v35  ;;  %v3971_v58 = vld [vmem:[#allocation2 + $0x138] sm:$0xff] (%p210_p10)  ;;  %v3980_v2 = vld [vmem:[#allocation2 + $0x88] sm:$0xff] (%p210_p10) }
 0x33f   : >> { %v3848_v22 = vpop.f32.mrf.mxu1  ;;  %3939 = vst [vmem:[#allocation2 + $0x28] sm:$0xff] %v3891_v14  ;;  %v3794_v45 = vadd.f32 %v6226_v60, %v3489_v25  ;;  %v4049_v60 = vmul.f32 (%p210_p10), -0.4, %v3953_v32  ;;  %vm4010_vm9 = vcmp.gt.f32.partialorder (%p210_p10), %v3962_v13, 0.0  ;;  %4151 = vst [vmem:[%s4982_s6 + $0x30] sm:$0xff] (%p210_p10), %v4103_v53  ;;  %v4104_v63 = vsel (%p210_p10), %vm4008_vm7, %v3960_v27, %v4056_v21  ;;  %v3972_v14 = vld [vmem:[#allocation2 + $0x120] sm:$0xff] (%p210_p10) }
 0x340   : >> { %3949 = vst [vmem:[#allocation2 + $0x70] sm:$0xff] %v3901_v6  ;;  %v3904_v28 = vadd.f32 %v3854_v55, %v1320_v57  ;;  %v3849_v24 = vadd.f32 %v3848_v22, %v6478_v3  ;;  %212 = sbr.rel (!%p210_p10) target bundleno = 44 (0x2c), region = 105  ;;  %v4058_v39 = vmul.f32 (%p210_p10), -0.4, %v3962_v13  ;;  %vm4011_vm10 = vcmp.gt.f32.partialorder (%p210_p10), %v3963_v54, 0.0  ;;  %4152 = vst [vmem:[%s4982_s6 + $0x38] sm:$0xff] (%p210_p10), %v4104_v63 }
 0x341   : >> { %v3892_v18 = vadd.f32 %v3794_v45, %v1308_v47  ;;  %v4097_v30 = vsel (%p210_p10), %vm4001_vm0, %v3953_v32, %v4049_v60  ;;  %v4059_v8 = vmul.f32 (%p210_p10), -0.4, %v3963_v54  ;;  %v4105_v56 = vsel (%p210_p10), %vm4009_vm8, %v3961_v1, %v4057_v46  ;;  %v3973_v6 = vld [vmem:[#allocation2 + $0xe0] sm:$0xff] (%p210_p10)  ;;  %v3974_v55 = vld [vmem:[#allocation2 + $0xa8] sm:$0xff] (%p210_p10)  ;;  %v3975_v22 = vld [vmem:[#allocation2 + $0xb8] sm:$0xff] (%p210_p10) }
 0x342   : >> { %3952 = vst [vmem:[#allocation2 + $0x150] sm:$0xff] %v3904_v28  ;;  %v3903_v44 = vadd.f32 %v3849_v24, %v1319_v11  ;;  %4145 = vst [vmem:[%s4982_s6] sm:$0xff] (%p210_p10), %v4097_v30  ;;  %vm4012_vm11 = vcmp.gt.f32.partialorder (%p210_p10), %v3964_v49, 0.0  ;;  %v4060_v38 = vmul.f32 (%p210_p10), -0.4, %v3964_v49  ;;  %vm4013_vm12 = vcmp.gt.f32.partialorder (%p210_p10), %v3965_v15, 0.0  ;;  %v3976_v3 = vld [vmem:[#allocation2 + $0x168] sm:$0xff] (%p210_p10) }
 0x343   : >> { %3940 = vst [vmem:[#allocation2 + $0x38] sm:$0xff] %v3892_v18  ;;  %4153 = vst [vmem:[%s4982_s6 + $0x40] sm:$0xff] (%p210_p10), %v4105_v56  ;;  %v4106_v33 = vsel (%p210_p10), %vm4010_vm9, %v3962_v13, %v4058_v39  ;;  %v4107_v41 = vsel (%p210_p10), %vm4011_vm10, %v3963_v54, %v4059_v8  ;;  %v4061_v62 = vmul.f32 (%p210_p10), -0.4, %v3965_v15  ;;  %vm4014_vm13 = vcmp.gt.f32.partialorder (%p210_p10), %v3966_v4, 0.0  ;;  %v3977_v24 = vld [vmem:[#allocation2 + $0xe8] sm:$0xff] (%p210_p10) }
 0x344   : >> { %3951 = vst [vmem:[#allocation2 + $0x158] sm:$0xff] %v3903_v44  ;;  %4154 = vst [vmem:[%s4982_s6 + $0x48] sm:$0xff] (%p210_p10), %v4106_v33  ;;  %v4108_v37 = vsel (%p210_p10), %vm4012_vm11, %v3964_v49, %v4060_v38  ;;  %v4062_v23 = vmul.f32 (%p210_p10), -0.4, %v3966_v4  ;;  %vm4015_vm14 = vcmp.gt.f32.partialorder (%p210_p10), %v3967_v0, 0.0  ;;  %vm4016_vm15 = vcmp.gt.f32.partialorder (%p210_p10), %v3968_v9, 0.0 }
 0x345   : > { %4155 = vst [vmem:[%s4982_s6 + $0x50] sm:$0xff] %v4107_v41  ;;  %v4063_v52 = vmul.f32 -0.4, %v3967_v0  ;;  %4156 = vst [vmem:[%s4982_s6 + $0x58] sm:$0xff] %v4108_v37  ;;  %v4109_v57 = vsel %vm4013_vm12, %v3965_v15, %v4061_v62  ;;  %v4064_v31 = vmul.f32 -0.4, %v3968_v9 }
 0x346   : > { %vm4017_vm0 = vcmp.gt.f32.partialorder %v3969_v17, 0.0  ;;  %4157 = vst [vmem:[%s4982_s6 + $0x60] sm:$0xff] %v4109_v57  ;;  %v4110_v50 = vsel %vm4014_vm13, %v3966_v4, %v4062_v23  ;;  %v4065_v59 = vmul.f32 -0.4, %v3969_v17  ;;  %vm4018_vm1 = vcmp.gt.f32.partialorder %v3970_v61, 0.0  ;;  %v3981_v30 = vld [vmem:[#allocation2 + $0xa0] sm:$0xff] }
 0x347   : > { %v4111_v25 = vsel %vm4015_vm14, %v3967_v0, %v4063_v52  ;;  %4158 = vst [vmem:[%s4982_s6 + $0x68] sm:$0xff] %v4110_v50  ;;  %v4112_v47 = vsel %vm4016_vm15, %v3968_v9, %v4064_v31  ;;  %v4066_v10 = vmul.f32 -0.4, %v3970_v61  ;;  %vm4019_vm2 = vcmp.gt.f32.partialorder %v3971_v58, 0.0  ;;  %v3982_v27 = vld [vmem:[#allocation2 + $0x170] sm:$0xff]  ;;  %v3984_v40 = vld [vmem:[#allocation2 + $0x140] sm:$0xff] }
 0x348   : > { %4159 = vst [vmem:[%s4982_s6 + $0x70] sm:$0xff] %v4111_v25  ;;  %v4067_v11 = vmul.f32 -0.4, %v3971_v58  ;;  %4160 = vst [vmem:[%s4982_s6 + $0x78] sm:$0xff] %v4112_v47  ;;  %v4113_v45 = vsel %vm4017_vm0, %v3969_v17, %v4065_v59  ;;  %vm4020_vm3 = vcmp.gt.f32.partialorder %v3972_v14, 0.0  ;;  %vm4021_vm4 = vcmp.gt.f32.partialorder %v3973_v6, 0.0 }
 0x349   : > { %v4068_v28 = vmul.f32 -0.4, %v3972_v14  ;;  %4161 = vst [vmem:[%s4982_s6 + $0x80] sm:$0xff] %v4113_v45  ;;  %v4114_v18 = vsel %vm4018_vm1, %v3970_v61, %v4066_v10  ;;  %v4069_v32 = vmul.f32 -0.4, %v3973_v6  ;;  %vm4022_vm5 = vcmp.gt.f32.partialorder %v3974_v55, 0.0 }
 0x34a   : > { %v4115_v44 = vsel %vm4019_vm2, %v3971_v58, %v4067_v11  ;;  %4162 = vst [vmem:[%s4982_s6 + $0x88] sm:$0xff] %v4114_v18  ;;  %v4070_v60 = vmul.f32 -0.4, %v3974_v55  ;;  %vm4023_vm6 = vcmp.gt.f32.partialorder %v3975_v22, 0.0  ;;  %v4071_v29 = vmul.f32 -0.4, %v3975_v22 }
 0x34b   : > { %4163 = vst [vmem:[%s4982_s6 + $0x90] sm:$0xff] %v4115_v44  ;;  %v4116_v48 = vsel %vm4020_vm3, %v3972_v14, %v4068_v28  ;;  %v4117_v36 = vsel %vm4021_vm4, %v3973_v6, %v4069_v32  ;;  %vm4024_vm7 = vcmp.gt.f32.partialorder %v3976_v3, 0.0  ;;  %v4072_v5 = vmul.f32 -0.4, %v3976_v3  ;;  %v3983_v13 = vld [vmem:[#allocation2 + $0xf0] sm:$0xff]  ;;  %v3985_v54 = vld [vmem:[#allocation2 + $0x60] sm:$0xff] }
 0x34c   : > { %4164 = vst [vmem:[%s4982_s6 + $0x98] sm:$0xff] %v4116_v48  ;;  %vm4025_vm8 = vcmp.gt.f32.partialorder %v3977_v24, 0.0  ;;  %4165 = vst [vmem:[%s4982_s6 + $0xa0] sm:$0xff] %v4117_v36  ;;  %v4118_v12 = vsel %vm4022_vm5, %v3974_v55, %v4070_v60  ;;  %v4119_v26 = vsel %vm4023_vm6, %v3975_v22, %v4071_v29  ;;  %v4073_v34 = vmul.f32 -0.4, %v3977_v24  ;;  %v3986_v15 = vld [vmem:[#allocation2 + $0xc8] sm:$0xff] }
 0x34d   : > { %vm4026_vm9 = vcmp.gt.f32.partialorder %v3978_v7, 0.0  ;;  %4166 = vst [vmem:[%s4982_s6 + $0xa8] sm:$0xff] %v4118_v12  ;;  %4167 = vst [vmem:[%s4982_s6 + $0xb0] sm:$0xff] %v4119_v26  ;;  %v4120_v1 = vsel %vm4024_vm7, %v3976_v3, %v4072_v5  ;;  %v4074_v16 = vmul.f32 -0.4, %v3978_v7  ;;  %vm4027_vm10 = vcmp.gt.f32.partialorder %v3979_v20, 0.0 }
 0x34e   : > { %v4075_v42 = vmul.f32 -0.4, %v3979_v20  ;;  %4168 = vst [vmem:[%s4982_s6 + $0xb8] sm:$0xff] %v4120_v1  ;;  %v4121_v19 = vsel %vm4025_vm8, %v3977_v24, %v4073_v34  ;;  %vm4028_vm11 = vcmp.gt.f32.partialorder %v3980_v2, 0.0  ;;  %v4076_v43 = vmul.f32 -0.4, %v3980_v2 }
 0x34f   : > { %vm4029_vm12 = vcmp.gt.f32.partialorder %v3981_v30, 0.0  ;;  %4169 = vst [vmem:[%s4982_s6 + $0xc0] sm:$0xff] %v4121_v19  ;;  %v4122_v51 = vsel %vm4026_vm9, %v3978_v7, %v4074_v16  ;;  %v4077_v49 = vmul.f32 -0.4, %v3981_v30  ;;  %vm4030_vm13 = vcmp.gt.f32.partialorder %v3982_v27, 0.0  ;;  %v3987_v4 = vld [vmem:[#allocation2 + $0x28] sm:$0xff] }
 0x350   : > { %v4123_v21 = vsel %vm4027_vm10, %v3979_v20, %v4075_v42  ;;  %4170 = vst [vmem:[%s4982_s6 + $0xc8] sm:$0xff] %v4122_v51  ;;  %v4124_v35 = vsel %vm4028_vm11, %v3980_v2, %v4076_v43  ;;  %v4078_v53 = vmul.f32 -0.4, %v3982_v27  ;;  %vm4031_vm14 = vcmp.gt.f32.partialorder %v3983_v13, 0.0  ;;  %v3988_v8 = vld [vmem:[#allocation2 + $0x38] sm:$0xff]  ;;  %v3989_v0 = vld [vmem:[#allocation2 + $0xc0] sm:$0xff] }
 0x351   : > { %4171 = vst [vmem:[%s4982_s6 + $0xd0] sm:$0xff] %v4123_v21  ;;  %v4079_v46 = vmul.f32 -0.4, %v3983_v13  ;;  %4172 = vst [vmem:[%s4982_s6 + $0xd8] sm:$0xff] %v4124_v35  ;;  %v4125_v63 = vsel %vm4029_vm12, %v3981_v30, %v4077_v49  ;;  %vm4032_vm15 = vcmp.gt.f32.partialorder %v3984_v40, 0.0  ;;  %vm4033_vm0 = vcmp.gt.f32.partialorder %v3985_v54, 0.0 }
 0x352   : > { %v4080_v39 = vmul.f32 -0.4, %v3984_v40  ;;  %4173 = vst [vmem:[%s4982_s6 + $0xe0] sm:$0xff] %v4125_v63  ;;  %v4126_v56 = vsel %vm4030_vm13, %v3982_v27, %v4078_v53  ;;  %v4081_v9 = vmul.f32 -0.4, %v3985_v54  ;;  %vm4034_vm1 = vcmp.gt.f32.partialorder %v3986_v15, 0.0 }
 0x353   : > { %v4127_v38 = vsel %vm4031_vm14, %v3983_v13, %v4079_v46  ;;  %v3990_v17 = vld [vmem:[#allocation2 + $0x18] sm:$0xff]  ;;  %4174 = vst [vmem:[%s4982_s6 + $0xe8] sm:$0xff] %v4126_v56  ;;  %v4082_v41 = vmul.f32 -0.4, %v3986_v15  ;;  %vm4035_vm2 = vcmp.gt.f32.partialorder %v3987_v4, 0.0  ;;  %vm4036_vm3 = vcmp.gt.f32.partialorder %v3988_v8, 0.0 }
 0x354   : > { %4175 = vst [vmem:[%s4982_s6 + $0xf0] sm:$0xff] %v4127_v38  ;;  %v4128_v33 = vsel %vm4032_vm15, %v3984_v40, %v4080_v39  ;;  %v4083_v62 = vmul.f32 -0.4, %v3987_v4  ;;  %v3991_v61 = vld [vmem:[#allocation2 + $0x98] sm:$0xff]  ;;  %v4129_v37 = vsel %vm4033_vm0, %v3985_v54, %v4081_v9  ;;  %v4084_v23 = vmul.f32 -0.4, %v3988_v8 }
 0x355   : > { %4176 = vst [vmem:[%s4982_s6 + $0xf8] sm:$0xff] %v4128_v33  ;;  %vm4037_vm4 = vcmp.gt.f32.partialorder %v3989_v0, 0.0  ;;  %v3992_v52 = vld [vmem:[#allocation2 + $0x8] sm:$0xff]  ;;  %v3993_v58 = vld [vmem:[#allocation2] sm:$0xff]  ;;  %4177 = vst [vmem:[%s4982_s6 + $0x100] sm:$0xff] %v4129_v37  ;;  %v4130_v57 = vsel %vm4034_vm1, %v3986_v15, %v4082_v41  ;;  %vm4038_vm5 = vcmp.gt.f32.partialorder %v3990_v17, 0.0 }
 0x356   : > { %v4131_v31 = vsel %vm4035_vm2, %v3987_v4, %v4083_v62  ;;  %v4085_v14 = vmul.f32 -0.4, %v3989_v0  ;;  %v3994_v6 = vld [vmem:[#allocation2 + $0x78] sm:$0xff]  ;;  %4178 = vst [vmem:[%s4982_s6 + $0x108] sm:$0xff] %v4130_v57  ;;  %v4132_v50 = vsel %vm4036_vm3, %v3988_v8, %v4084_v23  ;;  %v4086_v25 = vmul.f32 -0.4, %v3990_v17 }
 0x357   : > { %4179 = vst [vmem:[%s4982_s6 + $0x110] sm:$0xff] %v4131_v31  ;;  %vm4039_vm6 = vcmp.gt.f32.partialorder %v3991_v61, 0.0  ;;  %v4087_v59 = vmul.f32 -0.4, %v3991_v61  ;;  %v3995_v55 = vld [vmem:[#allocation2 + $0x50] sm:$0xff]  ;;  %4180 = vst [vmem:[%s4982_s6 + $0x118] sm:$0xff] %v4132_v50 }
 0x358   : > { %v4133_v47 = vsel %vm4037_vm4, %v3989_v0, %v4085_v14  ;;  %vm4040_vm7 = vcmp.gt.f32.partialorder %v3992_v52, 0.0  ;;  %v4088_v10 = vmul.f32 -0.4, %v3992_v52  ;;  %vm4041_vm8 = vcmp.gt.f32.partialorder %v3993_v58, 0.0  ;;  %v3996_v11 = vld [vmem:[#allocation2 + $0x68] sm:$0xff]  ;;  %v3997_v22 = vld [vmem:[#allocation2 + $0x70] sm:$0xff] }
 0x359   : > { %4181 = vst [vmem:[%s4982_s6 + $0x120] sm:$0xff] %v4133_v47  ;;  %v4134_v45 = vsel %vm4038_vm5, %v3990_v17, %v4086_v25  ;;  %v4135_v28 = vsel %vm4039_vm6, %v3991_v61, %v4087_v59  ;;  %v4089_v3 = vmul.f32 -0.4, %v3993_v58  ;;  %vm4042_vm9 = vcmp.gt.f32.partialorder %v3994_v6, 0.0  ;;  %v3998_v24 = vld [vmem:[#allocation2 + $0x30] sm:$0xff]  ;;  %v3999_v7 = vld [vmem:[#allocation2 + $0x158] sm:$0xff] }
 0x35a   : > { %4182 = vst [vmem:[%s4982_s6 + $0x128] sm:$0xff] %v4134_v45  ;;  %4183 = vst [vmem:[%s4982_s6 + $0x130] sm:$0xff] %v4135_v28  ;;  %v4136_v18 = vsel %vm4040_vm7, %v3992_v52, %v4088_v10  ;;  %v4090_v44 = vmul.f32 -0.4, %v3994_v6  ;;  %vm4043_vm10 = vcmp.gt.f32.partialorder %v3995_v55, 0.0  ;;  %vm4044_vm11 = vcmp.gt.f32.partialorder %v3996_v11, 0.0 }
 0x35b   : > { %v4091_v32 = vmul.f32 -0.4, %v3995_v55  ;;  %4184 = vst [vmem:[%s4982_s6 + $0x138] sm:$0xff] %v4136_v18  ;;  %v4137_v48 = vsel %vm4041_vm8, %v3993_v58, %v4089_v3  ;;  %v4092_v60 = vmul.f32 -0.4, %v3996_v11  ;;  %vm4045_vm12 = vcmp.gt.f32.partialorder %v3997_v22, 0.0 }
 0x35c   : > { %v4000_v29 = vld [vmem:[#allocation2 + $0x150] sm:$0xff]  ;;  %4185 = vst [vmem:[%s4982_s6 + $0x140] sm:$0xff] %v4137_v48  ;;  %v4138_v20 = vsel %vm4042_vm9, %v3994_v6, %v4090_v44  ;;  %v4093_v5 = vmul.f32 -0.4, %v3997_v22  ;;  %vm4046_vm13 = vcmp.gt.f32.partialorder %v3998_v24, 0.0  ;;  %vm4047_vm14 = vcmp.gt.f32.partialorder %v3999_v7, 0.0 }
 0x35d   : > { %v4139_v36 = vsel %vm4043_vm10, %v3995_v55, %v4091_v32  ;;  %4186 = vst [vmem:[%s4982_s6 + $0x148] sm:$0xff] %v4138_v20  ;;  %v4140_v2 = vsel %vm4044_vm11, %v3996_v11, %v4092_v60  ;;  %v4094_v30 = vmul.f32 -0.4, %v3998_v24  ;;  %v4095_v12 = vmul.f32 -0.4, %v3999_v7  ;;  %4199 = sbr.rel (!%p4948_p5) target bundleno = 893 (0x37d), region = 39 }
 0x35e   : > { %4187 = vst [vmem:[%s4982_s6 + $0x150] sm:$0xff] %v4139_v36  ;;  %4188 = vst [vmem:[%s4982_s6 + $0x158] sm:$0xff] %v4140_v2  ;;  %v4141_v26 = vsel %vm4045_vm12, %v3997_v22, %v4093_v5  ;;  %vm4048_vm15 = vcmp.gt.f32.partialorder %v4000_v29, 0.0  ;;  %v4096_v34 = vmul.f32 -0.4, %v4000_v29  ;;  %s4753_s25 = smul.u32 (%p4948_p5), 24, %s4863_s11 }
 0x35f   : > { %4189 = vst [vmem:[%s4982_s6 + $0x160] sm:$0xff] %v4141_v26  ;;  %v4142_v27 = vsel %vm4046_vm13, %v3998_v24, %v4094_v30  ;;  %v4143_v1 = vsel %vm4047_vm14, %v3999_v7, %v4095_v12  ;;  %s4754_s26 = smul.u32 (%p4948_p5), 96, %s4867_s12  ;;  %v4329_v42 = vld [vmem:[%s4982_s6] sm:$0xff] (%p4948_p5)  ;;  %v4331_v13 = vld [vmem:[%s4982_s6 + $0x8] sm:$0xff] (%p4948_p5)  ;;  %v4333_v19 = vld [vmem:[%s4982_s6 + $0x10] sm:$0xff] (%p4948_p5) }
 0x360   : > { %4190 = vst [vmem:[%s4982_s6 + $0x168] sm:$0xff] %v4142_v27  ;;  %4191 = vst [vmem:[%s4982_s6 + $0x170] sm:$0xff] %v4143_v1  ;;  %v4144_v16 = vsel %vm4048_vm15, %v4000_v29, %v4096_v34  ;;  %v4335_v43 = vld [vmem:[%s4982_s6 + $0x18] sm:$0xff] (%p4948_p5)  ;;  %v4337_v40 = vld [vmem:[%s4982_s6 + $0x20] sm:$0xff] (%p4948_p5) }
 0x361   : > { %4192 = vst [vmem:[%s4982_s6 + $0x178] sm:$0xff] %v4144_v16  ;;  %v4339_v54 = vld [vmem:[%s4982_s6 + $0x28] sm:$0xff] (%p4948_p5)  ;;  %v4341_v51 = vld [vmem:[%s4982_s6 + $0x30] sm:$0xff] (%p4948_p5)  ;;  %v4343_v21 = vld [vmem:[%s4982_s6 + $0x38] sm:$0xff] (%p4948_p5)  ;;  %s4204_s20 = sadd.s32 (%p4948_p5), %s4754_s26, %s4753_s25 }
 0x362   : > { %v4345_v49 = vld [vmem:[%s4982_s6 + $0x40] sm:$0xff]  ;;  %v4347_v15 = vld [vmem:[%s4982_s6 + $0x48] sm:$0xff]  ;;  %v4349_v35 = vld [vmem:[%s4982_s6 + $0x50] sm:$0xff]  ;;  %s4516_s11 = sshll.u32 %s4204_s20, 3 }
 0x363   : > { %v4351_v53 = vld [vmem:[%s4982_s6 + $0x58] sm:$0xff]  ;;  %v4353_v46 = vld [vmem:[%s4982_s6 + $0x60] sm:$0xff]  ;;  %v4355_v4 = vld [vmem:[%s4982_s6 + $0x68] sm:$0xff]  ;;  %s6344_s28 = scalar_lea.vmem %s6450_s2, %s4516_s11 }
 0x364   : > { %v4357_v63 = vld [vmem:[%s4982_s6 + $0x70] sm:$0xff]  ;;  %v4359_v39 = vld [vmem:[%s4982_s6 + $0x78] sm:$0xff]  ;;  %v4361_v8 = vld [vmem:[%s4982_s6 + $0x80] sm:$0xff]  ;;  %4330 = vst [vmem:[%s6344_s28] sm:$0xff] %v4329_v42 }
 0x365   : > { %v4363_v0 = vld [vmem:[%s4982_s6 + $0x88] sm:$0xff]  ;;  %4332 = vst [vmem:[%s6344_s28 + $0x8] sm:$0xff] %v4331_v13  ;;  %4334 = vst [vmem:[%s6344_s28 + $0x10] sm:$0xff] %v4333_v19  ;;  %v4365_v56 = vld [vmem:[%s4982_s6 + $0x90] sm:$0xff] }
 0x366   : > { %4336 = vst [vmem:[%s6344_s28 + $0x18] sm:$0xff] %v4335_v43  ;;  %4338 = vst [vmem:[%s6344_s28 + $0x20] sm:$0xff] %v4337_v40  ;;  %v4367_v38 = vld [vmem:[%s4982_s6 + $0x98] sm:$0xff]  ;;  %v4369_v9 = vld [vmem:[%s4982_s6 + $0xa0] sm:$0xff] }
 0x367   : > { %4340 = vst [vmem:[%s6344_s28 + $0x28] sm:$0xff] %v4339_v54  ;;  %4342 = vst [vmem:[%s6344_s28 + $0x30] sm:$0xff] %v4341_v51  ;;  %v4371_v17 = vld [vmem:[%s4982_s6 + $0xa8] sm:$0xff]  ;;  %v4373_v33 = vld [vmem:[%s4982_s6 + $0xb0] sm:$0xff] }
 0x368   : > { %4344 = vst [vmem:[%s6344_s28 + $0x38] sm:$0xff] %v4343_v21  ;;  %4346 = vst [vmem:[%s6344_s28 + $0x40] sm:$0xff] %v4345_v49  ;;  %v4375_v41 = vld [vmem:[%s4982_s6 + $0xb8] sm:$0xff]  ;;  %v4377_v62 = vld [vmem:[%s4982_s6 + $0xc0] sm:$0xff] }
 0x369   : > { %4348 = vst [vmem:[%s6344_s28 + $0x48] sm:$0xff] %v4347_v15  ;;  %4350 = vst [vmem:[%s6344_s28 + $0x50] sm:$0xff] %v4349_v35  ;;  %v4379_v61 = vld [vmem:[%s4982_s6 + $0xc8] sm:$0xff]  ;;  %v4381_v37 = vld [vmem:[%s4982_s6 + $0xd0] sm:$0xff] }
 0x36a   : > { %4352 = vst [vmem:[%s6344_s28 + $0x58] sm:$0xff] %v4351_v53  ;;  %4354 = vst [vmem:[%s6344_s28 + $0x60] sm:$0xff] %v4353_v46  ;;  %v4383_v23 = vld [vmem:[%s4982_s6 + $0xd8] sm:$0xff]  ;;  %v4385_v52 = vld [vmem:[%s4982_s6 + $0xe0] sm:$0xff] }
 0x36b   : > { %4356 = vst [vmem:[%s6344_s28 + $0x68] sm:$0xff] %v4355_v4  ;;  %4358 = vst [vmem:[%s6344_s28 + $0x70] sm:$0xff] %v4357_v63  ;;  %v4387_v58 = vld [vmem:[%s4982_s6 + $0xe8] sm:$0xff]  ;;  %v4389_v57 = vld [vmem:[%s4982_s6 + $0xf0] sm:$0xff] }
 0x36c   : > { %4360 = vst [vmem:[%s6344_s28 + $0x78] sm:$0xff] %v4359_v39  ;;  %4362 = vst [vmem:[%s6344_s28 + $0x80] sm:$0xff] %v4361_v8  ;;  %v4391_v31 = vld [vmem:[%s4982_s6 + $0xf8] sm:$0xff]  ;;  %v4393_v14 = vld [vmem:[%s4982_s6 + $0x100] sm:$0xff] }
 0x36d   : > { %4364 = vst [vmem:[%s6344_s28 + $0x88] sm:$0xff] %v4363_v0  ;;  %4366 = vst [vmem:[%s6344_s28 + $0x90] sm:$0xff] %v4365_v56  ;;  %v4395_v6 = vld [vmem:[%s4982_s6 + $0x108] sm:$0xff]  ;;  %v4397_v50 = vld [vmem:[%s4982_s6 + $0x110] sm:$0xff] }
 0x36e   : > { %4368 = vst [vmem:[%s6344_s28 + $0x98] sm:$0xff] %v4367_v38  ;;  %4370 = vst [vmem:[%s6344_s28 + $0xa0] sm:$0xff] %v4369_v9  ;;  %v4399_v25 = vld [vmem:[%s4982_s6 + $0x118] sm:$0xff]  ;;  %v4401_v59 = vld [vmem:[%s4982_s6 + $0x120] sm:$0xff] }
 0x36f   : > { %4372 = vst [vmem:[%s6344_s28 + $0xa8] sm:$0xff] %v4371_v17  ;;  %4374 = vst [vmem:[%s6344_s28 + $0xb0] sm:$0xff] %v4373_v33  ;;  %v4403_v55 = vld [vmem:[%s4982_s6 + $0x128] sm:$0xff]  ;;  %v4405_v47 = vld [vmem:[%s4982_s6 + $0x130] sm:$0xff] }
 0x370   : > { %4376 = vst [vmem:[%s6344_s28 + $0xb8] sm:$0xff] %v4375_v41  ;;  %4378 = vst [vmem:[%s6344_s28 + $0x180] sm:$0xff] %v4377_v62  ;;  %v4407_v10 = vld [vmem:[%s4982_s6 + $0x138] sm:$0xff]  ;;  %v4409_v11 = vld [vmem:[%s4982_s6 + $0x140] sm:$0xff] }
 0x371   : > { %4380 = vst [vmem:[%s6344_s28 + $0x188] sm:$0xff] %v4379_v61  ;;  %4382 = vst [vmem:[%s6344_s28 + $0x190] sm:$0xff] %v4381_v37  ;;  %v4411_v22 = vld [vmem:[%s4982_s6 + $0x148] sm:$0xff]  ;;  %v4413_v45 = vld [vmem:[%s4982_s6 + $0x150] sm:$0xff] }
 0x372   : > { %4384 = vst [vmem:[%s6344_s28 + $0x198] sm:$0xff] %v4383_v23  ;;  %4386 = vst [vmem:[%s6344_s28 + $0x1a0] sm:$0xff] %v4385_v52  ;;  %v4415_v28 = vld [vmem:[%s4982_s6 + $0x158] sm:$0xff]  ;;  %v4417_v3 = vld [vmem:[%s4982_s6 + $0x160] sm:$0xff] }
 0x373   : > { %4388 = vst [vmem:[%s6344_s28 + $0x1a8] sm:$0xff] %v4387_v58  ;;  %4390 = vst [vmem:[%s6344_s28 + $0x1b0] sm:$0xff] %v4389_v57  ;;  %v4419_v24 = vld [vmem:[%s4982_s6 + $0x168] sm:$0xff]  ;;  %v4421_v18 = vld [vmem:[%s4982_s6 + $0x170] sm:$0xff] }
 0x374   : > { %4392 = vst [vmem:[%s6344_s28 + $0x1b8] sm:$0xff] %v4391_v31  ;;  %4394 = vst [vmem:[%s6344_s28 + $0x1c0] sm:$0xff] %v4393_v14  ;;  %v4423_v44 = vld [vmem:[%s4982_s6 + $0x178] sm:$0xff] }
 0x375   : > { %4396 = vst [vmem:[%s6344_s28 + $0x1c8] sm:$0xff] %v4395_v6  ;;  %4398 = vst [vmem:[%s6344_s28 + $0x1d0] sm:$0xff] %v4397_v50 }
 0x376   : > { %4400 = vst [vmem:[%s6344_s28 + $0x1d8] sm:$0xff] %v4399_v25  ;;  %4402 = vst [vmem:[%s6344_s28 + $0x1e0] sm:$0xff] %v4401_v59 }
 0x377   : > { %4404 = vst [vmem:[%s6344_s28 + $0x1e8] sm:$0xff] %v4403_v55  ;;  %4406 = vst [vmem:[%s6344_s28 + $0x1f0] sm:$0xff] %v4405_v47 }
 0x378   : > { %4408 = vst [vmem:[%s6344_s28 + $0x1f8] sm:$0xff] %v4407_v10  ;;  %4410 = vst [vmem:[%s6344_s28 + $0x200] sm:$0xff] %v4409_v11 }
 0x379   : > { %4412 = vst [vmem:[%s6344_s28 + $0x208] sm:$0xff] %v4411_v22  ;;  %4414 = vst [vmem:[%s6344_s28 + $0x210] sm:$0xff] %v4413_v45 }
 0x37a   : > { %4416 = vst [vmem:[%s6344_s28 + $0x218] sm:$0xff] %v4415_v28  ;;  %4418 = vst [vmem:[%s6344_s28 + $0x220] sm:$0xff] %v4417_v3 }
 0x37b   : > { %4420 = vst [vmem:[%s6344_s28 + $0x228] sm:$0xff] %v4419_v24  ;;  %4422 = vst [vmem:[%s6344_s28 + $0x230] sm:$0xff] %v4421_v18 }
 0x37c   : > { %4424 = vst [vmem:[%s6344_s28 + $0x238] sm:$0xff] %v4423_v44 }
 0x37d PF: > { %s12_s15 = sadd.s32 1, %s4879_s15   ;;  %s6479_s9 = smov %s4859_s10 }
 0x37e   : > { %p9_p11 = scmp.ge.s32.totalorder %s12_s15, 6   ;;  %s6480_s10 = smov %s4959_s24 }
 0x37f   : > { %s6481_s11 = smov %s4871_s13  ;;  %s6482_s12 = smov %s4875_s14 }
 0x380   : > { %s6483_s13 = smov %s6486_s16  ;;  %s6484_s14 = smov %s6490_s17 }
 0x381   :  { %11 = sbr.rel (!%p9_p11) target bundleno = 4 (0x4), region = 116 }

</bundles_post_ra>
